<compile_context>
chip_gen: v7x
topology: tpu7x:2x2x1
jax: 0.10.0
libtpu: 0.0.40
codegen_flags: <defaults>
</compile_context>

<pallas_src>
import math

import jax
import jax.numpy as jnp
from jax.experimental import pallas as pl
from jax.experimental.pallas import tpu as pltpu

BN_EPS = 1e-5
BN_SCALE = 1.0 / math.sqrt(1.0 + BN_EPS)


def _vmem_limit_bytes():
    """Generation-aware scoped-VMEM limit (~half of physical, 32 MiB floor)."""
    try:
        cap = int(pltpu.get_tpu_info().vmem_capacity_bytes)
    except Exception:  # interpret mode / older API: fall back conservatively.
        cap = 64 * 1024 * 1024
    return int(max(32 * 1024 * 1024, min(96 * 1024 * 1024, cap // 2)))


_VMEM_LIMIT = _vmem_limit_bytes()


# ---------------------------------------------------------------------------
# Kernel 1: fused "heads" -- three 1x1x1 Unit3Ds + (maxpool3x3x3 -> 1x1x1
# Unit3D), all reading the module input exactly once per sample.
# ---------------------------------------------------------------------------
def inception_heads(x, w0, w1a, w2a, w3):
    """x: (N, D, H, W, Cin) bf16; w*: (Cin, c*) bf16.

    Returns four bf16 tensors of shape (N, D, H, W, c*):
      branch-0 output, branch-1 reduce, branch-2 reduce, branch-3 output.
    """
    N, D, H, W, C = x.shape
    HW = H * W
    c0, c1a, c2a, c3 = w0.shape[1], w1a.shape[1], w2a.shape[1], w3.shape[1]

    # -inf halo so the in-kernel running max matches MaxPool3d(3,1,1).
    # TODO(synk): halo still padded with an XLA op instead of in-kernel masking.
    xp = jnp.pad(x, ((0, 0), (1, 1), (1, 1), (1, 1), (0, 0)),
                 constant_values=-jnp.inf)

    def kernel(x_ref, w0_ref, w1a_ref, w2a_ref, w3_ref,
               o0_ref, o1a_ref, o2a_ref, o3_ref):
        # x_ref: (D+2, H+2, W+2, C) resident padded slab (constant block over d).
        d = pl.program_id(1)

        def unit(lhs, w_ref, o_ref):
            acc = jnp.dot(lhs, w_ref[...], preferred_element_type=jnp.float32)
            o_ref[...] = jnp.maximum(acc * BN_SCALE, 0.0).astype(o_ref.dtype)

        # Branch 3: 27-tap running max, kept in bf16 registers (exact).
        mx = None
        center = None
        for kd in range(3):
            plane = x_ref[d + kd]                       # (H+2, W+2, C) bf16
            if kd == 1:
                center = plane[1:1 + H, 1:1 + W, :].reshape(HW, C)
            for kh in range(3):
                for kw in range(3):
                    tap = plane[kh:kh + H, kw:kw + W, :]
                    mx = tap if mx is None else jnp.maximum(mx, tap)
        pooled = mx.reshape(HW, C)

        # Branches 0 / 1-reduce / 2-reduce share the (unpadded) center plane.
        unit(center, w0_ref, o0_ref)
        unit(center, w1a_ref, o1a_ref)
        unit(center, w2a_ref, o2a_ref)
        unit(pooled, w3_ref, o3_ref)

    n_out = c0 + c1a + c2a + c3
    cost = pl.CostEstimate(
        flops=2 * N * D * HW * C * n_out,
        transcendentals=0,
        bytes_accessed=int(2 * (xp.size + w0.size + w1a.size + w2a.size
                                + w3.size + N * D * HW * n_out)),
    )

    outs = pl.pallas_call(
        kernel,
        out_shape=(
            jax.ShapeDtypeStruct((N, D, HW, c0), jnp.bfloat16),
            jax.ShapeDtypeStruct((N, D, HW, c1a), jnp.bfloat16),
            jax.ShapeDtypeStruct((N, D, HW, c2a), jnp.bfloat16),
            jax.ShapeDtypeStruct((N, D, HW, c3), jnp.bfloat16),
        ),
        grid_spec=pltpu.PrefetchScalarGridSpec(
            num_scalar_prefetch=0,
            grid=(N, D),
            in_specs=[
                # Whole padded slab for sample n; block index constant along d
                # -> DMA'd from HBM once per sample, revisited from VMEM.
                pl.BlockSpec((None, D + 2, H + 2, W + 2, C),
                             lambda n, d: (n, 0, 0, 0, 0)),
                pl.BlockSpec((C, c0), lambda n, d: (0, 0)),
                pl.BlockSpec((C, c1a), lambda n, d: (0, 0)),
                pl.BlockSpec((C, c2a), lambda n, d: (0, 0)),
                pl.BlockSpec((C, c3), lambda n, d: (0, 0)),
            ],
            out_specs=[
                pl.BlockSpec((None, None, HW, c0), lambda n, d: (n, d, 0, 0)),
                pl.BlockSpec((None, None, HW, c1a), lambda n, d: (n, d, 0, 0)),
                pl.BlockSpec((None, None, HW, c2a), lambda n, d: (n, d, 0, 0)),
                pl.BlockSpec((None, None, HW, c3), lambda n, d: (n, d, 0, 0)),
            ],
        ),
        compiler_params=pltpu.CompilerParams(
            # Both axes independent -> both shardable across v7x's 2 TCs.
            dimension_semantics=("parallel", "parallel"),
            vmem_limit_bytes=_VMEM_LIMIT,
        ),
        cost_estimate=cost,
    )(xp, w0, w1a, w2a, w3)

    return tuple(o.reshape(N, D, H, W, o.shape[-1]) for o in outs)


# ---------------------------------------------------------------------------
# Kernel 2: 3x3x3 "same" conv + BN + ReLU with all 27 taps folded into the
# matmul K dimension (one bf16 (HW, 27C) @ (27C, Cout) dot per depth plane).
# ---------------------------------------------------------------------------
def conv3x3x3_bn_relu(x, w_flat):
    """x: (N, D, H, W, C) bf16; w_flat: (27*C, Cout) bf16 (rows: kd, kh, kw, c).

    Returns (N, D, H, W, Cout) bf16.
    """
    N, D, H, W, C = x.shape
    Cout = w_flat.shape[-1]
    HW = H * W

    # Zero halo for the "same" conv.
    # TODO(synk): halo still padded with an XLA op instead of in-kernel masking.
    xp = jnp.pad(x, ((0, 0), (1, 1), (1, 1), (1, 1), (0, 0)))

    def kernel(x_ref, w_ref, o_ref):
        # x_ref: (D+2, H+2, W+2, C) resident padded slab (constant block over d).
        # w_ref: (27*C, Cout) resident (constant index map).
        d = pl.program_id(1)
        taps = []
        for kd in range(3):
            plane = x_ref[d + kd]                       # (H+2, W+2, C) bf16
            for kh in range(3):
                for kw in range(3):
                    taps.append(plane[kh:kh + H, kw:kw + W, :])
        lhs = jnp.concatenate(taps, axis=-1).reshape(HW, 27 * C)  # bf16
        acc = jnp.dot(lhs, w_ref[...], preferred_element_type=jnp.float32)
        o_ref[...] = jnp.maximum(acc * BN_SCALE, 0.0).astype(o_ref.dtype)

    cost = pl.CostEstimate(
        flops=2 * 27 * N * D * HW * C * Cout,
        transcendentals=0,
        bytes_accessed=int(2 * (xp.size + w_flat.size + N * D * HW * Cout)),
    )

    out = pl.pallas_call(
        kernel,
        out_shape=jax.ShapeDtypeStruct((N, D, HW, Cout), jnp.bfloat16),
        grid_spec=pltpu.PrefetchScalarGridSpec(
            num_scalar_prefetch=0,
            grid=(N, D),
            in_specs=[
                pl.BlockSpec((None, D + 2, H + 2, W + 2, C),
                             lambda n, d: (n, 0, 0, 0, 0)),
                pl.BlockSpec((27 * C, Cout), lambda n, d: (0, 0)),
            ],
            out_specs=pl.BlockSpec((None, None, HW, Cout),
                                   lambda n, d: (n, d, 0, 0)),
        ),
        compiler_params=pltpu.CompilerParams(
            dimension_semantics=("parallel", "parallel"),
            vmem_limit_bytes=_VMEM_LIMIT,
        ),
        cost_estimate=cost,
    )(xp, w_flat)
    return out.reshape(N, D, H, W, Cout)


# ---------------------------------------------------------------------------
# Module wrapper (NCDHW in / NCDHW out, like the PyTorch InceptionModule)
# ---------------------------------------------------------------------------
def kaiming_normal(key, shape_dhwio):
    """Matches nn.init.kaiming_normal_ stats: std = sqrt(2 / fan_in)."""
    kd, kh, kw, cin, _ = shape_dhwio
    std = math.sqrt(2.0 / (kd * kh * kw * cin))
    return jax.random.normal(key, shape_dhwio, dtype=jnp.float32) * std


class InceptionModulePallas:
    """Weights stored as (kd, kh, kw, Cin, Cout) (DHWIO), float32 masters."""

    def __init__(self, in_channels, out_channels, key):
        assert len(out_channels) == 6
        c0, c1a, c1b, c2a, c2b, c3 = out_channels
        ks = jax.random.split(key, 6)
        self.w0 = kaiming_normal(ks[0], (1, 1, 1, in_channels, c0))
        self.w1a = kaiming_normal(ks[1], (1, 1, 1, in_channels, c1a))
        self.w1b = kaiming_normal(ks[2], (3, 3, 3, c1a, c1b))
        self.w2a = kaiming_normal(ks[3], (1, 1, 1, in_channels, c2a))
        self.w2b = kaiming_normal(ks[4], (3, 3, 3, c2a, c2b))
        self.w3 = kaiming_normal(ks[5], (1, 1, 1, in_channels, c3))

        # bf16 copies used by the kernels (MXU-native, half the weight traffic).
        bf = jnp.bfloat16
        self.w0_bf = self.w0[0, 0, 0].astype(bf)              # (Cin, c0)
        self.w1a_bf = self.w1a[0, 0, 0].astype(bf)            # (Cin, c1a)
        self.w2a_bf = self.w2a[0, 0, 0].astype(bf)            # (Cin, c2a)
        self.w3_bf = self.w3[0, 0, 0].astype(bf)              # (Cin, c3)
        # Flattened (27*C, Cout) for the tap-folded matmul (row order kd,kh,kw,c).
        self.w1b_bf = self.w1b.astype(bf).reshape(27 * c1a, c1b)
        self.w2b_bf = self.w2b.astype(bf).reshape(27 * c2a, c2b)

    def __call__(self, x_ncdhw):
        # NCDHW (PyTorch) -> NDHWC, bf16 at the kernel boundary.
        x = jnp.transpose(x_ncdhw, (0, 2, 3, 4, 1)).astype(jnp.bfloat16)

        # One kernel: branch 0, the two reduce convs and the pooled branch,
        # all from a single HBM read of x per sample.
        x0, x1a, x2a, x3 = inception_heads(
            x, self.w0_bf, self.w1a_bf, self.w2a_bf, self.w3_bf)

        # Branches 1 / 2: 3x3x3 conv with the 27 taps folded into K.
        x1 = conv3x3x3_bn_relu(x1a, self.w1b_bf)
        x2 = conv3x3x3_bn_relu(x2a, self.w2b_bf)

        # TODO(synk): concat + transpose remain XLA ops at the module boundary.
        out = jnp.concatenate([x0, x1, x2, x3], axis=-1)
        return jnp.transpose(out, (0, 4, 1, 2, 3)).astype(jnp.float32)

    # ---- pure-JAX reference mirroring the kernels' bf16 rounding points ----
    def reference(self, x_ncdhw):
        f32 = jnp.float32

        def rnd(a):
            return a.astype(jnp.bfloat16).astype(f32)

        x = jnp.transpose(x_ncdhw, (0, 2, 3, 4, 1)).astype(f32)
        xb = rnd(x)

        def unit(h, w, pad):
            y = jax.lax.conv_general_dilated(
                rnd(h), rnd(w), window_strides=(1, 1, 1),
                padding=[(pad, pad)] * 3,
                dimension_numbers=("NDHWC", "DHWIO", "NDHWC"),
                preferred_element_type=f32,
                precision=jax.lax.Precision.HIGHEST)
            # Kernels store their outputs in bf16.
            return rnd(jnp.maximum(y * BN_SCALE, 0.0))

        x0 = unit(xb, self.w0, 0)
        x1 = unit(unit(xb, self.w1a, 0), self.w1b, 1)
        x2 = unit(unit(xb, self.w2a, 0), self.w2b, 1)
        pooled = jax.lax.reduce_window(
            xb, -jnp.inf, jax.lax.max,
            window_dimensions=(1, 3, 3, 3, 1),
            window_strides=(1, 1, 1, 1, 1),
            padding=((0, 0), (1, 1), (1, 1), (1, 1), (0, 0)))
        x3 = unit(pooled, self.w3, 0)
        out = jnp.concatenate([x0, x1, x2, x3], axis=-1)
        return jnp.transpose(out, (0, 4, 1, 2, 3))


if __name__ == "__main__":
    key = jax.random.PRNGKey(0)
    k_w, k_x = jax.random.split(key)

    # small shapes (NCDHW, like PyTorch): batch=2, in_channels=4, D=4, H=W=8
    N, Cin, D, H, W = 2, 4, 4, 8, 8
    out_channels = [8, 8, 12, 4, 8, 8]  # -> 8 + 12 + 8 + 8 = 36 output channels

    module = InceptionModulePallas(Cin, out_channels, k_w)
    x = jax.random.normal(k_x, (N, Cin, D, H, W), dtype=jnp.float32)

    fwd = jax.jit(module.__call__)
    y = jax.block_until_ready(fwd(x))
    assert y.shape == (N, 36, D, H, W), y.shape

    y_ref = jax.block_until_ready(jax.jit(module.reference)(x))
    max_err = float(jnp.max(jnp.abs(y - y_ref)))
    # bf16 kernel outputs: allow ~1 bf16 ulp of slack on top of accumulation
    # order differences.
    assert jnp.allclose(y, y_ref, atol=2e-2, rtol=2e-2), max_err

    print("KERNEL_OK")
</pallas_src>

<mosaic_0001>
module attributes {stable_mosaic.version = 11 : i64} {
  func.func @kernel(%arg0: i32, %arg1: i32, %arg2: memref<1x6x10x10x4xbf16, #tpu.memory_space<vmem>>, %arg3: memref<4x8xbf16, #tpu.memory_space<vmem>>, %arg4: memref<4x8xbf16, #tpu.memory_space<vmem>>, %arg5: memref<4x4xbf16, #tpu.memory_space<vmem>>, %arg6: memref<4x8xbf16, #tpu.memory_space<vmem>>, %arg7: memref<1x1x64x8xbf16, #tpu.memory_space<vmem>>, %arg8: memref<1x1x64x8xbf16, #tpu.memory_space<vmem>>, %arg9: memref<1x1x64x4xbf16, #tpu.memory_space<vmem>>, %arg10: memref<1x1x64x8xbf16, #tpu.memory_space<vmem>>) attributes {dimension_semantics = [#tpu.dimension_semantics<parallel>, #tpu.dimension_semantics<parallel>], iteration_bounds = array<i64: 2, 4>, scalar_prefetch = 0 : i64, scratch_operands = 0 : i64, tpu.core_type = #tpu.core_type<tc>, window_params = [{transform_indices = @transform_0, window_bounds = array<i64: 1, 6, 10, 10, 4>}, {pipeline_mode = #tpu.pipeline_mode<synchronous>, transform_indices = @transform_1, window_bounds = array<i64: 4, 8>}, {pipeline_mode = #tpu.pipeline_mode<synchronous>, transform_indices = @transform_2, window_bounds = array<i64: 4, 8>}, {pipeline_mode = #tpu.pipeline_mode<synchronous>, transform_indices = @transform_3, window_bounds = array<i64: 4, 4>}, {pipeline_mode = #tpu.pipeline_mode<synchronous>, transform_indices = @transform_4, window_bounds = array<i64: 4, 8>}, {transform_indices = @transform_5, window_bounds = array<i64: 1, 1, 64, 8>}, {transform_indices = @transform_6, window_bounds = array<i64: 1, 1, 64, 8>}, {transform_indices = @transform_7, window_bounds = array<i64: 1, 1, 64, 4>}, {transform_indices = @transform_8, window_bounds = array<i64: 1, 1, 64, 8>}]} {
    %c0_i32 = arith.constant 0 : i32
    %0 = arith.addi %arg1, %c0_i32 : i32
    %c0 = arith.constant 0 : index
    %1 = arith.index_cast %0 : i32 to index
    %c0_0 = arith.constant 0 : index
    %c0_1 = arith.constant 0 : index
    %c0_2 = arith.constant 0 : index
    %2 = vector.load %arg2[%c0, %1, %c0_0, %c0_1, %c0_2] : memref<1x6x10x10x4xbf16, #tpu.memory_space<vmem>>, vector<1x1x10x10x4xbf16>
    %3 = vector.shape_cast %2 : vector<1x1x10x10x4xbf16> to vector<10x10x4xbf16>
    %4 = vector.extract_strided_slice %3 {offsets = [0, 0, 0], sizes = [8, 8, 4], strides = [1, 1, 1]} : vector<10x10x4xbf16> to vector<8x8x4xbf16>
    %5 = vector.extract_strided_slice %3 {offsets = [0, 1, 0], sizes = [8, 8, 4], strides = [1, 1, 1]} : vector<10x10x4xbf16> to vector<8x8x4xbf16>
    %6 = arith.maximumf %4, %5 : vector<8x8x4xbf16>
    %7 = vector.extract_strided_slice %3 {offsets = [0, 2, 0], sizes = [8, 8, 4], strides = [1, 1, 1]} : vector<10x10x4xbf16> to vector<8x8x4xbf16>
    %8 = arith.maximumf %6, %7 : vector<8x8x4xbf16>
    %9 = vector.extract_strided_slice %3 {offsets = [1, 0, 0], sizes = [8, 8, 4], strides = [1, 1, 1]} : vector<10x10x4xbf16> to vector<8x8x4xbf16>
    %10 = arith.maximumf %8, %9 : vector<8x8x4xbf16>
    %11 = vector.extract_strided_slice %3 {offsets = [1, 1, 0], sizes = [8, 8, 4], strides = [1, 1, 1]} : vector<10x10x4xbf16> to vector<8x8x4xbf16>
    %12 = arith.maximumf %10, %11 : vector<8x8x4xbf16>
    %13 = vector.extract_strided_slice %3 {offsets = [1, 2, 0], sizes = [8, 8, 4], strides = [1, 1, 1]} : vector<10x10x4xbf16> to vector<8x8x4xbf16>
    %14 = arith.maximumf %12, %13 : vector<8x8x4xbf16>
    %15 = vector.extract_strided_slice %3 {offsets = [2, 0, 0], sizes = [8, 8, 4], strides = [1, 1, 1]} : vector<10x10x4xbf16> to vector<8x8x4xbf16>
    %16 = arith.maximumf %14, %15 : vector<8x8x4xbf16>
    %17 = vector.extract_strided_slice %3 {offsets = [2, 1, 0], sizes = [8, 8, 4], strides = [1, 1, 1]} : vector<10x10x4xbf16> to vector<8x8x4xbf16>
    %18 = arith.maximumf %16, %17 : vector<8x8x4xbf16>
    %19 = vector.extract_strided_slice %3 {offsets = [2, 2, 0], sizes = [8, 8, 4], strides = [1, 1, 1]} : vector<10x10x4xbf16> to vector<8x8x4xbf16>
    %20 = arith.maximumf %18, %19 : vector<8x8x4xbf16>
    %c1_i32 = arith.constant 1 : i32
    %21 = arith.addi %arg1, %c1_i32 : i32
    %c0_3 = arith.constant 0 : index
    %22 = arith.index_cast %21 : i32 to index
    %c0_4 = arith.constant 0 : index
    %c0_5 = arith.constant 0 : index
    %c0_6 = arith.constant 0 : index
    %23 = vector.load %arg2[%c0_3, %22, %c0_4, %c0_5, %c0_6] : memref<1x6x10x10x4xbf16, #tpu.memory_space<vmem>>, vector<1x1x10x10x4xbf16>
    %24 = vector.shape_cast %23 : vector<1x1x10x10x4xbf16> to vector<10x10x4xbf16>
    %25 = vector.extract_strided_slice %24 {offsets = [1, 1, 0], sizes = [8, 8, 4], strides = [1, 1, 1]} : vector<10x10x4xbf16> to vector<8x8x4xbf16>
    %26 = vector.shape_cast %25 : vector<8x8x4xbf16> to vector<64x4xbf16>
    %27 = vector.extract_strided_slice %24 {offsets = [0, 0, 0], sizes = [8, 8, 4], strides = [1, 1, 1]} : vector<10x10x4xbf16> to vector<8x8x4xbf16>
    %28 = arith.maximumf %20, %27 : vector<8x8x4xbf16>
    %29 = vector.extract_strided_slice %24 {offsets = [0, 1, 0], sizes = [8, 8, 4], strides = [1, 1, 1]} : vector<10x10x4xbf16> to vector<8x8x4xbf16>
    %30 = arith.maximumf %28, %29 : vector<8x8x4xbf16>
    %31 = vector.extract_strided_slice %24 {offsets = [0, 2, 0], sizes = [8, 8, 4], strides = [1, 1, 1]} : vector<10x10x4xbf16> to vector<8x8x4xbf16>
    %32 = arith.maximumf %30, %31 : vector<8x8x4xbf16>
    %33 = vector.extract_strided_slice %24 {offsets = [1, 0, 0], sizes = [8, 8, 4], strides = [1, 1, 1]} : vector<10x10x4xbf16> to vector<8x8x4xbf16>
    %34 = arith.maximumf %32, %33 : vector<8x8x4xbf16>
    %35 = vector.extract_strided_slice %24 {offsets = [1, 1, 0], sizes = [8, 8, 4], strides = [1, 1, 1]} : vector<10x10x4xbf16> to vector<8x8x4xbf16>
    %36 = arith.maximumf %34, %35 : vector<8x8x4xbf16>
    %37 = vector.extract_strided_slice %24 {offsets = [1, 2, 0], sizes = [8, 8, 4], strides = [1, 1, 1]} : vector<10x10x4xbf16> to vector<8x8x4xbf16>
    %38 = arith.maximumf %36, %37 : vector<8x8x4xbf16>
    %39 = vector.extract_strided_slice %24 {offsets = [2, 0, 0], sizes = [8, 8, 4], strides = [1, 1, 1]} : vector<10x10x4xbf16> to vector<8x8x4xbf16>
    %40 = arith.maximumf %38, %39 : vector<8x8x4xbf16>
    %41 = vector.extract_strided_slice %24 {offsets = [2, 1, 0], sizes = [8, 8, 4], strides = [1, 1, 1]} : vector<10x10x4xbf16> to vector<8x8x4xbf16>
    %42 = arith.maximumf %40, %41 : vector<8x8x4xbf16>
    %43 = vector.extract_strided_slice %24 {offsets = [2, 2, 0], sizes = [8, 8, 4], strides = [1, 1, 1]} : vector<10x10x4xbf16> to vector<8x8x4xbf16>
    %44 = arith.maximumf %42, %43 : vector<8x8x4xbf16>
    %c2_i32 = arith.constant 2 : i32
    %45 = arith.addi %arg1, %c2_i32 : i32
    %c0_7 = arith.constant 0 : index
    %46 = arith.index_cast %45 : i32 to index
    %c0_8 = arith.constant 0 : index
    %c0_9 = arith.constant 0 : index
    %c0_10 = arith.constant 0 : index
    %47 = vector.load %arg2[%c0_7, %46, %c0_8, %c0_9, %c0_10] : memref<1x6x10x10x4xbf16, #tpu.memory_space<vmem>>, vector<1x1x10x10x4xbf16>
    %48 = vector.shape_cast %47 : vector<1x1x10x10x4xbf16> to vector<10x10x4xbf16>
    %49 = vector.extract_strided_slice %48 {offsets = [0, 0, 0], sizes = [8, 8, 4], strides = [1, 1, 1]} : vector<10x10x4xbf16> to vector<8x8x4xbf16>
    %50 = arith.maximumf %44, %49 : vector<8x8x4xbf16>
    %51 = vector.extract_strided_slice %48 {offsets = [0, 1, 0], sizes = [8, 8, 4], strides = [1, 1, 1]} : vector<10x10x4xbf16> to vector<8x8x4xbf16>
    %52 = arith.maximumf %50, %51 : vector<8x8x4xbf16>
    %53 = vector.extract_strided_slice %48 {offsets = [0, 2, 0], sizes = [8, 8, 4], strides = [1, 1, 1]} : vector<10x10x4xbf16> to vector<8x8x4xbf16>
    %54 = arith.maximumf %52, %53 : vector<8x8x4xbf16>
    %55 = vector.extract_strided_slice %48 {offsets = [1, 0, 0], sizes = [8, 8, 4], strides = [1, 1, 1]} : vector<10x10x4xbf16> to vector<8x8x4xbf16>
    %56 = arith.maximumf %54, %55 : vector<8x8x4xbf16>
    %57 = vector.extract_strided_slice %48 {offsets = [1, 1, 0], sizes = [8, 8, 4], strides = [1, 1, 1]} : vector<10x10x4xbf16> to vector<8x8x4xbf16>
    %58 = arith.maximumf %56, %57 : vector<8x8x4xbf16>
    %59 = vector.extract_strided_slice %48 {offsets = [1, 2, 0], sizes = [8, 8, 4], strides = [1, 1, 1]} : vector<10x10x4xbf16> to vector<8x8x4xbf16>
    %60 = arith.maximumf %58, %59 : vector<8x8x4xbf16>
    %61 = vector.extract_strided_slice %48 {offsets = [2, 0, 0], sizes = [8, 8, 4], strides = [1, 1, 1]} : vector<10x10x4xbf16> to vector<8x8x4xbf16>
    %62 = arith.maximumf %60, %61 : vector<8x8x4xbf16>
    %63 = vector.extract_strided_slice %48 {offsets = [2, 1, 0], sizes = [8, 8, 4], strides = [1, 1, 1]} : vector<10x10x4xbf16> to vector<8x8x4xbf16>
    %64 = arith.maximumf %62, %63 : vector<8x8x4xbf16>
    %65 = vector.extract_strided_slice %48 {offsets = [2, 2, 0], sizes = [8, 8, 4], strides = [1, 1, 1]} : vector<10x10x4xbf16> to vector<8x8x4xbf16>
    %66 = arith.maximumf %64, %65 : vector<8x8x4xbf16>
    %67 = vector.shape_cast %66 : vector<8x8x4xbf16> to vector<64x4xbf16>
    %c0_11 = arith.constant 0 : index
    %c0_12 = arith.constant 0 : index
    %68 = vector.load %arg3[%c0_11, %c0_12] : memref<4x8xbf16, #tpu.memory_space<vmem>>, vector<4x8xbf16>
    %cst = arith.constant dense<0.000000e+00> : vector<64x8xf32>
    %69 = tpu.matmul %26, %68, %cst {dimension_numbers = #tpu.dot_dimension_numbers<[1], [0], [0], [1], [0, 0, 1, 1], [], []>} : vector<64x4xbf16>, vector<4x8xbf16>, vector<64x8xf32> -> vector<64x8xf32>
    %cst_13 = arith.constant 0.999994993 : f32
    %70 = vector.broadcast %cst_13 : f32 to vector<64x8xf32>
    %71 = arith.mulf %69, %70 : vector<64x8xf32>
    %cst_14 = arith.constant 0.000000e+00 : f32
    %72 = vector.broadcast %cst_14 : f32 to vector<64x8xf32>
    %73 = arith.maximumf %71, %72 : vector<64x8xf32>
    %74 = arith.truncf %73 : vector<64x8xf32> to vector<64x8xbf16>
    %c0_15 = arith.constant 0 : index
    %c0_16 = arith.constant 0 : index
    %c0_17 = arith.constant 0 : index
    %c0_18 = arith.constant 0 : index
    %75 = vector.load %arg7[%c0_15, %c0_16, %c0_17, %c0_18] : memref<1x1x64x8xbf16, #tpu.memory_space<vmem>>, vector<1x1x64x8xbf16>
    %76 = vector.shape_cast %75 : vector<1x1x64x8xbf16> to vector<64x8xbf16>
    %77 = vector.shape_cast %74 : vector<64x8xbf16> to vector<1x1x64x8xbf16>
    tpu.vector_store %arg7[%c0_15, %c0_16, %c0_17, %c0_18], %77 {strides = array<i32>} : memref<1x1x64x8xbf16, #tpu.memory_space<vmem>>, vector<1x1x64x8xbf16>,
    %c0_19 = arith.constant 0 : index
    %c0_20 = arith.constant 0 : index
    %78 = vector.load %arg4[%c0_19, %c0_20] : memref<4x8xbf16, #tpu.memory_space<vmem>>, vector<4x8xbf16>
    %cst_21 = arith.constant dense<0.000000e+00> : vector<64x8xf32>
    %79 = tpu.matmul %26, %78, %cst_21 {dimension_numbers = #tpu.dot_dimension_numbers<[1], [0], [0], [1], [0, 0, 1, 1], [], []>} : vector<64x4xbf16>, vector<4x8xbf16>, vector<64x8xf32> -> vector<64x8xf32>
    %cst_22 = arith.constant 0.999994993 : f32
    %80 = vector.broadcast %cst_22 : f32 to vector<64x8xf32>
    %81 = arith.mulf %79, %80 : vector<64x8xf32>
    %cst_23 = arith.constant 0.000000e+00 : f32
    %82 = vector.broadcast %cst_23 : f32 to vector<64x8xf32>
    %83 = arith.maximumf %81, %82 : vector<64x8xf32>
    %84 = arith.truncf %83 : vector<64x8xf32> to vector<64x8xbf16>
    %c0_24 = arith.constant 0 : index
    %c0_25 = arith.constant 0 : index
    %c0_26 = arith.constant 0 : index
    %c0_27 = arith.constant 0 : index
    %85 = vector.load %arg8[%c0_24, %c0_25, %c0_26, %c0_27] : memref<1x1x64x8xbf16, #tpu.memory_space<vmem>>, vector<1x1x64x8xbf16>
    %86 = vector.shape_cast %85 : vector<1x1x64x8xbf16> to vector<64x8xbf16>
    %87 = vector.shape_cast %84 : vector<64x8xbf16> to vector<1x1x64x8xbf16>
    tpu.vector_store %arg8[%c0_24, %c0_25, %c0_26, %c0_27], %87 {strides = array<i32>} : memref<1x1x64x8xbf16, #tpu.memory_space<vmem>>, vector<1x1x64x8xbf16>,
    %c0_28 = arith.constant 0 : index
    %c0_29 = arith.constant 0 : index
    %88 = vector.load %arg5[%c0_28, %c0_29] : memref<4x4xbf16, #tpu.memory_space<vmem>>, vector<4x4xbf16>
    %cst_30 = arith.constant dense<0.000000e+00> : vector<64x4xf32>
    %89 = tpu.matmul %26, %88, %cst_30 {dimension_numbers = #tpu.dot_dimension_numbers<[1], [0], [0], [1], [0, 0, 1, 1], [], []>} : vector<64x4xbf16>, vector<4x4xbf16>, vector<64x4xf32> -> vector<64x4xf32>
    %cst_31 = arith.constant 0.999994993 : f32
    %90 = vector.broadcast %cst_31 : f32 to vector<64x4xf32>
    %91 = arith.mulf %89, %90 : vector<64x4xf32>
    %cst_32 = arith.constant 0.000000e+00 : f32
    %92 = vector.broadcast %cst_32 : f32 to vector<64x4xf32>
    %93 = arith.maximumf %91, %92 : vector<64x4xf32>
    %94 = arith.truncf %93 : vector<64x4xf32> to vector<64x4xbf16>
    %c0_33 = arith.constant 0 : index
    %c0_34 = arith.constant 0 : index
    %c0_35 = arith.constant 0 : index
    %c0_36 = arith.constant 0 : index
    %95 = vector.load %arg9[%c0_33, %c0_34, %c0_35, %c0_36] : memref<1x1x64x4xbf16, #tpu.memory_space<vmem>>, vector<1x1x64x4xbf16>
    %96 = vector.shape_cast %95 : vector<1x1x64x4xbf16> to vector<64x4xbf16>
    %97 = vector.shape_cast %94 : vector<64x4xbf16> to vector<1x1x64x4xbf16>
    tpu.vector_store %arg9[%c0_33, %c0_34, %c0_35, %c0_36], %97 {strides = array<i32>} : memref<1x1x64x4xbf16, #tpu.memory_space<vmem>>, vector<1x1x64x4xbf16>,
    %c0_37 = arith.constant 0 : index
    %c0_38 = arith.constant 0 : index
    %98 = vector.load %arg6[%c0_37, %c0_38] : memref<4x8xbf16, #tpu.memory_space<vmem>>, vector<4x8xbf16>
    %cst_39 = arith.constant dense<0.000000e+00> : vector<64x8xf32>
    %99 = tpu.matmul %67, %98, %cst_39 {dimension_numbers = #tpu.dot_dimension_numbers<[1], [0], [0], [1], [0, 0, 1, 1], [], []>} : vector<64x4xbf16>, vector<4x8xbf16>, vector<64x8xf32> -> vector<64x8xf32>
    %cst_40 = arith.constant 0.999994993 : f32
    %100 = vector.broadcast %cst_40 : f32 to vector<64x8xf32>
    %101 = arith.mulf %99, %100 : vector<64x8xf32>
    %cst_41 = arith.constant 0.000000e+00 : f32
    %102 = vector.broadcast %cst_41 : f32 to vector<64x8xf32>
    %103 = arith.maximumf %101, %102 : vector<64x8xf32>
    %104 = arith.truncf %103 : vector<64x8xf32> to vector<64x8xbf16>
    %c0_42 = arith.constant 0 : index
    %c0_43 = arith.constant 0 : index
    %c0_44 = arith.constant 0 : index
    %c0_45 = arith.constant 0 : index
    %105 = vector.load %arg10[%c0_42, %c0_43, %c0_44, %c0_45] : memref<1x1x64x8xbf16, #tpu.memory_space<vmem>>, vector<1x1x64x8xbf16>
    %106 = vector.shape_cast %105 : vector<1x1x64x8xbf16> to vector<64x8xbf16>
    %107 = vector.shape_cast %104 : vector<64x8xbf16> to vector<1x1x64x8xbf16>
    tpu.vector_store %arg10[%c0_42, %c0_43, %c0_44, %c0_45], %107 {strides = array<i32>} : memref<1x1x64x8xbf16, #tpu.memory_space<vmem>>, vector<1x1x64x8xbf16>,
    return
  }
  func.func @transform_0(%arg0: i32, %arg1: i32) -> (i32, i32, i32, i32, i32) {
    %c0_i32 = arith.constant 0 : i32
    %c0_i32_0 = arith.constant 0 : i32
    %c0_i32_1 = arith.constant 0 : i32
    %c0_i32_2 = arith.constant 0 : i32
    %c0_i32_3 = arith.constant 0 : i32
    return %arg0, %c0_i32, %c0_i32_0, %c0_i32_1, %c0_i32_2 : i32, i32, i32, i32, i32
  }
  func.func @transform_1(%arg0: i32, %arg1: i32) -> (i32, i32) {
    %c0_i32 = arith.constant 0 : i32
    %c0_i32_0 = arith.constant 0 : i32
    %c0_i32_1 = arith.constant 0 : i32
    return %c0_i32, %c0_i32_0 : i32, i32
  }
  func.func @transform_2(%arg0: i32, %arg1: i32) -> (i32, i32) {
    %c0_i32 = arith.constant 0 : i32
    %c0_i32_0 = arith.constant 0 : i32
    %c0_i32_1 = arith.constant 0 : i32
    return %c0_i32, %c0_i32_0 : i32, i32
  }
  func.func @transform_3(%arg0: i32, %arg1: i32) -> (i32, i32) {
    %c0_i32 = arith.constant 0 : i32
    %c0_i32_0 = arith.constant 0 : i32
    %c0_i32_1 = arith.constant 0 : i32
    return %c0_i32, %c0_i32_0 : i32, i32
  }
  func.func @transform_4(%arg0: i32, %arg1: i32) -> (i32, i32) {
    %c0_i32 = arith.constant 0 : i32
    %c0_i32_0 = arith.constant 0 : i32
    %c0_i32_1 = arith.constant 0 : i32
    return %c0_i32, %c0_i32_0 : i32, i32
  }
  func.func @transform_5(%arg0: i32, %arg1: i32) -> (i32, i32, i32, i32) {
    %c0_i32 = arith.constant 0 : i32
    %c0_i32_0 = arith.constant 0 : i32
    %c0_i32_1 = arith.constant 0 : i32
    return %arg0, %arg1, %c0_i32, %c0_i32_0 : i32, i32, i32, i32
  }
  func.func @transform_6(%arg0: i32, %arg1: i32) -> (i32, i32, i32, i32) {
    %c0_i32 = arith.constant 0 : i32
    %c0_i32_0 = arith.constant 0 : i32
    %c0_i32_1 = arith.constant 0 : i32
    return %arg0, %arg1, %c0_i32, %c0_i32_0 : i32, i32, i32, i32
  }
  func.func @transform_7(%arg0: i32, %arg1: i32) -> (i32, i32, i32, i32) {
    %c0_i32 = arith.constant 0 : i32
    %c0_i32_0 = arith.constant 0 : i32
    %c0_i32_1 = arith.constant 0 : i32
    return %arg0, %arg1, %c0_i32, %c0_i32_0 : i32, i32, i32, i32
  }
  func.func @transform_8(%arg0: i32, %arg1: i32) -> (i32, i32, i32, i32) {
    %c0_i32 = arith.constant 0 : i32
    %c0_i32_0 = arith.constant 0 : i32
    %c0_i32_1 = arith.constant 0 : i32
    return %arg0, %arg1, %c0_i32, %c0_i32_0 : i32, i32, i32, i32
  }
}

module attributes {stable_mosaic.version = 11 : i64} {
  func.func @kernel(%arg0: i32, %arg1: i32, %arg2: memref<1x6x10x10x8xbf16, #tpu.memory_space<vmem>>, %arg3: memref<216x12xbf16, #tpu.memory_space<vmem>>, %arg4: memref<1x1x64x12xbf16, #tpu.memory_space<vmem>>) attributes {dimension_semantics = [#tpu.dimension_semantics<parallel>, #tpu.dimension_semantics<parallel>], iteration_bounds = array<i64: 2, 4>, scalar_prefetch = 0 : i64, scratch_operands = 0 : i64, tpu.core_type = #tpu.core_type<tc>, window_params = [{transform_indices = @transform_0, window_bounds = array<i64: 1, 6, 10, 10, 8>}, {pipeline_mode = #tpu.pipeline_mode<synchronous>, transform_indices = @transform_1, window_bounds = array<i64: 216, 12>}, {transform_indices = @transform_2, window_bounds = array<i64: 1, 1, 64, 12>}]} {
    %c0_i32 = arith.constant 0 : i32
    %0 = arith.addi %arg1, %c0_i32 : i32
    %c0 = arith.constant 0 : index
    %1 = arith.index_cast %0 : i32 to index
    %c0_0 = arith.constant 0 : index
    %c0_1 = arith.constant 0 : index
    %c0_2 = arith.constant 0 : index
    %2 = vector.load %arg2[%c0, %1, %c0_0, %c0_1, %c0_2] : memref<1x6x10x10x8xbf16, #tpu.memory_space<vmem>>, vector<1x1x10x10x8xbf16>
    %3 = vector.shape_cast %2 : vector<1x1x10x10x8xbf16> to vector<10x10x8xbf16>
    %4 = vector.extract_strided_slice %3 {offsets = [0, 0, 0], sizes = [8, 8, 8], strides = [1, 1, 1]} : vector<10x10x8xbf16> to vector<8x8x8xbf16>
    %5 = vector.extract_strided_slice %3 {offsets = [0, 1, 0], sizes = [8, 8, 8], strides = [1, 1, 1]} : vector<10x10x8xbf16> to vector<8x8x8xbf16>
    %6 = vector.extract_strided_slice %3 {offsets = [0, 2, 0], sizes = [8, 8, 8], strides = [1, 1, 1]} : vector<10x10x8xbf16> to vector<8x8x8xbf16>
    %7 = vector.extract_strided_slice %3 {offsets = [1, 0, 0], sizes = [8, 8, 8], strides = [1, 1, 1]} : vector<10x10x8xbf16> to vector<8x8x8xbf16>
    %8 = vector.extract_strided_slice %3 {offsets = [1, 1, 0], sizes = [8, 8, 8], strides = [1, 1, 1]} : vector<10x10x8xbf16> to vector<8x8x8xbf16>
    %9 = vector.extract_strided_slice %3 {offsets = [1, 2, 0], sizes = [8, 8, 8], strides = [1, 1, 1]} : vector<10x10x8xbf16> to vector<8x8x8xbf16>
    %10 = vector.extract_strided_slice %3 {offsets = [2, 0, 0], sizes = [8, 8, 8], strides = [1, 1, 1]} : vector<10x10x8xbf16> to vector<8x8x8xbf16>
    %11 = vector.extract_strided_slice %3 {offsets = [2, 1, 0], sizes = [8, 8, 8], strides = [1, 1, 1]} : vector<10x10x8xbf16> to vector<8x8x8xbf16>
    %12 = vector.extract_strided_slice %3 {offsets = [2, 2, 0], sizes = [8, 8, 8], strides = [1, 1, 1]} : vector<10x10x8xbf16> to vector<8x8x8xbf16>
    %c1_i32 = arith.constant 1 : i32
    %13 = arith.addi %arg1, %c1_i32 : i32
    %c0_3 = arith.constant 0 : index
    %14 = arith.index_cast %13 : i32 to index
    %c0_4 = arith.constant 0 : index
    %c0_5 = arith.constant 0 : index
    %c0_6 = arith.constant 0 : index
    %15 = vector.load %arg2[%c0_3, %14, %c0_4, %c0_5, %c0_6] : memref<1x6x10x10x8xbf16, #tpu.memory_space<vmem>>, vector<1x1x10x10x8xbf16>
    %16 = vector.shape_cast %15 : vector<1x1x10x10x8xbf16> to vector<10x10x8xbf16>
    %17 = vector.extract_strided_slice %16 {offsets = [0, 0, 0], sizes = [8, 8, 8], strides = [1, 1, 1]} : vector<10x10x8xbf16> to vector<8x8x8xbf16>
    %18 = vector.extract_strided_slice %16 {offsets = [0, 1, 0], sizes = [8, 8, 8], strides = [1, 1, 1]} : vector<10x10x8xbf16> to vector<8x8x8xbf16>
    %19 = vector.extract_strided_slice %16 {offsets = [0, 2, 0], sizes = [8, 8, 8], strides = [1, 1, 1]} : vector<10x10x8xbf16> to vector<8x8x8xbf16>
    %20 = vector.extract_strided_slice %16 {offsets = [1, 0, 0], sizes = [8, 8, 8], strides = [1, 1, 1]} : vector<10x10x8xbf16> to vector<8x8x8xbf16>
    %21 = vector.extract_strided_slice %16 {offsets = [1, 1, 0], sizes = [8, 8, 8], strides = [1, 1, 1]} : vector<10x10x8xbf16> to vector<8x8x8xbf16>
    %22 = vector.extract_strided_slice %16 {offsets = [1, 2, 0], sizes = [8, 8, 8], strides = [1, 1, 1]} : vector<10x10x8xbf16> to vector<8x8x8xbf16>
    %23 = vector.extract_strided_slice %16 {offsets = [2, 0, 0], sizes = [8, 8, 8], strides = [1, 1, 1]} : vector<10x10x8xbf16> to vector<8x8x8xbf16>
    %24 = vector.extract_strided_slice %16 {offsets = [2, 1, 0], sizes = [8, 8, 8], strides = [1, 1, 1]} : vector<10x10x8xbf16> to vector<8x8x8xbf16>
    %25 = vector.extract_strided_slice %16 {offsets = [2, 2, 0], sizes = [8, 8, 8], strides = [1, 1, 1]} : vector<10x10x8xbf16> to vector<8x8x8xbf16>
    %c2_i32 = arith.constant 2 : i32
    %26 = arith.addi %arg1, %c2_i32 : i32
    %c0_7 = arith.constant 0 : index
    %27 = arith.index_cast %26 : i32 to index
    %c0_8 = arith.constant 0 : index
    %c0_9 = arith.constant 0 : index
    %c0_10 = arith.constant 0 : index
    %28 = vector.load %arg2[%c0_7, %27, %c0_8, %c0_9, %c0_10] : memref<1x6x10x10x8xbf16, #tpu.memory_space<vmem>>, vector<1x1x10x10x8xbf16>
    %29 = vector.shape_cast %28 : vector<1x1x10x10x8xbf16> to vector<10x10x8xbf16>
    %30 = vector.extract_strided_slice %29 {offsets = [0, 0, 0], sizes = [8, 8, 8], strides = [1, 1, 1]} : vector<10x10x8xbf16> to vector<8x8x8xbf16>
    %31 = vector.extract_strided_slice %29 {offsets = [0, 1, 0], sizes = [8, 8, 8], strides = [1, 1, 1]} : vector<10x10x8xbf16> to vector<8x8x8xbf16>
    %32 = vector.extract_strided_slice %29 {offsets = [0, 2, 0], sizes = [8, 8, 8], strides = [1, 1, 1]} : vector<10x10x8xbf16> to vector<8x8x8xbf16>
    %33 = vector.extract_strided_slice %29 {offsets = [1, 0, 0], sizes = [8, 8, 8], strides = [1, 1, 1]} : vector<10x10x8xbf16> to vector<8x8x8xbf16>
    %34 = vector.extract_strided_slice %29 {offsets = [1, 1, 0], sizes = [8, 8, 8], strides = [1, 1, 1]} : vector<10x10x8xbf16> to vector<8x8x8xbf16>
    %35 = vector.extract_strided_slice %29 {offsets = [1, 2, 0], sizes = [8, 8, 8], strides = [1, 1, 1]} : vector<10x10x8xbf16> to vector<8x8x8xbf16>
    %36 = vector.extract_strided_slice %29 {offsets = [2, 0, 0], sizes = [8, 8, 8], strides = [1, 1, 1]} : vector<10x10x8xbf16> to vector<8x8x8xbf16>
    %37 = vector.extract_strided_slice %29 {offsets = [2, 1, 0], sizes = [8, 8, 8], strides = [1, 1, 1]} : vector<10x10x8xbf16> to vector<8x8x8xbf16>
    %38 = vector.extract_strided_slice %29 {offsets = [2, 2, 0], sizes = [8, 8, 8], strides = [1, 1, 1]} : vector<10x10x8xbf16> to vector<8x8x8xbf16>
    %39 = tpu.concatenate %4, %5, %6, %7, %8, %9, %10, %11, %12, %17, %18, %19, %20, %21, %22, %23 in 2 : vector<8x8x8xbf16>, vector<8x8x8xbf16>, vector<8x8x8xbf16>, vector<8x8x8xbf16>, vector<8x8x8xbf16>, vector<8x8x8xbf16>, vector<8x8x8xbf16>, vector<8x8x8xbf16>, vector<8x8x8xbf16>, vector<8x8x8xbf16>, vector<8x8x8xbf16>, vector<8x8x8xbf16>, vector<8x8x8xbf16>, vector<8x8x8xbf16>, vector<8x8x8xbf16>, vector<8x8x8xbf16> -> vector<8x8x128xbf16>
    %40 = tpu.concatenate %24, %25, %30, %31, %32, %33, %34, %35, %36, %37, %38 in 2 : vector<8x8x8xbf16>, vector<8x8x8xbf16>, vector<8x8x8xbf16>, vector<8x8x8xbf16>, vector<8x8x8xbf16>, vector<8x8x8xbf16>, vector<8x8x8xbf16>, vector<8x8x8xbf16>, vector<8x8x8xbf16>, vector<8x8x8xbf16>, vector<8x8x8xbf16> -> vector<8x8x88xbf16>
    %41 = tpu.concatenate %39, %40 in 2 : vector<8x8x128xbf16>, vector<8x8x88xbf16> -> vector<8x8x216xbf16>
    %42 = vector.shape_cast %41 : vector<8x8x216xbf16> to vector<64x216xbf16>
    %c0_11 = arith.constant 0 : index
    %c0_12 = arith.constant 0 : index
    %43 = vector.load %arg3[%c0_11, %c0_12] : memref<216x12xbf16, #tpu.memory_space<vmem>>, vector<216x12xbf16>
    %cst = arith.constant dense<0.000000e+00> : vector<64x12xf32>
    %44 = tpu.matmul %42, %43, %cst {dimension_numbers = #tpu.dot_dimension_numbers<[1], [0], [0], [1], [0, 0, 1, 1], [], []>} : vector<64x216xbf16>, vector<216x12xbf16>, vector<64x12xf32> -> vector<64x12xf32>
    %cst_13 = arith.constant 0.999994993 : f32
    %45 = vector.broadcast %cst_13 : f32 to vector<64x12xf32>
    %46 = arith.mulf %44, %45 : vector<64x12xf32>
    %cst_14 = arith.constant 0.000000e+00 : f32
    %47 = vector.broadcast %cst_14 : f32 to vector<64x12xf32>
    %48 = arith.maximumf %46, %47 : vector<64x12xf32>
    %49 = arith.truncf %48 : vector<64x12xf32> to vector<64x12xbf16>
    %c0_15 = arith.constant 0 : index
    %c0_16 = arith.constant 0 : index
    %c0_17 = arith.constant 0 : index
    %c0_18 = arith.constant 0 : index
    %50 = vector.load %arg4[%c0_15, %c0_16, %c0_17, %c0_18] : memref<1x1x64x12xbf16, #tpu.memory_space<vmem>>, vector<1x1x64x12xbf16>
    %51 = vector.shape_cast %50 : vector<1x1x64x12xbf16> to vector<64x12xbf16>
    %52 = vector.shape_cast %49 : vector<64x12xbf16> to vector<1x1x64x12xbf16>
    tpu.vector_store %arg4[%c0_15, %c0_16, %c0_17, %c0_18], %52 {strides = array<i32>} : memref<1x1x64x12xbf16, #tpu.memory_space<vmem>>, vector<1x1x64x12xbf16>,
    return
  }
  func.func @transform_0(%arg0: i32, %arg1: i32) -> (i32, i32, i32, i32, i32) {
    %c0_i32 = arith.constant 0 : i32
    %c0_i32_0 = arith.constant 0 : i32
    %c0_i32_1 = arith.constant 0 : i32
    %c0_i32_2 = arith.constant 0 : i32
    %c0_i32_3 = arith.constant 0 : i32
    return %arg0, %c0_i32, %c0_i32_0, %c0_i32_1, %c0_i32_2 : i32, i32, i32, i32, i32
  }
  func.func @transform_1(%arg0: i32, %arg1: i32) -> (i32, i32) {
    %c0_i32 = arith.constant 0 : i32
    %c0_i32_0 = arith.constant 0 : i32
    %c0_i32_1 = arith.constant 0 : i32
    return %c0_i32, %c0_i32_0 : i32, i32
  }
  func.func @transform_2(%arg0: i32, %arg1: i32) -> (i32, i32, i32, i32) {
    %c0_i32 = arith.constant 0 : i32
    %c0_i32_0 = arith.constant 0 : i32
    %c0_i32_1 = arith.constant 0 : i32
    return %arg0, %arg1, %c0_i32, %c0_i32_0 : i32, i32, i32, i32
  }
}

module attributes {stable_mosaic.version = 11 : i64} {
  func.func @kernel(%arg0: i32, %arg1: i32, %arg2: memref<1x6x10x10x4xbf16, #tpu.memory_space<vmem>>, %arg3: memref<108x8xbf16, #tpu.memory_space<vmem>>, %arg4: memref<1x1x64x8xbf16, #tpu.memory_space<vmem>>) attributes {dimension_semantics = [#tpu.dimension_semantics<parallel>, #tpu.dimension_semantics<parallel>], iteration_bounds = array<i64: 2, 4>, scalar_prefetch = 0 : i64, scratch_operands = 0 : i64, tpu.core_type = #tpu.core_type<tc>, window_params = [{transform_indices = @transform_0, window_bounds = array<i64: 1, 6, 10, 10, 4>}, {pipeline_mode = #tpu.pipeline_mode<synchronous>, transform_indices = @transform_1, window_bounds = array<i64: 108, 8>}, {transform_indices = @transform_2, window_bounds = array<i64: 1, 1, 64, 8>}]} {
    %c0_i32 = arith.constant 0 : i32
    %0 = arith.addi %arg1, %c0_i32 : i32
    %c0 = arith.constant 0 : index
    %1 = arith.index_cast %0 : i32 to index
    %c0_0 = arith.constant 0 : index
    %c0_1 = arith.constant 0 : index
    %c0_2 = arith.constant 0 : index
    %2 = vector.load %arg2[%c0, %1, %c0_0, %c0_1, %c0_2] : memref<1x6x10x10x4xbf16, #tpu.memory_space<vmem>>, vector<1x1x10x10x4xbf16>
    %3 = vector.shape_cast %2 : vector<1x1x10x10x4xbf16> to vector<10x10x4xbf16>
    %4 = vector.extract_strided_slice %3 {offsets = [0, 0, 0], sizes = [8, 8, 4], strides = [1, 1, 1]} : vector<10x10x4xbf16> to vector<8x8x4xbf16>
    %5 = vector.extract_strided_slice %3 {offsets = [0, 1, 0], sizes = [8, 8, 4], strides = [1, 1, 1]} : vector<10x10x4xbf16> to vector<8x8x4xbf16>
    %6 = vector.extract_strided_slice %3 {offsets = [0, 2, 0], sizes = [8, 8, 4], strides = [1, 1, 1]} : vector<10x10x4xbf16> to vector<8x8x4xbf16>
    %7 = vector.extract_strided_slice %3 {offsets = [1, 0, 0], sizes = [8, 8, 4], strides = [1, 1, 1]} : vector<10x10x4xbf16> to vector<8x8x4xbf16>
    %8 = vector.extract_strided_slice %3 {offsets = [1, 1, 0], sizes = [8, 8, 4], strides = [1, 1, 1]} : vector<10x10x4xbf16> to vector<8x8x4xbf16>
    %9 = vector.extract_strided_slice %3 {offsets = [1, 2, 0], sizes = [8, 8, 4], strides = [1, 1, 1]} : vector<10x10x4xbf16> to vector<8x8x4xbf16>
    %10 = vector.extract_strided_slice %3 {offsets = [2, 0, 0], sizes = [8, 8, 4], strides = [1, 1, 1]} : vector<10x10x4xbf16> to vector<8x8x4xbf16>
    %11 = vector.extract_strided_slice %3 {offsets = [2, 1, 0], sizes = [8, 8, 4], strides = [1, 1, 1]} : vector<10x10x4xbf16> to vector<8x8x4xbf16>
    %12 = vector.extract_strided_slice %3 {offsets = [2, 2, 0], sizes = [8, 8, 4], strides = [1, 1, 1]} : vector<10x10x4xbf16> to vector<8x8x4xbf16>
    %c1_i32 = arith.constant 1 : i32
    %13 = arith.addi %arg1, %c1_i32 : i32
    %c0_3 = arith.constant 0 : index
    %14 = arith.index_cast %13 : i32 to index
    %c0_4 = arith.constant 0 : index
    %c0_5 = arith.constant 0 : index
    %c0_6 = arith.constant 0 : index
    %15 = vector.load %arg2[%c0_3, %14, %c0_4, %c0_5, %c0_6] : memref<1x6x10x10x4xbf16, #tpu.memory_space<vmem>>, vector<1x1x10x10x4xbf16>
    %16 = vector.shape_cast %15 : vector<1x1x10x10x4xbf16> to vector<10x10x4xbf16>
    %17 = vector.extract_strided_slice %16 {offsets = [0, 0, 0], sizes = [8, 8, 4], strides = [1, 1, 1]} : vector<10x10x4xbf16> to vector<8x8x4xbf16>
    %18 = vector.extract_strided_slice %16 {offsets = [0, 1, 0], sizes = [8, 8, 4], strides = [1, 1, 1]} : vector<10x10x4xbf16> to vector<8x8x4xbf16>
    %19 = vector.extract_strided_slice %16 {offsets = [0, 2, 0], sizes = [8, 8, 4], strides = [1, 1, 1]} : vector<10x10x4xbf16> to vector<8x8x4xbf16>
    %20 = vector.extract_strided_slice %16 {offsets = [1, 0, 0], sizes = [8, 8, 4], strides = [1, 1, 1]} : vector<10x10x4xbf16> to vector<8x8x4xbf16>
    %21 = vector.extract_strided_slice %16 {offsets = [1, 1, 0], sizes = [8, 8, 4], strides = [1, 1, 1]} : vector<10x10x4xbf16> to vector<8x8x4xbf16>
    %22 = vector.extract_strided_slice %16 {offsets = [1, 2, 0], sizes = [8, 8, 4], strides = [1, 1, 1]} : vector<10x10x4xbf16> to vector<8x8x4xbf16>
    %23 = vector.extract_strided_slice %16 {offsets = [2, 0, 0], sizes = [8, 8, 4], strides = [1, 1, 1]} : vector<10x10x4xbf16> to vector<8x8x4xbf16>
    %24 = vector.extract_strided_slice %16 {offsets = [2, 1, 0], sizes = [8, 8, 4], strides = [1, 1, 1]} : vector<10x10x4xbf16> to vector<8x8x4xbf16>
    %25 = vector.extract_strided_slice %16 {offsets = [2, 2, 0], sizes = [8, 8, 4], strides = [1, 1, 1]} : vector<10x10x4xbf16> to vector<8x8x4xbf16>
    %c2_i32 = arith.constant 2 : i32
    %26 = arith.addi %arg1, %c2_i32 : i32
    %c0_7 = arith.constant 0 : index
    %27 = arith.index_cast %26 : i32 to index
    %c0_8 = arith.constant 0 : index
    %c0_9 = arith.constant 0 : index
    %c0_10 = arith.constant 0 : index
    %28 = vector.load %arg2[%c0_7, %27, %c0_8, %c0_9, %c0_10] : memref<1x6x10x10x4xbf16, #tpu.memory_space<vmem>>, vector<1x1x10x10x4xbf16>
    %29 = vector.shape_cast %28 : vector<1x1x10x10x4xbf16> to vector<10x10x4xbf16>
    %30 = vector.extract_strided_slice %29 {offsets = [0, 0, 0], sizes = [8, 8, 4], strides = [1, 1, 1]} : vector<10x10x4xbf16> to vector<8x8x4xbf16>
    %31 = vector.extract_strided_slice %29 {offsets = [0, 1, 0], sizes = [8, 8, 4], strides = [1, 1, 1]} : vector<10x10x4xbf16> to vector<8x8x4xbf16>
    %32 = vector.extract_strided_slice %29 {offsets = [0, 2, 0], sizes = [8, 8, 4], strides = [1, 1, 1]} : vector<10x10x4xbf16> to vector<8x8x4xbf16>
    %33 = vector.extract_strided_slice %29 {offsets = [1, 0, 0], sizes = [8, 8, 4], strides = [1, 1, 1]} : vector<10x10x4xbf16> to vector<8x8x4xbf16>
    %34 = vector.extract_strided_slice %29 {offsets = [1, 1, 0], sizes = [8, 8, 4], strides = [1, 1, 1]} : vector<10x10x4xbf16> to vector<8x8x4xbf16>
    %35 = vector.extract_strided_slice %29 {offsets = [1, 2, 0], sizes = [8, 8, 4], strides = [1, 1, 1]} : vector<10x10x4xbf16> to vector<8x8x4xbf16>
    %36 = vector.extract_strided_slice %29 {offsets = [2, 0, 0], sizes = [8, 8, 4], strides = [1, 1, 1]} : vector<10x10x4xbf16> to vector<8x8x4xbf16>
    %37 = vector.extract_strided_slice %29 {offsets = [2, 1, 0], sizes = [8, 8, 4], strides = [1, 1, 1]} : vector<10x10x4xbf16> to vector<8x8x4xbf16>
    %38 = vector.extract_strided_slice %29 {offsets = [2, 2, 0], sizes = [8, 8, 4], strides = [1, 1, 1]} : vector<10x10x4xbf16> to vector<8x8x4xbf16>
    %39 = tpu.concatenate %4, %5, %6, %7, %8, %9, %10, %11, %12, %17, %18, %19, %20, %21, %22, %23 in 2 : vector<8x8x4xbf16>, vector<8x8x4xbf16>, vector<8x8x4xbf16>, vector<8x8x4xbf16>, vector<8x8x4xbf16>, vector<8x8x4xbf16>, vector<8x8x4xbf16>, vector<8x8x4xbf16>, vector<8x8x4xbf16>, vector<8x8x4xbf16>, vector<8x8x4xbf16>, vector<8x8x4xbf16>, vector<8x8x4xbf16>, vector<8x8x4xbf16>, vector<8x8x4xbf16>, vector<8x8x4xbf16> -> vector<8x8x64xbf16>
    %40 = tpu.concatenate %24, %25, %30, %31, %32, %33, %34, %35, %36, %37, %38 in 2 : vector<8x8x4xbf16>, vector<8x8x4xbf16>, vector<8x8x4xbf16>, vector<8x8x4xbf16>, vector<8x8x4xbf16>, vector<8x8x4xbf16>, vector<8x8x4xbf16>, vector<8x8x4xbf16>, vector<8x8x4xbf16>, vector<8x8x4xbf16>, vector<8x8x4xbf16> -> vector<8x8x44xbf16>
    %41 = tpu.concatenate %39, %40 in 2 : vector<8x8x64xbf16>, vector<8x8x44xbf16> -> vector<8x8x108xbf16>
    %42 = vector.shape_cast %41 : vector<8x8x108xbf16> to vector<64x108xbf16>
    %c0_11 = arith.constant 0 : index
    %c0_12 = arith.constant 0 : index
    %43 = vector.load %arg3[%c0_11, %c0_12] : memref<108x8xbf16, #tpu.memory_space<vmem>>, vector<108x8xbf16>
    %cst = arith.constant dense<0.000000e+00> : vector<64x8xf32>
    %44 = tpu.matmul %42, %43, %cst {dimension_numbers = #tpu.dot_dimension_numbers<[1], [0], [0], [1], [0, 0, 1, 1], [], []>} : vector<64x108xbf16>, vector<108x8xbf16>, vector<64x8xf32> -> vector<64x8xf32>
    %cst_13 = arith.constant 0.999994993 : f32
    %45 = vector.broadcast %cst_13 : f32 to vector<64x8xf32>
    %46 = arith.mulf %44, %45 : vector<64x8xf32>
    %cst_14 = arith.constant 0.000000e+00 : f32
    %47 = vector.broadcast %cst_14 : f32 to vector<64x8xf32>
    %48 = arith.maximumf %46, %47 : vector<64x8xf32>
    %49 = arith.truncf %48 : vector<64x8xf32> to vector<64x8xbf16>
    %c0_15 = arith.constant 0 : index
    %c0_16 = arith.constant 0 : index
    %c0_17 = arith.constant 0 : index
    %c0_18 = arith.constant 0 : index
    %50 = vector.load %arg4[%c0_15, %c0_16, %c0_17, %c0_18] : memref<1x1x64x8xbf16, #tpu.memory_space<vmem>>, vector<1x1x64x8xbf16>
    %51 = vector.shape_cast %50 : vector<1x1x64x8xbf16> to vector<64x8xbf16>
    %52 = vector.shape_cast %49 : vector<64x8xbf16> to vector<1x1x64x8xbf16>
    tpu.vector_store %arg4[%c0_15, %c0_16, %c0_17, %c0_18], %52 {strides = array<i32>} : memref<1x1x64x8xbf16, #tpu.memory_space<vmem>>, vector<1x1x64x8xbf16>,
    return
  }
  func.func @transform_0(%arg0: i32, %arg1: i32) -> (i32, i32, i32, i32, i32) {
    %c0_i32 = arith.constant 0 : i32
    %c0_i32_0 = arith.constant 0 : i32
    %c0_i32_1 = arith.constant 0 : i32
    %c0_i32_2 = arith.constant 0 : i32
    %c0_i32_3 = arith.constant 0 : i32
    return %arg0, %c0_i32, %c0_i32_0, %c0_i32_1, %c0_i32_2 : i32, i32, i32, i32, i32
  }
  func.func @transform_1(%arg0: i32, %arg1: i32) -> (i32, i32) {
    %c0_i32 = arith.constant 0 : i32
    %c0_i32_0 = arith.constant 0 : i32
    %c0_i32_1 = arith.constant 0 : i32
    return %c0_i32, %c0_i32_0 : i32, i32
  }
  func.func @transform_2(%arg0: i32, %arg1: i32) -> (i32, i32, i32, i32) {
    %c0_i32 = arith.constant 0 : i32
    %c0_i32_0 = arith.constant 0 : i32
    %c0_i32_1 = arith.constant 0 : i32
    return %arg0, %arg1, %c0_i32, %c0_i32_0 : i32, i32, i32, i32
  }
}

</mosaic_0001>

<bundles_post_ra>
// kernel: a_call__.3
= control target key start
LH: loop header
LB: loop body
LE: loop exit
PB: predicated region body
PF: predicated region fallthrough
CT: control target
= control target key end

     0   :  { %s2524_s27 = smov 0   ;;  %s2526_s28 = smov 0   ;;  %s3283_s0 = inlined_call_operand.vmem [shape: bf16[2,6,10,10,4], index: 0, kind: input, shape index: {}]   ;;  %s3284_s1 = inlined_call_operand.vmem [shape: bf16[4,8], index: 1, kind: input, shape index: {}]   ;;  %s3285_s2 = inlined_call_operand.vmem [shape: bf16[4,8], index: 2, kind: input, shape index: {}]   ;;  %s3286_s3 = inlined_call_operand.vmem [shape: bf16[4,4], index: 3, kind: input, shape index: {}]   ;;  %s3287_s4 = inlined_call_operand.vmem [shape: bf16[4,8], index: 4, kind: input, shape index: {}]   ;;  %s3288_s5 = inlined_call_operand.vmem [shape: bf16[2,4,64,8], index: 5, kind: output, shape index: {0}]   ;;  %s3289_s6 = inlined_call_operand.vmem [shape: bf16[2,4,64,8], index: 6, kind: output, shape index: {1}]   ;;  %s3290_s7 = inlined_call_operand.vmem [shape: bf16[2,4,64,4], index: 7, kind: output, shape index: {2}]   ;;  %s3291_s8 = inlined_call_operand.vmem [shape: bf16[2,4,64,8], index: 8, kind: output, shape index: {3}]  }
   0x1   :  { %s2528_s29 = smov 0   ;;  %s2530_s30 = smov 0  }
   0x2   :  { %s2532_s9 = smov 0  }
   0x3 LB: > { %s28_s10 = sadd.s32 1, %s2469_s29  ;;  %s31_s11 = sadd.s32 1, %s2473_s30  ;;  %s2477_s9 = sphi %s2532_s9, %s19_s9   ;;  %s2473_s30 = sphi %s2530_s30, %s3299_s30   ;;  %s2469_s29 = sphi %s2528_s29, %s3298_s29   ;;  %s2465_s28 = sphi %s2526_s28, %s3297_s28   ;;  %s2461_s27 = sphi %s2524_s27, %s3296_s27  }
   0x4   : > { %p29_p0 = scmp.ge.s32.totalorder %s28_s10, 4  ;;  %p2158_p1 = scmp.ge.s32.totalorder %s2477_s9, 1 }
   0x5   : > { %p289_p2 = scmp.lt.s32.totalorder %s2477_s9, 9 }
   0x6   : > { %s3301_s10 = smov (%p29_p0, %s28_s10), 0  ;;  %s3303_s11 = smov (!%p29_p0, %s31_s11), %s2473_s30 }
   0x7   : > { %p290_p3 = pnand %p2158_p1, %p289_p2  ;;  %p33_p4 = scmp.ge.s32.totalorder %s3303_s11, 2 }
   0x8   : > { %v1341_v0 = vld [vmem:[%s3284_s1] sm:$0x3] (!%p290_p3)  ;;  %vm1367_vm0 = vcmask (!%p290_p3), 1041408   ;;  %p354_p5 = scmp.lt.s32.totalorder (!%p290_p3), %s2465_s28, 1  ;;  %s2301_s16 = smul.u32 (!%p290_p3), 80, %s2461_s27  ;;  %vm566_vm3 = vcmask (!%p290_p3), 1042432  }
   0x9   : > { %s3305_s11 = smov (%p33_p4, %s3303_s11), 0  ;;  %293 = sbr.rel (%p290_p3) target bundleno = 397 (0x18d), region = 40 }
   0xa   : > { %v1493_v1 = vld [vmem:[%s3285_s2] sm:$0x3] (!%p290_p3)  ;;  %2394 = vmatprep.subr.msk.bf16.mxu0 (!%p290_p3), %vm1367_vm0, %v1341_v0  ;;  %v1369_v2 = vsel (!%p290_p3), %vm1367_vm0, %v1341_v0, 0  ;;  %vm419_vm1 = vsmask.f32 (!%p290_p3), 3328  ;;  %vm567_vm4 = vcmask (!%p290_p3), 1046532  }
   0xb   : > { %2395 = vmatprep.subr.msk.bf16.mxu1 (!%p290_p3), %vm1367_vm0, %v1493_v1  ;;  %v1495_v3 = vsel (!%p290_p3), %vm1367_vm0, %v1493_v1, 0  ;;  %2355 = vmatpush3.bf16.msra.mxu0 (!%p290_p3), %v1369_v2  ;;  %v1618_v4 = vld [vmem:[%s3286_s3] sm:$0x3] (!%p290_p3)  ;;  %vm420_vm2 = vsmask.f32 (!%p290_p3), 7440  ;;  %vm2650_vm6 = vmor (!%p290_p3), %vm566_vm3, %vm567_vm4  ;;  %vm1354_vm7 = vcmask (!%p290_p3), 31744  }
   0xc   : > { %2365 = vmatpush3.bf16.msra.mxu1 (!%p290_p3), %v1495_v3  ;;  %v1744_v5 = vld [vmem:[%s3287_s4] sm:$0x3] (!%p290_p3)  ;;  %2396 = vmatprep.subr.msk.bf16.mxu0 (!%p290_p3), %vm1367_vm0, %v1618_v4  ;;  %v2579_v6 = vsel (!%p290_p3), %vm1367_vm0, %v1618_v4, 0  ;;  %vm2632_vm5 = vmor (!%p290_p3), %vm419_vm1, %vm420_vm2  ;;  %p361_p6 = scmp.lt.s32.totalorder (!%p290_p3), %s2461_s27, 3  ;;  %vm1484_vm8 = vcmask (!%p290_p3), 60416   ;;  %vm1735_vm9 = vcmask (!%p290_p3), 27648  }
   0xd   : > { %2397 = vmatprep.subr.msk.bf16.mxu1 (!%p290_p3), %vm1367_vm0, %v1744_v5  ;;  %v2582_v7 = vsel (!%p290_p3), %vm1367_vm0, %v1744_v5, 0 }
  0x10   : > { %s3307_s28 = smov (!%p354_p5, %s2465_s28), 1  ;;  %s3309_s27 = smov (!%p361_p6, %s2461_s27), 3 }
  0x11   : > { %s2398_s21 = smul.u32 480, %s3307_s28  ;;  %s2160_s26 = sshll.u32 %s3309_s27, 3 }
  0x12   : > { %s2161_s12 = sshll.u32 %s3307_s28, 5 }
  0x13   : > { %s358_s24 = scalar_lea.vmem %s3283_s0, %s2398_s21  ;;  %s365_s13 = sadd.s32 %s2161_s12, %s2160_s26 }
  0x14   : > { %s2587_s25 = scalar_lea.vmem %s358_s24, %s2301_s16  ;;  %s3178_s14 = sshll.u32 %s365_s13, 2 }
  0x15   : > { %v2590_v8 = vld [vmem:[%s2587_s25] sm:$0xf]  ;;  %v2593_v9 = vld [vmem:[%s2587_s25 + $0x4] sm:$0x1]  ;;  %v2596_v10 = vld [vmem:[%s2587_s25 + $0x8] sm:$0xf]  ;;  %s3184_s15 = scalar_lea.vmem %s3288_s5, %s3178_s14  ;;  %s3190_s18 = scalar_lea.vmem %s3289_s6, %s3178_s14 }
  0x16   : > { %v2599_v11 = vld [vmem:[%s2587_s25 + $0xc] sm:$0x1]  ;;  %v2602_v12 = vld [vmem:[%s2587_s25 + $0x10] sm:$0xf]  ;;  %v2605_v13 = vld [vmem:[%s2587_s25 + $0x20] sm:$0xf]  ;;  %s3228_s21 = scalar_lea.vmem %s3290_s7, %s3178_s14  ;;  %s3250_s24 = scalar_lea.vmem %s3291_s8, %s3178_s14 }
  0x17   : > { %v2608_v14 = vld [vmem:[%s2587_s25 + $0x28] sm:$0xf]  ;;  %v423_v15 = vshrl.u32 %v2590_v8, 16  ;;  %v426_v16 = vshll.u32 %v2590_v8, 16  ;;  %v2613_v17 = vld [vmem:[%s2587_s25 + $0x14] sm:$0x1] }
  0x18   : > { %v620_v18 = vmax.bf16 %v2608_v14, %v2605_v13  ;;  %v432_v19 = vshll.u32 %v2593_v9, 16  ;;  %v437_v20 = vshrl.u32 %v2596_v10, 16  ;;  %v440_v21 = vshll.u32 %v2596_v10, 16  ;;  %v2621_v22 = vld [vmem:[%s2587_s25 + $0x18] sm:$0xf] }
  0x19   : > { %v425_v23 = vrot.slane %v423_v15, 4  ;;  %v428_v24 = vrot.slane %v426_v16, 5  ;;  %v446_v25 = vshll.u32 %v2599_v11, 16  ;;  %v451_v26 = vshrl.u32 %v2602_v12, 16  ;;  %v2626_v27 = vld [vmem:[%s2587_s25 + $0x1c] sm:$0x1] }
  0x1a   : > { %v434_v28 = vrot.slane %v432_v19, 5  ;;  %v439_v29 = vrot.slane %v437_v20, 4  ;;  %v442_v30 = vrot.slane %v440_v21, 5  ;;  %v454_v31 = vshll.u32 %v2602_v12, 16  ;;  %v408_v41 = vld [vmem:[%s2587_s25 + $0x24] sm:$0x1] }
  0x1b   : > { %v429_v32 = vor.u32 %v428_v24, %v425_v23  ;;  %v448_v33 = vrot.slane %v446_v25, 5  ;;  %v453_v34 = vrot.slane %v451_v26, 4  ;;  %v460_v35 = vshll.u32 %v2613_v17, 16 }
  0x1c   : > { %v443_v37 = vor.u32 %v442_v30, %v439_v29  ;;  %v456_v38 = vrot.slane %v454_v31, 5  ;;  %v465_v39 = vshrl.u32 %v2621_v22, 16  ;;  %v468_v40 = vshll.u32 %v2621_v22, 16 }
  0x1d   : > { %v430_v42 = vrot.slane %v429_v32, 4  ;;  %v462_v43 = vrot.slane %v460_v35, 5  ;;  %v474_v44 = vshll.u32 %v2626_v27, 16  ;;  %v479_v45 = vshrl.u32 %v2605_v13, 16  ;;  %v2687_v32 = vld [vmem:[%s2587_s25 + $0x58] sm:$0xf] }
  0x1e   : > { %v444_v46 = vrot.slane %v443_v37, 4  ;;  %v457_v47 = vor.u32 %v456_v38, %v453_v34  ;;  %v467_v48 = vrot.slane %v465_v39, 4  ;;  %v470_v49 = vrot.slane %v468_v40, 5  ;;  %v2698_v37 = vld [vmem:[%s2587_s25 + $0x5c] sm:$0x1] }
  0x1f   : > { %v435_v50 = vsel %vm2632_vm5, %v430_v42, %v434_v28  ;;  %v476_v51 = vrot.slane %v474_v44, 5  ;;  %v481_v52 = vrot.slane %v479_v45, 4  ;;  %v482_v53 = vshll.u32 %v2605_v13, 16 }
  0x20   : > { %v449_v54 = vsel %vm2632_vm5, %v444_v46, %v448_v33  ;;  %v458_v55 = vrot.slane %v457_v47, 4  ;;  %v471_v56 = vor.u32 %v470_v49, %v467_v48  ;;  %v488_v57 = vshll.u32 %v408_v41, 16  ;;  %v2710_v48 = vld [vmem:[%s2587_s25 + $0x60] sm:$0xf] }
  0x21   : > { %v484_v58 = vrot.slane %v482_v53, 5  ;;  %v542_v59 = vmax.bf16 %v435_v50, %v2590_v8  ;;  %v543_v60 = vmax.bf16 %v449_v54, %v2596_v10  ;;  %v2173_v62 = vrot.slane %v2590_v8, 9 }
  0x22   : > { %v2657_v63 = vsel %vm2632_vm5, %v458_v55, %v462_v43  ;;  %v472_v0 = vrot.slane %v471_v56, 4  ;;  %v490_v1 = vrot.slane %v488_v57, 5  ;;  %v571_v2 = vrot.slane %v2593_v9, 5 }
  0x23   : > { %v485_v3 = vor.u32 %v484_v58, %v481_v52  ;;  %v544_v4 = vmax.bf16 %v2657_v63, %v2602_v12  ;;  %v2174_v5 = vrot.slane %v2596_v10, 9  ;;  %v575_v15 = vrot.slane %v2599_v11, 5  ;;  %v2721_v52 = vld [vmem:[%s2587_s25 + $0x64] sm:$0x1]  ;;  %v2183_v58 = vld [vmem:[%s2587_s25 + $0x50] sm:$0xf] }
  0x24   : > { %v2666_v16 = vsel %vm2632_vm5, %v472_v0, %v476_v51  ;;  %v572_v8 = vsel %vm2650_vm6, %v2173_v62, %v571_v2  ;;  %v2175_v19 = vrot.slane %v2602_v12, 9  ;;  %v579_v9 = vrot.slane %v2613_v17, 5 }
  0x25   : > { %v486_v20 = vrot.slane %v485_v3, 4  ;;  %v545_v21 = vmax.bf16 %v2666_v16, %v2621_v22  ;;  %v576_v11 = vsel %vm2650_vm6, %v2174_v5, %v575_v15  ;;  %v2176_v23 = vrot.slane %v2621_v22, 9  ;;  %v2184_v15 = vld [vmem:[%s2587_s25 + $0x54] sm:$0x1] }
  0x26   : > { %v2679_v24 = vsel %vm2650_vm6, %v2175_v19, %v579_v9  ;;  %v583_v25 = vrot.slane %v2626_v27, 5  ;;  %v2177_v26 = vrot.slane %v2605_v13, 9  ;;  %v587_v28 = vrot.slane %v408_v41, 5 }
  0x27   : > { %v491_v17 = vsel %vm2632_vm5, %v486_v20, %v490_v1  ;;  %v609_v29 = vmax.bf16 %v572_v8, %v542_v59  ;;  %v610_v30 = vmax.bf16 %v576_v11, %v543_v60  ;;  %v611_v31 = vmax.bf16 %v2679_v24, %v544_v4 }
  0x28   : > { %v643_v33 = vmax.bf16 %v620_v18, %v491_v17  ;;  %v546_v34 = vmax.bf16 %v491_v17, %v2605_v13  ;;  %v584_v27 = vsel %vm2650_vm6, %v2176_v23, %v583_v25  ;;  %v588_v35 = vsel %vm2650_vm6, %v2177_v26, %v587_v28 }
  0x29   : > { %v612_v38 = vmax.bf16 %v584_v27, %v545_v21  ;;  %v617_v39 = vmax.bf16 %v609_v29, %v2596_v10  ;;  %v618_v40 = vmax.bf16 %v610_v30, %v2602_v12  ;;  %v619_v18 = vmax.bf16 %v611_v31, %v2621_v22  ;;  %v2713_v10 = vld [vmem:[%s2587_s25 + $0x68] sm:$0xf] }
  0x2a   : > { %v658_v41 = vmax.bf16 %v643_v33, %v588_v35  ;;  %v2703_v42 = vmax.bf16 %v588_v35, %v546_v34  ;;  %v734_v43 = vshrl.u32 %v2687_v32, 16  ;;  %v737_v44 = vshll.u32 %v2687_v32, 16 }
  0x2b   : > { %v640_v45 = vmax.bf16 %v617_v39, %v449_v54  ;;  %v641_v46 = vmax.bf16 %v618_v40, %v2657_v63  ;;  %v642_v47 = vmax.bf16 %v619_v18, %v2666_v16  ;;  %v743_v49 = vshll.u32 %v2698_v37, 16  ;;  %v2744_v18 = vld [vmem:[%s2587_s25 + $0xa0] sm:$0xf] }
  0x2c   : > { %v2716_v50 = vmax.bf16 %v658_v41, %v612_v38  ;;  %v621_v51 = vmax.bf16 %v2703_v42, %v2608_v14  ;;  %v736_v53 = vrot.slane %v734_v43, 4  ;;  %v739_v54 = vrot.slane %v737_v44, 5  ;;  %v2214_v43 = vld [vmem:[%s2587_s25 + $0xa4] sm:$0x1] }
  0x2d   : > { %v655_v55 = vmax.bf16 %v640_v45, %v576_v11  ;;  %v656_v56 = vmax.bf16 %v641_v46, %v2679_v24  ;;  %v657_v57 = vmax.bf16 %v642_v47, %v584_v27  ;;  %v745_v59 = vrot.slane %v743_v49, 5 }
  0x2e   : > { %v689_v60 = vmax.bf16 %v2713_v10, %v2716_v50  ;;  %v740_v62 = vor.u32 %v739_v54, %v736_v53  ;;  %v748_v0 = vshrl.u32 %v2710_v48, 16  ;;  %v751_v1 = vshll.u32 %v2710_v48, 16 }
  0x2f   : > { %v663_v2 = vmax.bf16 %v655_v55, %v2602_v12  ;;  %v664_v3 = vmax.bf16 %v656_v56, %v2621_v22  ;;  %v665_v4 = vmax.bf16 %v657_v57, %v2605_v13  ;;  %v757_v5 = vshll.u32 %v2721_v52, 16 }
  0x30   : > { %v741_v8 = vrot.slane %v740_v62, 4  ;;  %v750_v19 = vrot.slane %v748_v0, 4  ;;  %v753_v9 = vrot.slane %v751_v1, 5  ;;  %v854_v20 = vshrl.u32 %v2183_v58, 16 }
  0x31   : > { %v686_v21 = vmax.bf16 %v663_v2, %v2657_v63  ;;  %v687_v11 = vmax.bf16 %v664_v3, %v2666_v16  ;;  %v688_v23 = vmax.bf16 %v665_v4, %v491_v17  ;;  %v759_v25 = vrot.slane %v757_v5, 5  ;;  %v410_v5 = vld [vmem:[%s2587_s25 + $0x2c] sm:$0x1] }
  0x32   : > { %v2738_v12 = vsel %vm2632_vm5, %v741_v8, %v745_v59  ;;  %v754_v22 = vor.u32 %v753_v9, %v750_v19  ;;  %v856_v13 = vrot.slane %v854_v20, 4  ;;  %v857_v26 = vshll.u32 %v2183_v58, 16 }
  0x33   : > { %v701_v28 = vmax.bf16 %v686_v21, %v2679_v24  ;;  %v702_v29 = vmax.bf16 %v687_v11, %v584_v27  ;;  %v703_v30 = vmax.bf16 %v688_v23, %v588_v35  ;;  %v863_v31 = vshll.u32 %v2184_v15, 16 }
  0x34   : > { %v755_v63 = vrot.slane %v754_v22, 4  ;;  %v859_v33 = vrot.slane %v857_v26, 5  ;;  %v2203_v16 = vrot.slane %v2183_v58, 9  ;;  %v901_v17 = vrot.slane %v2184_v15, 5  ;;  %v2775_v15 = vld [vmem:[%s2587_s25 + $0x30] sm:$0xf] }
  0x35   : > { %v845_v34 = vmax.bf16 %v2183_v58, %v701_v28  ;;  %v846_v38 = vmax.bf16 %v2687_v32, %v702_v29  ;;  %v847_v39 = vmax.bf16 %v2710_v48, %v703_v30  ;;  %v865_v40 = vrot.slane %v863_v31, 5 }
  0x36   : > { %v2748_v24 = vsel %vm2632_vm5, %v755_v63, %v759_v25  ;;  %v860_v27 = vor.u32 %v859_v33, %v856_v13  ;;  %v902_v35 = vsel %vm2650_vm6, %v2203_v16, %v901_v17  ;;  %v2204_v41 = vrot.slane %v2687_v32, 9  ;;  %v412_v25 = vld [vmem:[%s2587_s25 + $0x34] sm:$0x1] }
  0x37   : > { %v876_v44 = vmax.bf16 %v846_v38, %v2738_v12  ;;  %v877_v45 = vmax.bf16 %v847_v39, %v2748_v24  ;;  %v905_v46 = vrot.slane %v2698_v37, 5  ;;  %v2205_v47 = vrot.slane %v2710_v48, 9 }
  0x38   : > { %v861_v49 = vrot.slane %v860_v27, 4  ;;  %v909_v53 = vrot.slane %v2721_v52, 5  ;;  %v1058_v54 = vshrl.u32 %v2744_v18, 16  ;;  %v1061_v55 = vshll.u32 %v2744_v18, 16 }
  0x39   : > { %v906_v56 = vsel %vm2650_vm6, %v2204_v41, %v905_v46  ;;  %v1067_v57 = vshll.u32 %v2214_v43, 16  ;;  %v2233_v58 = vrot.slane %v2744_v18, 9  ;;  %v1203_v59 = vrot.slane %v2214_v43, 5 }
  0x3a   : > { %v866_v37 = vsel %vm2632_vm5, %v861_v49, %v865_v40  ;;  %v2768_v62 = vsel %vm2650_vm6, %v2205_v47, %v909_v53  ;;  %v940_v52 = vmax.bf16 %v906_v56, %v876_v44  ;;  %v1060_v0 = vrot.slane %v1058_v54, 4 }
  0x3b   : > { %v875_v1 = vmax.bf16 %v866_v37, %v845_v34  ;;  %v941_v2 = vmax.bf16 %v2768_v62, %v877_v45  ;;  %v1063_v3 = vrot.slane %v1061_v55, 5  ;;  %v2771_v4 = vrot.slane %v1067_v57, 5  ;;  %v2811_v45 = vld [vmem:[%s2587_s25 + $0x6c] sm:$0x1] }
  0x3c   : > { %v948_v8 = vmax.bf16 %v2710_v48, %v940_v52  ;;  %v2780_v19 = vsel %vm2650_vm6, %v2233_v58, %v1203_v59  ;;  %v2784_v9 = vcombine.low %v2738_v12, %v2748_v24  ;;  %v493_v20 = vshrl.u32 %v2608_v14, 16 }
  0x3d   : > { %v939_v21 = vmax.bf16 %v902_v35, %v875_v1  ;;  %v2788_v11 = vmax.bf16 %v2713_v10, %v941_v2  ;;  %v1064_v23 = vor.u32 %v1063_v3, %v1060_v0  ;;  %v496_v22 = vshll.u32 %v2608_v14, 16  ;;  %v2834_v2 = vld [vmem:[%s2587_s25 + $0x70] sm:$0xf] }
  0x3e   : > { %v957_v13 = vmax.bf16 %v948_v8, %v2748_v24  ;;  %2356 = vmatprep.mubr.msk.bf16.mxu0 %vm1354_vm7, %v2784_v9  ;;  %2366 = vmatprep.mubr.msk.bf16.mxu1 %vm1354_vm7, %v2784_v9  ;;  %v495_v26 = vrot.slane %v493_v20, 4  ;;  %v502_v28 = vshll.u32 %v410_v5, 16  ;;  %v507_v29 = vshrl.u32 %v2775_v15, 16 }
  0x3f   : > { %v947_v30 = vmax.bf16 %v2687_v32, %v939_v21  ;;  %v1065_v31 = vrot.slane %v1064_v23, 4  ;;  %v498_v63 = vrot.slane %v496_v22, 5  ;;  %v510_v33 = vshll.u32 %v2775_v15, 16 }
  0x40   : > { %v2801_v16 = vmax.bf16 %v957_v13, %v2768_v62  ;;  %v504_v17 = vrot.slane %v502_v28, 5  ;;  %v509_v34 = vrot.slane %v507_v29, 4  ;;  %v516_v38 = vshll.u32 %v412_v25, 16  ;;  %v2851_v29 = vld [vmem:[%s2587_s25 + $0x38] sm:$0xf] }
  0x41   : > { %v956_v39 = vmax.bf16 %v947_v30, %v2738_v12  ;;  %v1070_v40 = vsel %vm2632_vm5, %v1065_v31, %v2771_v4  ;;  %v499_v27 = vor.u32 %v498_v63, %v495_v26  ;;  %v512_v35 = vrot.slane %v510_v33, 5 }
  0x42   : > { %v980_v32 = vmax.bf16 %v2713_v10, %v2801_v16  ;;  %v518_v41 = vrot.slane %v516_v38, 5  ;;  %v2178_v43 = vrot.slane %v2608_v14, 9  ;;  %v591_v44 = vrot.slane %v410_v5, 5  ;;  %v415_v16 = vld [vmem:[%s2587_s25 + $0x40] sm:$0xf] }
  0x43   : > { %v971_v46 = vmax.bf16 %v956_v39, %v906_v56  ;;  %v500_v47 = vrot.slane %v499_v27, 4  ;;  %v513_v49 = vor.u32 %v512_v35, %v509_v34  ;;  %v2179_v12 = vrot.slane %v2775_v15, 9 }
  0x44   : > { %v592_v53 = vsel %vm2650_vm6, %v2178_v43, %v591_v44  ;;  %v595_v54 = vrot.slane %v412_v25, 5  ;;  %v762_v55 = vshrl.u32 %v2713_v10, 16  ;;  %v765_v57 = vshll.u32 %v2713_v10, 16  ;;  %v2192_v25 = vld [vmem:[%s2587_s25 + $0x74] sm:$0x1] }
  0x45   : > { %v979_v58 = vmax.bf16 %v2710_v48, %v971_v46  ;;  %v505_v59 = vsel %vm2632_vm5, %v500_v47, %v504_v17  ;;  %v514_v37 = vrot.slane %v513_v49, 4  ;;  %v771_v56 = vshll.u32 %v2811_v45, 16  ;;  %v414_v49 = vld [vmem:[%s2587_s25 + $0x3c] sm:$0x1] }
  0x46   : > { %v704_v52 = vmax.bf16 %v689_v60, %v505_v59  ;;  %v547_v0 = vmax.bf16 %v505_v59, %v2608_v14  ;;  %v2828_v1 = vsel %vm2650_vm6, %v2179_v12, %v595_v54  ;;  %v644_v48 = vmax.bf16 %v621_v51, %v505_v59 }
  0x47   : > { %v1002_v3 = vmax.bf16 %v979_v58, %v2748_v24  ;;  %v519_v4 = vsel %vm2632_vm5, %v514_v37, %v518_v41  ;;  %v764_v5 = vrot.slane %v762_v55, 4  ;;  %v767_v50 = vrot.slane %v765_v57, 5 }
  0x48   : > { %v548_v60 = vmax.bf16 %v519_v4, %v2775_v15  ;;  %v848_v8 = vmax.bf16 %v704_v52, %v592_v53  ;;  %v614_v20 = vmax.bf16 %v592_v53, %v547_v0  ;;  %v659_v21 = vmax.bf16 %v644_v48, %v592_v53 }
  0x49   : > { %v1017_v23 = vmax.bf16 %v1002_v3, %v2768_v62  ;;  %v768_v14 = vor.u32 %v767_v50, %v764_v5  ;;  %v773_v42 = vrot.slane %v771_v56, 5  ;;  %v776_v51 = vshrl.u32 %v2834_v2, 16 }
  0x4a   : > { %v2844_v24 = vmax.bf16 %v2828_v1, %v548_v60  ;;  %v622_v22 = vmax.bf16 %v614_v20, %v2775_v15  ;;  %v667_v13 = vmax.bf16 %v659_v21, %v2775_v15  ;;  %v878_v26 = vmax.bf16 %v2834_v2, %v848_v8  ;;  %v416_v60 = vld [vmem:[%s2587_s25 + $0x44] sm:$0x1] }
  0x4b   : > { %v1049_v28 = vmax.bf16 %v2744_v18, %v1017_v23  ;;  %v769_v30 = vrot.slane %v768_v14, 4  ;;  %v778_v62 = vrot.slane %v776_v51, 4  ;;  %v779_v31 = vshll.u32 %v2834_v2, 16 }
  0x4c   : > { %v623_v63 = vmax.bf16 %v2844_v24, %v2851_v29  ;;  %v2856_v33 = vmax.bf16 %v622_v22, %v519_v4  ;;  %v690_v17 = vmax.bf16 %v667_v13, %v519_v4  ;;  %v785_v34 = vshll.u32 %v2192_v25, 16 }
  0x4d   : > { %v2858_v38 = vmax.bf16 %v1070_v40, %v1049_v28  ;;  %v774_v15 = vsel %vm2632_vm5, %v769_v30, %v773_v42  ;;  %v781_v18 = vrot.slane %v779_v31, 5  ;;  %v2206_v39 = vrot.slane %v2713_v10, 9 }
  0x4e   : > { %v660_v27 = vmax.bf16 %v2856_v33, %v2828_v1  ;;  %v705_v35 = vmax.bf16 %v690_v17, %v2828_v1  ;;  %v942_v41 = vmax.bf16 %v878_v26, %v774_v15  ;;  %v787_v43 = vrot.slane %v785_v34, 5  ;;  %v2193_v33 = vld [vmem:[%s2587_s25 + $0x78] sm:$0xf] }
  0x4f   : > { %v1241_v44 = vmax.bf16 %v2780_v19, %v2858_v38  ;;  %v782_v46 = vor.u32 %v781_v18, %v778_v62  ;;  %v913_v40 = vrot.slane %v2811_v45, 5  ;;  %v2207_v47 = vrot.slane %v2834_v2, 9 }
  0x50   : > { %v849_v12 = vmax.bf16 %v2834_v2, %v705_v35  ;;  %v917_v53 = vrot.slane %v2192_v25, 5  ;;  %v958_v54 = vmax.bf16 %v2788_v11, %v774_v15  ;;  %v1003_v55 = vmax.bf16 %v980_v32, %v774_v15  ;;  %v2885_v11 = vld [vmem:[%s2587_s25 + $0xa8] sm:$0xf] }
  0x51   : > { %v783_v57 = vrot.slane %v782_v46, 4  ;;  %v914_v58 = vsel %vm2650_vm6, %v2206_v39, %v913_v40  ;;  %v521_v59 = vshrl.u32 %v2851_v29, 16  ;;  %v524_v45 = vshll.u32 %v2851_v29, 16  ;;  %v2194_v39 = vld [vmem:[%s2587_s25 + $0x7c] sm:$0x1] }
  0x52   : > { %v2882_v37 = vsel %vm2650_vm6, %v2207_v47, %v917_v53  ;;  %v973_v56 = vmax.bf16 %v958_v54, %v914_v58  ;;  %v1018_v52 = vmax.bf16 %v1003_v55, %v914_v58  ;;  %v530_v0 = vshll.u32 %v414_v49, 16 }
  0x53   : > { %v788_v10 = vsel %vm2632_vm5, %v783_v57, %v787_v43  ;;  %v523_v32 = vrot.slane %v521_v59, 4  ;;  %v526_v1 = vrot.slane %v524_v45, 5  ;;  %v2180_v48 = vrot.slane %v2851_v29, 9  ;;  %v2925_v43 = vld [vmem:[%s2587_s25 + $0x80] sm:$0xf] }
  0x54   : > { %v950_v3 = vmax.bf16 %v942_v41, %v788_v10  ;;  %v2891_v4 = vmax.bf16 %v849_v12, %v788_v10  ;;  %v981_v5 = vmax.bf16 %v2834_v2, %v973_v56  ;;  %v2895_v50 = vmax.bf16 %v2885_v11, %v1018_v52 }
  0x55   : > { %v2898_v8 = vcombine.low %v774_v15, %v788_v10  ;;  %v527_v20 = vor.u32 %v526_v1, %v523_v32  ;;  %v532_v21 = vrot.slane %v530_v0, 5  ;;  %v599_v23 = vrot.slane %v414_v49, 5 }
  0x56   : > { %v959_v25 = vmax.bf16 %v950_v3, %v914_v58  ;;  %v943_v14 = vmax.bf16 %v2882_v37, %v2891_v4  ;;  %v2902_v42 = vmax.bf16 %v981_v5, %v788_v10  ;;  %v626_v51 = vshrl.u32 %v415_v16, 16  ;;  %v2196_v58 = vld [vmem:[%s2587_s25 + $0x84] sm:$0x1] }
  0x57   : > { %2357 = vmatmul.mubr.msk.bf16.vlgmr.msra.gmra.mrb[0].mxu0 %vm1354_vm7, %v2898_v8  ;;  %2367 = vmatmul.mubr.msk.bf16.vlgmr.msra.gmra.mrb[0].mxu1 %vm1354_vm7, %v2898_v8  ;;  %v528_v2 = vrot.slane %v527_v20, 4  ;;  %v600_v22 = vsel %vm2650_vm6, %v2180_v48, %v599_v23  ;;  %v629_v13 = vshll.u32 %v415_v16, 16  ;;  %v635_v26 = vshll.u32 %v416_v60, 16 }
  0x58   : > { %v974_v28 = vmax.bf16 %v959_v25, %v2882_v37  ;;  %v1019_v30 = vmax.bf16 %v2902_v42, %v2882_v37  ;;  %2375 = vmatpush3.bf16.msra.mxu0 %v2579_v6  ;;  %2385 = vmatpush3.bf16.msra.mxu1 %v2582_v7  ;;  %v628_v62 = vrot.slane %v626_v51, 4  ;;  %v2181_v31 = vrot.slane %v415_v16, 9  ;;  %v2218_v37 = vld [vmem:[%s2587_s25 + $0xb4] sm:$0x1] }
  0x59   : > { %v533_v17 = vsel %vm2632_vm5, %v528_v2, %v532_v21  ;;  %v631_v34 = vrot.slane %v629_v13, 5  ;;  %v637_v15 = vrot.slane %v635_v26, 5  ;;  %v652_v18 = vrot.slane %v416_v60, 5 }
  0x5a   : > { %v549_v35 = vmax.bf16 %v533_v17, %v2851_v29  ;;  %v646_v41 = vmax.bf16 %v623_v63, %v533_v17  ;;  %v668_v6 = vmax.bf16 %v660_v27, %v2851_v29  ;;  %v982_v7 = vmax.bf16 %v2193_v33, %v974_v28 }
  0x5b   : > { %v632_v46 = vor.u32 %v631_v34, %v628_v62  ;;  %v653_v40 = vsel %vm2650_vm6, %v2181_v31, %v652_v18  ;;  %v790_v47 = vshrl.u32 %v2193_v33, 16  ;;  %v793_v49 = vshll.u32 %v2193_v33, 16  ;;  %v418_v18 = vld [vmem:[%s2587_s25 + $0x4c] sm:$0x1] }
  0x5c   : > { %v616_v12 = vmax.bf16 %v600_v22, %v549_v35  ;;  %v661_v53 = vmax.bf16 %v646_v41, %v600_v22  ;;  %v691_v54 = vmax.bf16 %v668_v6, %v533_v17  ;;  %v799_v55 = vshll.u32 %v2194_v39, 16  ;;  %v2948_v41 = vld [vmem:[%s2587_s25 + $0xc0] sm:$0xf] }
  0x5d   : > { %v633_v57 = vrot.slane %v632_v46, 4  ;;  %v792_v59 = vrot.slane %v790_v47, 4  ;;  %v795_v24 = vrot.slane %v793_v49, 5  ;;  %v804_v63 = vshrl.u32 %v2925_v43, 16 }
  0x5e   : > { %v624_v29 = vmax.bf16 %v616_v12, %v415_v16  ;;  %v669_v27 = vmax.bf16 %v661_v53, %v415_v16  ;;  %v706_v45 = vmax.bf16 %v691_v54, %v600_v22  ;;  %v801_v56 = vrot.slane %v799_v55, 5  ;;  %v417_v22 = vld [vmem:[%s2587_s25 + $0x48] sm:$0xf] }
  0x5f   : > { %v638_v52 = vsel %vm2632_vm5, %v633_v57, %v637_v15  ;;  %v796_v0 = vor.u32 %v795_v24, %v792_v59  ;;  %v806_v10 = vrot.slane %v804_v63, 4  ;;  %v807_v32 = vshll.u32 %v2925_v43, 16  ;;  %v2953_v53 = vld [vmem:[%s2587_s25 + $0x88] sm:$0xf]  ;;  %v2198_v59 = vld [vmem:[%s2587_s25 + $0x8c] sm:$0x1] }
  0x60   : > { %v647_v1 = vmax.bf16 %v638_v52, %v624_v29  ;;  %v692_v48 = vmax.bf16 %v669_v27, %v638_v52  ;;  %v813_v3 = vshll.u32 %v2196_v58, 16  ;;  %v850_v5 = vmax.bf16 %v2193_v33, %v706_v45  ;;  %v2963_v45 = vld [vmem:[%s2587_s25 + $0x90] sm:$0xf] }
  0x61   : > { %v797_v60 = vrot.slane %v796_v0, 4  ;;  %v809_v20 = vrot.slane %v807_v32, 5  ;;  %v2208_v21 = vrot.slane %v2193_v33, 9  ;;  %v921_v23 = vrot.slane %v2194_v39, 5 }
  0x62   : > { %v662_v16 = vmax.bf16 %v653_v40, %v647_v1  ;;  %v707_v25 = vmax.bf16 %v692_v48, %v653_v40  ;;  %v815_v51 = vrot.slane %v813_v3, 5  ;;  %v2209_v2 = vrot.slane %v2925_v43, 9  ;;  %v2200_v48 = vld [vmem:[%s2587_s25 + $0x94] sm:$0x1] }
  0x63   : > { %v802_v13 = vsel %vm2632_vm5, %v797_v60, %v801_v56  ;;  %v810_v26 = vor.u32 %v809_v20, %v806_v10  ;;  %v922_v28 = vsel %vm2650_vm6, %v2208_v21, %v921_v23  ;;  %v925_v62 = vrot.slane %v2196_v58, 5 }
  0x64   : > { %v1005_v31 = vmax.bf16 %v982_v7, %v802_v13  ;;  %v851_v17 = vmax.bf16 %v2925_v43, %v707_v25  ;;  %v880_v34 = vmax.bf16 %v850_v5, %v802_v13  ;;  %v951_v15 = vmax.bf16 %v2193_v33, %v943_v14 }
  0x65   : > { %v811_v39 = vrot.slane %v810_v26, 4  ;;  %v926_v35 = vsel %vm2650_vm6, %v2209_v2, %v925_v62  ;;  %v670_v6 = vmax.bf16 %v662_v16, %v417_v22  ;;  %v672_v46 = vshrl.u32 %v417_v22, 16  ;;  %v2981_v62 = vld [vmem:[%s2587_s25 + $0x98] sm:$0xf] }
  0x66   : > { %v1020_v40 = vmax.bf16 %v1005_v31, %v922_v28  ;;  %v944_v7 = vmax.bf16 %v922_v28, %v880_v34  ;;  %v960_v47 = vmax.bf16 %v951_v15, %v802_v13  ;;  %v675_v49 = vshll.u32 %v417_v22, 16 }
  0x67   : > { %v816_v4 = vsel %vm2632_vm5, %v811_v39, %v815_v51  ;;  %v674_v12 = vrot.slane %v672_v46, 4  ;;  %v681_v14 = vshll.u32 %v418_v18, 16  ;;  %v2182_v33 = vrot.slane %v417_v22, 9  ;;  %v2987_v39 = vld [vmem:[%s2587_s25 + $0x9c] sm:$0x1] }
  0x68   : > { %v881_v54 = vmax.bf16 %v851_v17, %v816_v4  ;;  %v952_v55 = vmax.bf16 %v2925_v43, %v944_v7  ;;  %v975_v57 = vmax.bf16 %v960_v47, %v922_v28  ;;  %v2957_v58 = vmax.bf16 %v2948_v41, %v1020_v40 }
  0x69   : > { %v2960_v24 = vcombine.low %v802_v13, %v816_v4  ;;  %v677_v63 = vrot.slane %v675_v49, 5  ;;  %v683_v29 = vrot.slane %v681_v14, 5  ;;  %v698_v27 = vrot.slane %v418_v18, 5 }
  0x6a   : > { %v945_v56 = vmax.bf16 %v926_v35, %v881_v54  ;;  %v961_v52 = vmax.bf16 %v952_v55, %v816_v4  ;;  %v983_v0 = vmax.bf16 %v2925_v43, %v975_v57  ;;  %v818_v10 = vshrl.u32 %v2953_v53, 16 }
  0x6b   : > { %2360 = vmatprep.mubr.msk.bf16.mxu0 %vm1354_vm7, %v2960_v24  ;;  %2370 = vmatprep.mubr.msk.bf16.mxu1 %vm1354_vm7, %v2960_v24  ;;  %v678_v32 = vor.u32 %v677_v63, %v674_v12  ;;  %v699_v1 = vsel %vm2650_vm6, %v2182_v33, %v698_v27  ;;  %v821_v3 = vshll.u32 %v2953_v53, 16  ;;  %v827_v5 = vshll.u32 %v2198_v59, 16 }
  0x6c   : > { %v976_v60 = vmax.bf16 %v961_v52, %v926_v35  ;;  %v1006_v20 = vmax.bf16 %v983_v0, %v816_v4  ;;  %v820_v43 = vrot.slane %v818_v10, 4  ;;  %v832_v21 = vshrl.u32 %v2963_v45, 16 }
  0x6d   : > { %v679_v23 = vrot.slane %v678_v32, 4  ;;  %v823_v16 = vrot.slane %v821_v3, 5  ;;  %v829_v25 = vrot.slane %v827_v5, 5  ;;  %v835_v51 = vshll.u32 %v2963_v45, 16 }
  0x6e   : > { %v1021_v2 = vmax.bf16 %v1006_v20, %v926_v35  ;;  %v834_v22 = vrot.slane %v832_v21, 4  ;;  %v841_v13 = vshll.u32 %v2200_v48, 16  ;;  %v2210_v26 = vrot.slane %v2953_v53, 9 }
  0x6f   : > { %v684_v28 = vsel %vm2632_vm5, %v679_v23, %v683_v29  ;;  %v824_v31 = vor.u32 %v823_v16, %v820_v43  ;;  %v837_v17 = vrot.slane %v835_v51, 5  ;;  %v929_v34 = vrot.slane %v2198_v59, 5 }
  0x70   : > { %v2984_v15 = vmax.bf16 %v2948_v41, %v1021_v2  ;;  %v693_v18 = vmax.bf16 %v684_v28, %v670_v6  ;;  %v843_v46 = vrot.slane %v841_v13, 5  ;;  %v953_v35 = vmax.bf16 %v2953_v53, %v945_v56  ;;  %v3003_v56 = vld [vmem:[%s2587_s25 + $0xc8] sm:$0xf]  ;;  %v3020_v2 = vld [vmem:[%s2587_s25 + $0xac] sm:$0x1] }
  0x71   : > { %v825_v40 = vrot.slane %v824_v31, 4  ;;  %v838_v7 = vor.u32 %v837_v17, %v834_v22  ;;  %v930_v47 = vsel %vm2650_vm6, %v2210_v26, %v929_v34  ;;  %v2211_v49 = vrot.slane %v2963_v45, 9  ;;  %v3026_v28 = vld [vmem:[%s2587_s25 + $0xb0] sm:$0xf] }
  0x72   : > { %v708_v4 = vmax.bf16 %v699_v1, %v693_v18  ;;  %v968_v12 = vrot.slane %v2200_v48, 5  ;;  %v984_v14 = vmax.bf16 %v2953_v53, %v976_v60  ;;  %v988_v6 = vshrl.u32 %v2981_v62, 16  ;;  %v3008_v1 = vld [vmem:[%s2587_s25 + $0xcc] sm:$0x1] }
  0x73   : > { %v830_v33 = vsel %vm2632_vm5, %v825_v40, %v829_v25  ;;  %v839_v54 = vrot.slane %v838_v7, 4  ;;  %v991_v55 = vshll.u32 %v2981_v62, 16  ;;  %v997_v57 = vshll.u32 %v2987_v39, 16 }
  0x74   : > { %v852_v59 = vmax.bf16 %v2953_v53, %v708_v4  ;;  %v962_v63 = vmax.bf16 %v953_v35, %v830_v33  ;;  %v969_v29 = vsel %vm2650_vm6, %v2211_v49, %v968_v12  ;;  %v990_v27 = vrot.slane %v988_v6, 4  ;;  %v3046_v49 = vld [vmem:[%s2587_s25 + $0xd0] sm:$0xf]  ;;  %v3052_v12 = vld [vmem:[%s2587_s25 + $0xb8] sm:$0xf] }
  0x75   : > { %v844_v52 = vsel %vm2632_vm5, %v839_v54, %v843_v46  ;;  %v993_v0 = vrot.slane %v991_v55, 5  ;;  %v999_v10 = vrot.slane %v997_v57, 5  ;;  %v1007_v32 = vmax.bf16 %v984_v14, %v830_v33 }
  0x76   : > { %v882_v48 = vmax.bf16 %v852_v59, %v830_v33  ;;  %v977_v3 = vmax.bf16 %v962_v63, %v930_v47  ;;  %v2212_v53 = vrot.slane %v2981_v62, 9  ;;  %v1180_v5 = vmax.bf16 %v3003_v56, %v2957_v58  ;;  %v2220_v63 = vld [vmem:[%s2587_s25 + $0xbc] sm:$0x1] }
  0x77   : > { %v994_v60 = vor.u32 %v993_v0, %v990_v27  ;;  %v1022_v20 = vmax.bf16 %v1007_v32, %v930_v47  ;;  %v1128_v43 = vshrl.u32 %v3003_v56, 16  ;;  %v1131_v21 = vshll.u32 %v3003_v56, 16 }
  0x78   : > { %v946_v23 = vmax.bf16 %v930_v47, %v882_v48  ;;  %v985_v16 = vmax.bf16 %v2963_v45, %v977_v3  ;;  %v1137_v25 = vshll.u32 %v3008_v1, 16  ;;  %v3017_v51 = vcombine.low %v830_v33, %v844_v52  ;;  %v2222_v3 = vld [vmem:[%s2587_s25 + $0xc4] sm:$0x1] }
  0x79   : > { %v995_v22 = vrot.slane %v994_v60, 4  ;;  %v3023_v13 = vmax.bf16 %v3003_v56, %v1022_v20  ;;  %v1130_v58 = vrot.slane %v1128_v43, 4  ;;  %v1133_v26 = vrot.slane %v1131_v21, 5 }
  0x7a   : > { %v954_v31 = vmax.bf16 %v2963_v45, %v946_v23  ;;  %v1008_v17 = vmax.bf16 %v985_v16, %v844_v52  ;;  %v1139_v34 = vrot.slane %v1137_v25, 5  ;;  %2361 = vmatmul.mubr.msk.bf16.gmra.mrb[4].mxu0 %vm1354_vm7, %v3017_v51  ;;  %2371 = vmatmul.mubr.msk.bf16.gmra.mrb[4].mxu1 %vm1354_vm7, %v3017_v51  ;;  %v3037_v18 = vmax.bf16 %v3026_v28, %v1019_v30 }
  0x7b   : > { %v1000_v46 = vsel %vm2632_vm5, %v995_v22, %v999_v10  ;;  %v1134_v35 = vor.u32 %v1133_v26, %v1130_v58  ;;  %2376 = vmatprep.mubr.msk.bf16.mxu0 %vm1354_vm7, %v2784_v9  ;;  %v1072_v45 = vshrl.u32 %v2885_v11, 16  ;;  %v1075_v40 = vshll.u32 %v2885_v11, 16 }
  0x7c   : > { %v963_v7 = vmax.bf16 %v954_v31, %v844_v52  ;;  %v1023_v47 = vmax.bf16 %v1008_v17, %v969_v29  ;;  %v1081_v42 = vshll.u32 %v3020_v2, 16  ;;  %v1086_v30 = vshrl.u32 %v3026_v28, 16 }
  0x7d   : > { %v1135_v4 = vrot.slane %v1134_v35, 4  ;;  %v1074_v14 = vrot.slane %v1072_v45, 4  ;;  %v1077_v9 = vrot.slane %v1075_v40, 5  ;;  %v1089_v6 = vshll.u32 %v3026_v28, 16 }
  0x7e   : > { %v978_v33 = vmax.bf16 %v969_v29, %v963_v7  ;;  %v3056_v54 = vmax.bf16 %v3046_v49, %v1023_v47  ;;  %v1083_v55 = vrot.slane %v1081_v42, 5  ;;  %v1088_v57 = vrot.slane %v1086_v30, 4 }
  0x7f   : > { %v3060_v59 = vsel %vm2632_vm5, %v1135_v4, %v1139_v34  ;;  %v1078_v27 = vor.u32 %v1077_v9, %v1074_v14  ;;  %v1091_v52 = vrot.slane %v1089_v6, 5  ;;  %v1095_v0 = vshll.u32 %v2218_v37, 16 }
  0x80   : > { %v986_v10 = vmax.bf16 %v2981_v62, %v978_v33  ;;  %v1244_v32 = vmax.bf16 %v1180_v5, %v3060_v59  ;;  %v1182_v29 = vmax.bf16 %v3060_v59, %v3023_v13  ;;  %v1100_v48 = vshrl.u32 %v3052_v12, 16 }
  0x81   : > { %v1079_v60 = vrot.slane %v1078_v27, 4  ;;  %v1092_v20 = vor.u32 %v1091_v52, %v1088_v57  ;;  %v1097_v43 = vrot.slane %v1095_v0, 5  ;;  %v1103_v21 = vshll.u32 %v3052_v12, 16 }
  0x82   : > { %v3070_v23 = vmax.bf16 %v1000_v46, %v986_v10  ;;  %2377 = vmatmul.mubr.msk.bf16.vlgmr.msra.gmra.mrb[8].mxu0 %vm1354_vm7, %v2898_v8  ;;  %v1252_v16 = vmax.bf16 %v3052_v12, %v1244_v32  ;;  %v1102_v25 = vrot.slane %v1100_v48, 4  ;;  %v1109_v5 = vshll.u32 %v2220_v63, 16 }
  0x83   : > { %v1084_v22 = vsel %vm2632_vm5, %v1079_v60, %v1083_v55  ;;  %v1093_v58 = vrot.slane %v1092_v20, 4  ;;  %v1105_v26 = vrot.slane %v1103_v21, 5  ;;  %v1114_v31 = vshrl.u32 %v2948_v41, 16  ;;  %2380 = vmatprep.mubr.msk.bf16.mxu0 %vm1354_vm7, %v2960_v24 }
  0x84   : > { %v1111_v17 = vrot.slane %v1109_v5, 5  ;;  %v1117_v34 = vshll.u32 %v2948_v41, 16  ;;  %v1123_v46 = vshll.u32 %v2222_v3, 16  ;;  %v1178_v8 = vmax.bf16 %v1084_v22, %v2895_v50 }
  0x85   : > { %v1098_v35 = vsel %vm2632_vm5, %v1093_v58, %v1097_v43  ;;  %v1106_v45 = vor.u32 %v1105_v26, %v1102_v25  ;;  %v1116_v40 = vrot.slane %v1114_v31, 4  ;;  %v2234_v7 = vrot.slane %v2885_v11, 9 }
  0x86   : > { %v1119_v47 = vrot.slane %v1117_v34, 5  ;;  %v1125_v42 = vrot.slane %v1123_v46, 5  ;;  %v1179_v30 = vmax.bf16 %v1098_v35, %v3037_v18  ;;  %v1207_v4 = vrot.slane %v3020_v2, 5 }
  0x87   : > { %v1107_v24 = vrot.slane %v1106_v45, 4  ;;  %v2235_v14 = vrot.slane %v3026_v28, 9  ;;  %v1211_v9 = vrot.slane %v2218_v37, 5  ;;  %v2236_v6 = vrot.slane %v3052_v12, 9 }
  0x88   : > { %v1120_v50 = vor.u32 %v1119_v47, %v1116_v40  ;;  %v1208_v33 = vsel %vm2650_vm6, %v2234_v7, %v1207_v4  ;;  %v1215_v55 = vrot.slane %v2220_v63, 5  ;;  %v2237_v57 = vrot.slane %v2948_v41, 9 }
  0x89   : > { %v1112_v27 = vsel %vm2632_vm5, %v1107_v24, %v1111_v17  ;;  %v1212_v18 = vsel %vm2650_vm6, %v2235_v14, %v1211_v9  ;;  %v1219_v2 = vrot.slane %v2222_v3, 5  ;;  %v1242_v52 = vmax.bf16 %v1208_v33, %v1178_v8 }
  0x8a   : > { %v1275_v0 = vmax.bf16 %v1252_v16, %v1112_v27  ;;  %v1121_v10 = vrot.slane %v1120_v50, 4  ;;  %v1216_v37 = vsel %vm2650_vm6, %v2236_v6, %v1215_v55  ;;  %v1243_v32 = vmax.bf16 %v1212_v18, %v1179_v30  ;;  %2381 = vmatmul.mubr.msk.bf16.gmra.mrb[12].mxu0 %vm1354_vm7, %v3017_v51 }
  0x8b   : > { %v1220_v63 = vsel %vm2650_vm6, %v2237_v57, %v1219_v2  ;;  %v1249_v48 = vmax.bf16 %v2885_v11, %v1241_v44  ;;  %v1250_v3 = vmax.bf16 %v3026_v28, %v1242_v52  ;;  %v2238_v60 = vrot.slane %v3003_v56, 9  ;;  %v2226_v44 = vld [vmem:[%s2587_s25 + $0xd4] sm:$0x1] }
  0x8c   : > { %v1126_v20 = vsel %vm2632_vm5, %v1121_v10, %v1125_v42  ;;  %v1251_v43 = vmax.bf16 %v3052_v12, %v1243_v32  ;;  %v1223_v51 = vrot.slane %v3008_v1, 5  ;;  %v1014_v21 = vrot.slane %v2987_v39, 5 }
  0x8d   : > { %v1290_v16 = vmax.bf16 %v1275_v0, %v1126_v20  ;;  %v1181_v25 = vmax.bf16 %v1126_v20, %v2984_v15  ;;  %v1272_v19 = vmax.bf16 %v1249_v48, %v1084_v22  ;;  %v1273_v38 = vmax.bf16 %v1250_v3, %v1098_v35  ;;  %v3126_v22 = vld [vmem:[%s2587_s25 + $0xd8] sm:$0xf]  ;;  %v2229_v3 = vld [vmem:[%s2587_s25 + $0xe0] sm:$0xf] }
  0x8e   : > { %v1274_v11 = vmax.bf16 %v1251_v43, %v1112_v27  ;;  %v3117_v5 = vsel %vm2650_vm6, %v2238_v60, %v1223_v51  ;;  %v1015_v58 = vsel %vm2650_vm6, %v2212_v53, %v1014_v21  ;;  %v1142_v1 = vshrl.u32 %v3046_v49, 16  ;;  %v2228_v53 = vld [vmem:[%s2587_s25 + $0xdc] sm:$0x1]  ;;  %v2230_v60 = vld [vmem:[%s2587_s25 + $0xe4] sm:$0x1] }
  0x8f   : > { %v1298_v39 = vmax.bf16 %v1290_v16, %v1216_v37  ;;  %v1287_v26 = vmax.bf16 %v1272_v19, %v1208_v33  ;;  %v1288_v31 = vmax.bf16 %v1273_v38, %v1212_v18  ;;  %v1024_v15 = vmax.bf16 %v1015_v58, %v3070_v23 }
  0x90   : > { %v1289_v17 = vmax.bf16 %v1274_v11, %v1216_v37  ;;  %v1144_v34 = vrot.slane %v1142_v1, 4  ;;  %v1145_v46 = vshll.u32 %v3046_v49, 16  ;;  %v1151_v8 = vshll.u32 %v2226_v44, 16  ;;  %v2231_v1 = vld [vmem:[%s2587_s25 + $0xe8] sm:$0xf] }
  0x91   : > { %v1321_v45 = vmax.bf16 %v1298_v39, %v1220_v63  ;;  %v1295_v62 = vmax.bf16 %v3026_v28, %v1287_v26  ;;  %v1296_v40 = vmax.bf16 %v3052_v12, %v1288_v31  ;;  %v1056_v7 = vmax.bf16 %v3126_v22, %v1024_v15 }
  0x92   : > { %v1297_v47 = vmax.bf16 %v2948_v41, %v1289_v17  ;;  %v1147_v42 = vrot.slane %v1145_v46, 5  ;;  %v1153_v30 = vrot.slane %v1151_v8, 5  ;;  %v1156_v23 = vshrl.u32 %v3126_v22, 16 }
  0x93   : > { %v1318_v4 = vmax.bf16 %v1295_v62, %v1098_v35  ;;  %v1319_v24 = vmax.bf16 %v1296_v40, %v1112_v27  ;;  %v1336_v14 = vmax.bf16 %v1321_v45, %v3117_v5  ;;  %v1159_v9 = vshll.u32 %v3126_v22, 16  ;;  %v2232_v45 = vld [vmem:[%s2587_s25 + $0xec] sm:$0x1] }
  0x94   : > { %v1320_v6 = vmax.bf16 %v1297_v47, %v1126_v20  ;;  %v1148_v28 = vor.u32 %v1147_v42, %v1144_v34  ;;  %v1158_v12 = vrot.slane %v1156_v23, 4  ;;  %v1165_v50 = vshll.u32 %v2228_v53, 16 }
  0x95   : > { %v1333_v33 = vmax.bf16 %v1318_v4, %v1212_v18  ;;  %v1334_v55 = vmax.bf16 %v1319_v24, %v1216_v37  ;;  %v1161_v57 = vrot.slane %v1159_v9, 5  ;;  %v2239_v41 = vrot.slane %v3046_v49, 9 }
  0x96   : > { %v1335_v2 = vmax.bf16 %v1320_v6, %v1220_v63  ;;  %v1149_v52 = vrot.slane %v1148_v28, 4  ;;  %v1167_v0 = vrot.slane %v1165_v50, 5  ;;  %v1227_v35 = vrot.slane %v2226_v44, 5 }
  0x97   : > { %v2283_v27 = vcombine.low %v1333_v33, %v1334_v55  ;;  %v1162_v10 = vor.u32 %v1161_v57, %v1158_v12  ;;  %v2240_v32 = vrot.slane %v3126_v22, 9  ;;  %v1231_v48 = vrot.slane %v2228_v53, 5 }
  0x98   : > { %v2284_v20 = vcombine.low %v1335_v2, %v1336_v14  ;;  %v1154_v43 = vsel %vm2632_vm5, %v1149_v52, %v1153_v30  ;;  %v1228_v18 = vsel %vm2650_vm6, %v2239_v41, %v1227_v35  ;;  %v1245_v37 = vmax.bf16 %v1220_v63, %v1181_v25 }
  0x99   : > { %2386 = vmatprep.mubr.msk.bf16.mxu1 %vm1354_vm7, %v2283_v27  ;;  %v1163_v51 = vrot.slane %v1162_v10, 4  ;;  %v1183_v21 = vmax.bf16 %v1154_v43, %v3056_v54  ;;  %v1232_v16 = vsel %vm2650_vm6, %v2240_v32, %v1231_v48  ;;  %v1246_v19 = vmax.bf16 %v3117_v5, %v1182_v29 }
  0x9a   : > { %2387 = vmatmul.mubr.msk.bf16.vlgmr.msra.gmra.mrb[8].mxu1 %vm1354_vm7, %v2284_v20  ;;  %v1253_v38 = vmax.bf16 %v3003_v56, %v1245_v37  ;;  %v1258_v44 = vshrl.u32 %v2229_v3, 16  ;;  %v1261_v11 = vshll.u32 %v2229_v3, 16  ;;  %v1267_v63 = vshll.u32 %v2230_v60, 16 }
  0x9b   : > { %v1168_v25 = vsel %vm2632_vm5, %v1163_v51, %v1167_v0  ;;  %v1247_v54 = vmax.bf16 %v1228_v18, %v1183_v21  ;;  %v1254_v58 = vmax.bf16 %v3046_v49, %v1246_v19  ;;  %v2241_v39 = vrot.slane %v2229_v3, 9 }
  0x9c   : > { %v1184_v26 = vmax.bf16 %v1168_v25, %v1056_v7  ;;  %v1276_v13 = vmax.bf16 %v1253_v38, %v3060_v59  ;;  %v1260_v29 = vrot.slane %v1258_v44, 4  ;;  %v1263_v31 = vrot.slane %v1261_v11, 5 }
  0x9d   : > { %v1255_v15 = vmax.bf16 %v3126_v22, %v1247_v54  ;;  %v1277_v56 = vmax.bf16 %v1254_v58, %v1154_v43  ;;  %v1269_v17 = vrot.slane %v1267_v63, 5  ;;  %v1284_v34 = vrot.slane %v2230_v60, 5 }
  0x9e   : > { %v1248_v46 = vmax.bf16 %v1232_v16, %v1184_v26  ;;  %v1291_v8 = vmax.bf16 %v1276_v13, %v3117_v5  ;;  %v1264_v62 = vor.u32 %v1263_v31, %v1260_v29  ;;  %v1304_v40 = vshrl.u32 %v2231_v1, 16 }
  0x9f   : > { %v1278_v53 = vmax.bf16 %v1255_v15, %v1168_v25  ;;  %v1292_v47 = vmax.bf16 %v1277_v56, %v1228_v18  ;;  %v1307_v42 = vshll.u32 %v2231_v1, 16  ;;  %v1313_v9 = vshll.u32 %v2232_v45, 16 }
  0xa0   : > { %v1299_v7 = vmax.bf16 %v3046_v49, %v1291_v8  ;;  %v1256_v30 = vmax.bf16 %v2229_v3, %v1248_v46  ;;  %v1265_v59 = vrot.slane %v1264_v62, 4  ;;  %v1306_v23 = vrot.slane %v1304_v40, 4 }
  0xa1   : > { %v1293_v4 = vmax.bf16 %v1278_v53, %v1232_v16  ;;  %v1300_v24 = vmax.bf16 %v3126_v22, %v1292_v47  ;;  %v1309_v14 = vrot.slane %v1307_v42, 5  ;;  %v1285_v28 = vsel %vm2650_vm6, %v2241_v39, %v1284_v34 }
  0xa2   : > { %v1322_v6 = vmax.bf16 %v1299_v7, %v1154_v43  ;;  %v1270_v5 = vsel %vm2632_vm5, %v1265_v59, %v1269_v17  ;;  %v1315_v57 = vrot.slane %v1313_v9, 5  ;;  %v2242_v41 = vrot.slane %v2231_v1, 9 }
  0xa3   : > { %v1323_v12 = vmax.bf16 %v1300_v24, %v1168_v25  ;;  %v1279_v50 = vmax.bf16 %v1270_v5, %v1256_v30  ;;  %v1301_v33 = vmax.bf16 %v2229_v3, %v1293_v4  ;;  %v1310_v55 = vor.u32 %v1309_v14, %v1306_v23 }
  0xa4   : > { %v1337_v49 = vmax.bf16 %v1322_v6, %v1228_v18  ;;  %v1330_v2 = vrot.slane %v2232_v45, 5 }
  0xa5   : > { %v1338_v22 = vmax.bf16 %v1323_v12, %v1232_v16  ;;  %v1294_v52 = vmax.bf16 %v1285_v28, %v1279_v50  ;;  %v1311_v0 = vrot.slane %v1310_v55, 4  ;;  %v1324_v35 = vmax.bf16 %v1301_v33, %v1270_v5 }
  0xa6   : > { %v1331_v48 = vsel %vm2650_vm6, %v2242_v41, %v1330_v2 }
  0xa7   : > { %v2285_v27 = vcombine.low %v1337_v49, %v1338_v22  ;;  %v1302_v10 = vmax.bf16 %v2231_v1, %v1294_v52  ;;  %v1316_v32 = vsel %vm2632_vm5, %v1311_v0, %v1315_v57  ;;  %v1339_v60 = vmax.bf16 %v1324_v35, %v1285_v28 }
  0xa9   : > { %2390 = vmatprep.mubr.msk.bf16.mxu1 %vm1354_vm7, %v2285_v27  ;;  %v1325_v3 = vmax.bf16 %v1316_v32, %v1302_v10 }
  0xab   : > { %v1340_v20 = vmax.bf16 %v1331_v48, %v1325_v3 }
  0xad   : > { %v2286_v43 = vcombine.low %v1339_v60, %v1340_v20 }
  0xaf   : > { %2391 = vmatmul.mubr.msk.bf16.gmra.mrb[12].mxu1 %vm1354_vm7, %v2286_v43 }
 0x12a   : > { %v2358_v36 = vpop.f32.mrb[0].mxu0  ;;  %v2368_v61 = vpop.f32.mrb[0].mxu1 }
 0x12b   : > { %v1438_v18 = vmul.f32 0.999995, %v2358_v36  ;;  %v1564_v37 = vmul.f32 0.999995, %v2368_v61  ;;  %v1405_v51 = vpop.f32.mrb[1].mxu0  ;;  %v1531_v21 = vpop.f32.mrb[1].mxu1 }
 0x12c   : > { %v1436_v16 = vmul.f32 0.999995, %v1405_v51  ;;  %v1562_v19 = vmul.f32 0.999995, %v1531_v21  ;;  %v2359_v38 = vpop.f32.mrb[2].mxu0  ;;  %v2369_v44 = vpop.f32.mrb[2].mxu1 }
 0x12d   : > { %v1446_v11 = vmax.f32 %v1438_v18, 0.0  ;;  %v1572_v63 = vmax.f32 %v1564_v37, 0.0  ;;  %v1439_v25 = vmul.f32 0.999995, %v2359_v38  ;;  %v1565_v54 = vmul.f32 0.999995, %v2369_v44 }
 0x12e   : > { %v1444_v58 = vmax.f32 %v1436_v16, 0.0  ;;  %v1570_v1 = vmax.f32 %v1562_v19, 0.0  ;;  %v1408_v39 = vpop.f32.mrb[3].mxu0  ;;  %v1534_v26 = vpop.f32.mrb[3].mxu1 }
 0x12f   : > { %v2304_v13 = vpack.c.bf16 %v1446_v11, %v1446_v11  ;;  %v2312_v29 = vpack.c.bf16 %v1572_v63, %v1572_v63  ;;  %v1447_v31 = vmax.f32 %v1439_v25, 0.0  ;;  %v1573_v15 = vmax.f32 %v1565_v54, 0.0 }
 0x130   : > { %v2302_v56 = vpack.c.bf16 %v1444_v58, %v1444_v58  ;;  %v2310_v17 = vpack.c.bf16 %v1570_v1, %v1570_v1  ;;  %v1437_v34 = vmul.f32 0.999995, %v1408_v39  ;;  %v1563_v46 = vmul.f32 0.999995, %v1534_v26 }
 0x131   : > { %1487 = vst.msk [vmem:[%s3184_s15 + $0x8] sm:$0xf] %vm1484_vm8, %v2304_v13  ;;  %1612 = vst.msk [vmem:[%s3190_s18 + $0x8] sm:$0xf] %vm1484_vm8, %v2312_v29  ;;  %v2305_v8 = vpack.c.bf16 %v1447_v31, %v1447_v31  ;;  %v2313_v45 = vpack.c.bf16 %v1573_v15, %v1573_v15 }
 0x132   : > { %1485 = vst.msk [vmem:[%s3184_s15] sm:$0xf] %vm1484_vm8, %v2302_v56  ;;  %1610 = vst.msk [vmem:[%s3190_s18] sm:$0xf] %vm1484_vm8, %v2310_v17  ;;  %v1445_v62 = vmax.f32 %v1437_v34, 0.0  ;;  %v1571_v40 = vmax.f32 %v1563_v46, 0.0 }
 0x133   : > { %1488 = vst.msk [vmem:[%s3184_s15 + $0xc] sm:$0xf] %vm1484_vm8, %v2305_v8  ;;  %1613 = vst.msk [vmem:[%s3190_s18 + $0xc] sm:$0xf] %vm1484_vm8, %v2313_v45 }
 0x134   : > { %v2303_v53 = vpack.c.bf16 %v1445_v62, %v1445_v62  ;;  %v2311_v47 = vpack.c.bf16 %v1571_v40, %v1571_v40 }
 0x136   : > { %1486 = vst.msk [vmem:[%s3184_s15 + $0x4] sm:$0xf] %vm1484_vm8, %v2303_v53  ;;  %1611 = vst.msk [vmem:[%s3190_s18 + $0x4] sm:$0xf] %vm1484_vm8, %v2311_v47 }
 0x14d   : > { %v2362_v42 = vpop.f32.mrb[4].mxu0  ;;  %v2372_v7 = vpop.f32.mrb[4].mxu1 }
 0x14e   : > { %v1442_v30 = vmul.f32 0.999995, %v2362_v42  ;;  %v1568_v59 = vmul.f32 0.999995, %v2372_v7  ;;  %v1421_v23 = vpop.f32.mrb[5].mxu0  ;;  %v1547_v4 = vpop.f32.mrb[5].mxu1 }
 0x14f   : > { %v1440_v24 = vmul.f32 0.999995, %v1421_v23  ;;  %v1566_v14 = vmul.f32 0.999995, %v1547_v4  ;;  %v2363_v9 = vpop.f32.mrb[6].mxu0  ;;  %v2373_v6 = vpop.f32.mrb[6].mxu1 }
 0x150   : > { %v1450_v5 = vmax.f32 %v1442_v30, 0.0  ;;  %v1576_v28 = vmax.f32 %v1568_v59, 0.0  ;;  %v1443_v12 = vmul.f32 0.999995, %v2363_v9  ;;  %v1569_v50 = vmul.f32 0.999995, %v2373_v6 }
 0x151   : > { %v1448_v33 = vmax.f32 %v1440_v24, 0.0  ;;  %v1574_v55 = vmax.f32 %v1566_v14, 0.0  ;;  %v1424_v49 = vpop.f32.mrb[7].mxu0  ;;  %v1550_v57 = vpop.f32.mrb[7].mxu1 }
 0x152   : > { %v2308_v41 = vpack.c.bf16 %v1450_v5, %v1450_v5  ;;  %v2316_v2 = vpack.c.bf16 %v1576_v28, %v1576_v28  ;;  %v1451_v22 = vmax.f32 %v1443_v12, 0.0  ;;  %v1577_v52 = vmax.f32 %v1569_v50, 0.0 }
 0x153   : > { %v2306_v0 = vpack.c.bf16 %v1448_v33, %v1448_v33  ;;  %v2314_v35 = vpack.c.bf16 %v1574_v55, %v1574_v55  ;;  %v1441_v27 = vmul.f32 0.999995, %v1424_v49  ;;  %v1567_v10 = vmul.f32 0.999995, %v1550_v57 }
 0x154   : > { %1491 = vst.msk [vmem:[%s3184_s15 + $0x18] sm:$0xf] %vm1484_vm8, %v2308_v41  ;;  %1616 = vst.msk [vmem:[%s3190_s18 + $0x18] sm:$0xf] %vm1484_vm8, %v2316_v2  ;;  %v2309_v32 = vpack.c.bf16 %v1451_v22, %v1451_v22  ;;  %v2317_v48 = vpack.c.bf16 %v1577_v52, %v1577_v52 }
 0x155   : > { %1489 = vst.msk [vmem:[%s3184_s15 + $0x10] sm:$0xf] %vm1484_vm8, %v2306_v0  ;;  %1614 = vst.msk [vmem:[%s3190_s18 + $0x10] sm:$0xf] %vm1484_vm8, %v2314_v35  ;;  %v1449_v3 = vmax.f32 %v1441_v27, 0.0  ;;  %v1575_v60 = vmax.f32 %v1567_v10, 0.0 }
 0x156   : > { %v2378_v20 = vpop.f32.mrb[8].mxu0  ;;  %1492 = vst.msk [vmem:[%s3184_s15 + $0x1c] sm:$0xf] %vm1484_vm8, %v2309_v32  ;;  %1617 = vst.msk [vmem:[%s3190_s18 + $0x1c] sm:$0xf] %vm1484_vm8, %v2317_v48 }
 0x157   : > { %v1689_v43 = vmul.f32 0.999995, %v2378_v20  ;;  %v1656_v36 = vpop.f32.mrb[9].mxu0  ;;  %v2307_v61 = vpack.c.bf16 %v1449_v3, %v1449_v3  ;;  %v2315_v18 = vpack.c.bf16 %v1575_v60, %v1575_v60 }
 0x158   : > { %v1687_v37 = vmul.f32 0.999995, %v1656_v36  ;;  %v2379_v51 = vpop.f32.mrb[10].mxu0 }
 0x159   : > { %v1697_v21 = vmax.f32 %v1689_v43, 0.0  ;;  %v1690_v16 = vmul.f32 0.999995, %v2379_v51  ;;  %v1659_v19 = vpop.f32.mrb[11].mxu0  ;;  %1490 = vst.msk [vmem:[%s3184_s15 + $0x14] sm:$0xf] %vm1484_vm8, %v2307_v61 }
 0x15a   : > { %1615 = vst.msk [vmem:[%s3190_s18 + $0x14] sm:$0xf] %vm1484_vm8, %v2315_v18  ;;  %v1695_v38 = vmax.f32 %v1687_v37, 0.0  ;;  %v1688_v44 = vmul.f32 0.999995, %v1659_v19 }
 0x15b   : > { %v2320_v11 = vpack.c.bf16 %v1697_v21, %v1697_v21  ;;  %v1698_v63 = vmax.f32 %v1690_v16, 0.0 }
 0x15c   : > { %v2318_v25 = vpack.c.bf16 %v1695_v38, %v1695_v38  ;;  %v1696_v54 = vmax.f32 %v1688_v44, 0.0 }
 0x15d   : > { %1738 = vst.msk [vmem:[%s3228_s21 + $0x8] sm:$0xf] %vm1735_vm9, %v2320_v11  ;;  %v2321_v58 = vpack.c.bf16 %v1698_v63, %v1698_v63  ;;  %v2382_v39 = vpop.f32.mrb[12].mxu0 }
 0x15e   : > { %1736 = vst.msk [vmem:[%s3228_s21] sm:$0xf] %vm1735_vm9, %v2318_v25  ;;  %v2319_v1 = vpack.c.bf16 %v1696_v54, %v1696_v54  ;;  %v1693_v26 = vmul.f32 0.999995, %v2382_v39  ;;  %v1672_v13 = vpop.f32.mrb[13].mxu0 }
 0x15f   : > { %1739 = vst.msk [vmem:[%s3228_s21 + $0xc] sm:$0xf] %vm1735_vm9, %v2321_v58  ;;  %v1691_v29 = vmul.f32 0.999995, %v1672_v13  ;;  %v2383_v31 = vpop.f32.mrb[14].mxu0 }
 0x160   : > { %1737 = vst.msk [vmem:[%s3228_s21 + $0x4] sm:$0xf] %vm1735_vm9, %v2319_v1  ;;  %v1701_v15 = vmax.f32 %v1693_v26, 0.0  ;;  %v1694_v56 = vmul.f32 0.999995, %v2383_v31  ;;  %v1675_v17 = vpop.f32.mrb[15].mxu0 }
 0x161   : > { %v1699_v34 = vmax.f32 %v1691_v29, 0.0  ;;  %v1692_v46 = vmul.f32 0.999995, %v1675_v17 }
 0x162   : > { %v2324_v8 = vpack.c.bf16 %v1701_v15, %v1701_v15  ;;  %v1702_v45 = vmax.f32 %v1694_v56, 0.0 }
 0x163   : > { %v2322_v62 = vpack.c.bf16 %v1699_v34, %v1699_v34  ;;  %v1700_v40 = vmax.f32 %v1692_v46, 0.0 }
 0x164   : > { %1742 = vst.msk [vmem:[%s3228_s21 + $0x18] sm:$0xf] %vm1735_vm9, %v2324_v8  ;;  %v2325_v53 = vpack.c.bf16 %v1702_v45, %v1702_v45 }
 0x165   : > { %1740 = vst.msk [vmem:[%s3228_s21 + $0x10] sm:$0xf] %vm1735_vm9, %v2322_v62  ;;  %v2323_v47 = vpack.c.bf16 %v1700_v40, %v1700_v40 }
 0x166   : > { %1743 = vst.msk [vmem:[%s3228_s21 + $0x1c] sm:$0xf] %vm1735_vm9, %v2325_v53 }
 0x167   : > { %1741 = vst.msk [vmem:[%s3228_s21 + $0x14] sm:$0xf] %vm1735_vm9, %v2323_v47 }
 0x16d   : > { %v2388_v42 = vpop.f32.mrb[8].mxu1 }
 0x16e   : > { %v1847_v7 = vmul.f32 0.999995, %v2388_v42  ;;  %v1814_v30 = vpop.f32.mrb[9].mxu1 }
 0x16f   : > { %v1845_v59 = vmul.f32 0.999995, %v1814_v30  ;;  %v2389_v23 = vpop.f32.mrb[10].mxu1 }
 0x170   : > { %v1855_v4 = vmax.f32 %v1847_v7, 0.0  ;;  %v1848_v24 = vmul.f32 0.999995, %v2389_v23  ;;  %v1817_v14 = vpop.f32.mrb[11].mxu1 }
 0x171   : > { %v1853_v9 = vmax.f32 %v1845_v59, 0.0  ;;  %v1846_v6 = vmul.f32 0.999995, %v1817_v14 }
 0x172   : > { %v2328_v5 = vpack.c.bf16 %v1855_v4, %v1855_v4  ;;  %v1856_v28 = vmax.f32 %v1848_v24, 0.0 }
 0x173   : > { %v2326_v12 = vpack.c.bf16 %v1853_v9, %v1853_v9  ;;  %v1854_v50 = vmax.f32 %v1846_v6, 0.0 }
 0x174   : > { %1895 = vst.msk [vmem:[%s3250_s24 + $0x8] sm:$0xf] %vm1484_vm8, %v2328_v5  ;;  %v2329_v33 = vpack.c.bf16 %v1856_v28, %v1856_v28 }
 0x175   : > { %1893 = vst.msk [vmem:[%s3250_s24] sm:$0xf] %vm1484_vm8, %v2326_v12  ;;  %v2327_v55 = vpack.c.bf16 %v1854_v50, %v1854_v50 }
 0x176   : > { %1896 = vst.msk [vmem:[%s3250_s24 + $0xc] sm:$0xf] %vm1484_vm8, %v2329_v33 }
 0x177   : > { %1894 = vst.msk [vmem:[%s3250_s24 + $0x4] sm:$0xf] %vm1484_vm8, %v2327_v55 }
 0x182   : > { %v2392_v49 = vpop.f32.mrb[12].mxu1 }
 0x183   : > { %v1851_v57 = vmul.f32 0.999995, %v2392_v49  ;;  %v1830_v41 = vpop.f32.mrb[13].mxu1 }
 0x184   : > { %v1849_v2 = vmul.f32 0.999995, %v1830_v41  ;;  %v2393_v22 = vpop.f32.mrb[14].mxu1 }
 0x185   : > { %v1859_v52 = vmax.f32 %v1851_v57, 0.0  ;;  %v1852_v0 = vmul.f32 0.999995, %v2393_v22  ;;  %v1833_v35 = vpop.f32.mrb[15].mxu1 }
 0x186   : > { %v1857_v27 = vmax.f32 %v1849_v2, 0.0  ;;  %v1850_v10 = vmul.f32 0.999995, %v1833_v35 }
 0x187   : > { %v2332_v32 = vpack.c.bf16 %v1859_v52, %v1859_v52  ;;  %v1860_v48 = vmax.f32 %v1852_v0, 0.0 }
 0x188   : > { %v2330_v3 = vpack.c.bf16 %v1857_v27, %v1857_v27  ;;  %v1858_v60 = vmax.f32 %v1850_v10, 0.0 }
 0x189   : > { %1899 = vst.msk [vmem:[%s3250_s24 + $0x18] sm:$0xf] %vm1484_vm8, %v2332_v32  ;;  %v2333_v20 = vpack.c.bf16 %v1860_v48, %v1860_v48 }
 0x18a   : > { %1897 = vst.msk [vmem:[%s3250_s24 + $0x10] sm:$0xf] %vm1484_vm8, %v2330_v3  ;;  %v2331_v43 = vpack.c.bf16 %v1858_v60, %v1858_v60 }
 0x18b   : > { %1900 = vst.msk [vmem:[%s3250_s24 + $0x1c] sm:$0xf] %vm1484_vm8, %v2333_v20 }
 0x18c   : > { %1898 = vst.msk [vmem:[%s3250_s24 + $0x14] sm:$0xf] %vm1484_vm8, %v2331_v43 }
 0x18d PF: > { %s19_s9 = sadd.s32 1, %s2477_s9   ;;  %s3296_s27 = smov %s2469_s29 }
 0x18e   : > { %p16_p7 = scmp.ge.s32.totalorder %s19_s9, 10   ;;  %s3297_s28 = smov %s2473_s30 }
 0x18f   : > { %s3298_s29 = smov %s3301_s10  ;;  %s3299_s30 = smov %s3305_s11 }
 0x190   :  { %18 = sbr.rel (!%p16_p7) target bundleno = 3 (0x3), region = 109 }

// kernel: a_call__.4
= control target key start
LH: loop header
LB: loop body
LE: loop exit
PB: predicated region body
PF: predicated region fallthrough
CT: control target
= control target key end

     0   :  { %s2357_s9 = smov 0   ;;  %s2359_s10 = smov 0   ;;  %s3815_s0 = inlined_call_operand.vmem [shape: bf16[2,6,10,10,8], index: 0, kind: input, shape index: {}]   ;;  %s3816_s1 = inlined_call_operand.vmem [shape: bf16[216,12], index: 1, kind: input, shape index: {}]   ;;  %s3817_s2 = inlined_call_operand.vmem [shape: bf16[2,4,64,12], index: 2, kind: output, shape index: {}]  }
   0x1   :  { %s2361_s11 = smov 0   ;;  %s2363_s12 = smov 0  }
   0x2   :  { %s2365_s13 = smov 0  }
   0x3 LB: > { %s21_s14 = sadd.s32 1, %s2316_s11  ;;  %s24_s15 = sadd.s32 1, %s2320_s12  ;;  %s2324_s13 = sphi %s2365_s13, %s12_s13   ;;  %s2320_s12 = sphi %s2363_s12, %s4004_s12   ;;  %s2316_s11 = sphi %s2361_s11, %s4003_s11   ;;  %s2312_s10 = sphi %s2359_s10, %s4002_s10   ;;  %s2308_s9 = sphi %s2357_s9, %s4001_s9  }
   0x4   : > { %p22_p0 = scmp.ge.s32.totalorder %s21_s14, 4  ;;  %p1967_p1 = scmp.ge.s32.totalorder %s2324_s13, 1 }
   0x5   : > { %p126_p2 = scmp.lt.s32.totalorder %s2324_s13, 9 }
   0x6   : > { %s4006_s14 = smov (%p22_p0, %s21_s14), 0  ;;  %s4008_s15 = smov (!%p22_p0, %s24_s15), %s2320_s12 }
   0x7   : > { %p127_p3 = pnand %p1967_p1, %p126_p2  ;;  %p26_p4 = scmp.ge.s32.totalorder %s4008_s15, 2 }
   0x9   : > { %s4010_s15 = smov (%p26_p4, %s4008_s15), 0  ;;  %130 = sbr.rel (%p127_p3) target bundleno = 765 (0x2fd), region = 28 }
  0x10   : > { %p152_p5 = scmp.lt.s32.totalorder %s2312_s10, 1  ;;  %s2108_s16 = smul.u32 80, %s2308_s9  ;;  %vm1743_vm0 = vcmask 1043456   ;;  %vm746_vm1 = vcmask 64512   ;;  %vm771_vm2 = vcmask 130048   ;;  %vm788_vm3 = vcmask 195584  }
  0x11   : > { %s2326_s22 = smov 16   ;;  %s2327_s23 = smov 8   ;;  %vm805_vm4 = vcmask 261120   ;;  %vm822_vm5 = vcmask 326656   ;;  %vm839_vm6 = vcmask 392192   ;;  %vm856_vm7 = vcmask 457728  }
  0x12   : > { %s4012_s10 = smov (!%p152_p5, %s2312_s10), 1  ;;  %s2328_s24 = smov 24   ;;  %vm873_vm8 = vcmask 523264   ;;  %vm890_vm9 = vcmask 588800   ;;  %vm907_vm10 = vcmask 654336   ;;  %vm924_vm11 = vcmask 719872  }
  0x13   : > { %s2145_s17 = smul.u32 480, %s4012_s10  ;;  %s2329_s25 = smov 32   ;;  %vm941_vm12 = vcmask 785408   ;;  %vm958_vm13 = vcmask 850944   ;;  %vm975_vm14 = vcmask 916480   ;;  %vm992_vm15 = vcmask 982016  }
  0x14   : > { %s2330_s26 = smov 40   ;;  %s2331_s27 = smov 48  }
  0x15   : > { %s156_s20 = scalar_lea.vmem %s3815_s0, %s2145_s17  ;;  %s2332_s28 = smov 56  }
  0x16   : > { %s2396_s21 = scalar_lea.vmem %s156_s20, %s2108_s16  ;;  %s2333_s29 = smov 64  }
  0x17   : > { %v2399_v0 = vld [vmem:[%s2396_s21 + $0x8] sm:$0xf]  ;;  %v173_v1 = vld [vmem:[%s2396_s21 + $0xc] sm:$0x1]  ;;  %v170_v2 = vld [vmem:[%s2396_s21] sm:$0xf] }
  0x18   : > { %v2404_v3 = vcombine.low %v2399_v0, %v173_v1  ;;  %v171_v4 = vld [vmem:[%s2396_s21 + $0x4] sm:$0x1]  ;;  %v2408_v5 = vld [vmem:[%s2396_s21 + $0x10] sm:$0xf]  ;;  %v175_v6 = vld [vmem:[%s2396_s21 + $0x14] sm:$0x1] }
  0x19   : > { %v2013_v7 = vcombine.low %v170_v2, %v171_v4  ;;  %v2015_v8 = vcombine.low %v2408_v5, %v175_v6  ;;  %v2413_v9 = vld [vmem:[%s2396_s21 + $0x18] sm:$0xf]  ;;  %v177_v10 = vld [vmem:[%s2396_s21 + $0x1c] sm:$0x1]  ;;  %v2420_v14 = vld [vmem:[%s2396_s21 + $0x28] sm:$0xf]  ;;  %v2022_v1 = vcombine.low %v2408_v5, %v2408_v5  ;;  %v2021_v2 = vcombine.low %v2399_v0, %v2399_v0 }
  0x1a   : > { %v351_v11 = vrot.slane %v2404_v3, 1  ;;  %v2016_v12 = vcombine.low %v2413_v9, %v177_v10  ;;  %v288_v13 = vshll.u32 %v2404_v3, 16  ;;  %v181_v15 = vld [vmem:[%s2396_s21 + $0x2c] sm:$0x1]  ;;  %v286_v19 = vshrl.u32 %v2404_v3, 16  ;;  %s2334_s30 = smov 72  }
  0x1b   : > { %v350_v16 = vrot.slane %v2013_v7, 1  ;;  %v293_v17 = vshrl.u32 %v2015_v8, 16  ;;  %v295_v18 = vshll.u32 %v2015_v8, 16  ;;  %v2425_v20 = vld [vmem:[%s2396_s21 + $0x20] sm:$0xf]  ;;  %v279_v21 = vshrl.u32 %v2013_v7, 16 }
  0x1c   : > { %360 = vrot.lane.b32.xlu1 %v351_v11, %s2326_s22  ;;  %v281_v22 = vshll.u32 %v2013_v7, 16  ;;  %v300_v23 = vshrl.u32 %v2016_v12, 16  ;;  %v302_v24 = vshll.u32 %v2016_v12, 16  ;;  %v179_v25 = vld [vmem:[%s2396_s21 + $0x24] sm:$0x1]  ;;  %v290_v27 = vrot.slane %v288_v13, 1 }
  0x1d   : > { %358 = vrot.lane.b32.xlu0 %v350_v16, %s2326_s22  ;;  %v297_v26 = vrot.slane %v295_v18, 1  ;;  %v2018_v28 = vcombine.low %v2420_v14, %v181_v15  ;;  %v2017_v29 = vcombine.low %v2425_v20, %v179_v25  ;;  %v2435_v30 = vld [vmem:[%s2396_s21 + $0x38] sm:$0xf]  ;;  %v185_v31 = vld [vmem:[%s2396_s21 + $0x3c] sm:$0x1]  ;;  %v2465_v58 = vrot.slane %v2016_v12, 1 }
  0x1e   : > { %v283_v32 = vrot.slane %v281_v22, 1  ;;  %v304_v33 = vrot.slane %v302_v24, 1  ;;  %v2020_v34 = vcombine.low %v2435_v30, %v185_v31  ;;  %v182_v35 = vld [vmem:[%s2396_s21 + $0x30] sm:$0xf]  ;;  %v183_v36 = vld [vmem:[%s2396_s21 + $0x34] sm:$0x1]  ;;  %v291_v46 = vor.u32 %v290_v27, %v286_v19 }
  0x1f   : > { %v2441_v37 = vor.u32 %v297_v26, %v293_v17  ;;  %v316_v38 = vshll.u32 %v2018_v28, 16  ;;  %v314_v40 = vshrl.u32 %v2018_v28, 16  ;;  %v309_v41 = vshll.u32 %v2017_v29, 16  ;;  %v186_v7 = vld [vmem:[%s2396_s21 + $0x40] sm:$0xf]  ;;  %s2335_s3 = smov 80  }
  0x20   : > { %v284_v39 = vor.u32 %v283_v32, %v279_v21  ;;  %v2445_v42 = vor.u32 %v304_v33, %v300_v23  ;;  %v330_v44 = vshll.u32 %v2020_v34, 16  ;;  %v2019_v45 = vcombine.low %v182_v35, %v183_v36  ;;  %v187_v10 = vld [vmem:[%s2396_s21 + $0x44] sm:$0x1]  ;;  %v2560_v3 = vld [vmem:[%s2396_s21 + $0x68] sm:$0xf]  ;;  %s2336_s4 = smov 88  }
  0x21   : > { %338 = vrot.lane.b32.xlu1 %v2441_v37, %s2327_s23  ;;  %v318_v43 = vrot.slane %v316_v38, 1  ;;  %v307_v47 = vshrl.u32 %v2017_v29, 16  ;;  %v311_v48 = vrot.slane %v309_v41, 1  ;;  %v328_v51 = vshrl.u32 %v2020_v34, 16  ;;  %v2564_v18 = vld [vmem:[%s2396_s21 + $0x60] sm:$0xf] }
  0x22   : > { %334 = vrot.lane.b32.xlu0 %v284_v39, %s2327_s23  ;;  %v323_v49 = vshll.u32 %v2019_v45, 16  ;;  %v332_v52 = vrot.slane %v330_v44, 1  ;;  %v321_v54 = vshrl.u32 %v2019_v45, 16  ;;  %v2469_v59 = vrot.slane %v2015_v8, 1  ;;  %v1978_v19 = vld [vmem:[%s2396_s21 + $0x64] sm:$0x1] }
  0x23   : > { %v2450_v50 = vor.u32 %v318_v43, %v314_v40  ;;  %v2453_v53 = vor.u32 %v311_v48, %v307_v47  ;;  %v2473_v60 = vrot.slane %v2018_v28, 1  ;;  %v2477_v61 = vrot.slane %v2017_v29, 1  ;;  %v1987_v21 = vld [vmem:[%s2396_s21 + $0x88] sm:$0xf]  ;;  %v1988_v22 = vld [vmem:[%s2396_s21 + $0x8c] sm:$0x1] }
  0x24   : > { %v325_v55 = vrot.slane %v323_v49, 1  ;;  %v2457_v56 = vor.u32 %v332_v52, %v328_v51  ;;  %v2481_v62 = vrot.slane %v2020_v34, 1  ;;  %v2485_v63 = vrot.slane %v2019_v45, 1  ;;  %v2578_v24 = vld [vmem:[%s2396_s21 + $0x80] sm:$0xf]  ;;  %s2338_s18 = smov 96  }
  0x25   : > { %340 = vrot.lane.b32.xlu1 %v2445_v42, %s2327_s23  ;;  %3847 = vst [vmem:[#allocation2_spill] sm:$0xff] %v2473_v60  ;;  %3848 = vst [vmem:[#allocation3_spill] sm:$0xff] %v2477_v61  ;;  %v2024_v4 = vcombine.low %v2425_v20, %v2425_v20  ;;  %v2023_v6 = vcombine.low %v2413_v9, %v2413_v9  ;;  %v2502_v5 = vcombine.low %v182_v35, %v182_v35  ;;  %v1986_v25 = vld [vmem:[%s2396_s21 + $0x84] sm:$0x1]  ;;  %v2587_v28 = vld [vmem:[%s2396_s21 + $0x48] sm:$0xf] }
  0x26   : > { %336 = vrot.lane.b32.xlu0 %v291_v46, %s2327_s23  ;;  %v2461_v57 = vor.u32 %v325_v55, %v321_v54  ;;  %v2025_v0 = vcombine.low %v2420_v14, %v2420_v14  ;;  %v2510_v8 = vcombine.low %v186_v7, %v186_v7  ;;  %v2027_v9 = vcombine.low %v2435_v30, %v2435_v30  ;;  %v1995_v31 = vld [vmem:[%s2396_s21 + $0xa8] sm:$0xf]  ;;  %v1993_v32 = vld [vmem:[%s2396_s21 + $0xa0] sm:$0xf]  ;;  %s2339_s6 = smov 104   ;;  %p159_p6 = scmp.lt.s32.totalorder %s2308_s9, 3 }
  0x27   : > { %v2516_v12 = vcombine.low %v186_v7, %v187_v10  ;;  %v2575_v23 = vcombine.low %v2564_v18, %v1978_v19  ;;  %v2581_v26 = vcombine.low %v1987_v21, %v1988_v22  ;;  %v2591_v30 = vcombine.low %v2578_v24, %v1986_v25  ;;  %v2003_v44 = vld [vmem:[%s2396_s21 + $0xc8] sm:$0xf]  ;;  %v2001_v45 = vld [vmem:[%s2396_s21 + $0xc0] sm:$0xf]  ;;  %v1996_v22 = vld [vmem:[%s2396_s21 + $0xac] sm:$0x1] }
  0x28   : > { %v2030_v34 = vcombine.low %v2587_v28, %v2587_v28  ;;  %v2053_v38 = vcombine.low %v1995_v31, %v1995_v31  ;;  %v2052_v43 = vcombine.low %v1993_v32, %v1993_v32  ;;  %v2057_v52 = vcombine.low %v2003_v44, %v2003_v44  ;;  %s4014_s9 = smov (!%p159_p6, %s2308_s9), 3 }
  0x29   : > { %344 = vrot.lane.b32.xlu1 %v2450_v50, %s2327_s23  ;;  %3849 = vst [vmem:[#allocation4_spill] sm:$0xff] %v2516_v12  ;;  %v406_v13 = vshll.u32 %v2516_v12, 16  ;;  %v404_v14 = vshrl.u32 %v2516_v12, 16  ;;  %v3818_v17 = vrot.slane %v2516_v12, 1  ;;  %v586_v29 = vshll.u32 %v2575_v23, 16 }
  0x2a   : > { %342 = vrot.lane.b32.xlu0 %v2453_v53, %s2327_s23  ;;  %v621_v33 = vshll.u32 %v2581_v26, 16  ;;  %v584_v39 = vshrl.u32 %v2575_v23, 16  ;;  %v614_v41 = vshll.u32 %v2591_v30, 16  ;;  %v612_v49 = vshrl.u32 %v2591_v30, 16 }
  0x2b   : > { %v408_v15 = vrot.slane %v406_v13, 1  ;;  %v588_v40 = vrot.slane %v586_v29, 1  ;;  %v1067_v51 = vshrl.u32 %v2053_v38, 16  ;;  %v1063_v10 = vshll.u32 %v2052_v43, 16 }
  0x2c   : > { %v623_v47 = vrot.slane %v621_v33, 1  ;;  %v616_v55 = vrot.slane %v614_v41, 1  ;;  %v2638_v33 = vcombine.low %v1995_v31, %v1996_v22 }
  0x2d   : > { %348 = vrot.lane.b32.xlu1 %v2457_v56, %s2327_s23  ;;  %v2532_v16 = vor.u32 %v408_v15, %v404_v14  ;;  %v2613_v54 = vor.u32 %v588_v40, %v584_v39  ;;  %v1098_v15 = vshll.u32 %v2057_v52, 16  ;;  %v1997_v40 = vld [vmem:[%s2396_s21 + $0xb0] sm:$0xf] }
  0x2e   : > { %346 = vrot.lane.b32.xlu0 %v2461_v57, %s2327_s23  ;;  %v2621_v7 = vor.u32 %v616_v55, %v612_v49  ;;  %v1179_v31 = vshrl.u32 %v2638_v33, 16  ;;  %v2005_v55 = vld [vmem:[%s2396_s21 + $0xd0] sm:$0xf] }
  0x2f   : > { %3851 = vst [vmem:[#allocation6_spill] sm:$0xff] %v2613_v54 }
  0x30   : > { %3853 = vst [vmem:[#allocation8_spill] sm:$0xff] %v2621_v7 }
  0x31   : > { %364 = vrot.lane.b32.xlu1 %v2465_v58, %s2326_s22 }
  0x32   : > { %362 = vrot.lane.b32.xlu0 %v2469_v59, %s2326_s22 }
  0x35   : > { %368 = vrot.lane.b32.xlu1 %v2473_v60, %s2326_s22 }
  0x36   : > { %366 = vrot.lane.b32.xlu0 %v2477_v61, %s2326_s22 }
  0x39   : > { %372 = vrot.lane.b32.xlu1 %v2481_v62, %s2326_s22 }
  0x3a   : > { %370 = vrot.lane.b32.xlu0 %v2485_v63, %s2326_s22 }
  0x3d   : > { %386 = vrot.lane.b32.xlu1 %v2022_v1, %s2328_s24 }
  0x3e   : > { %384 = vrot.lane.b32.xlu0 %v2021_v2, %s2328_s24  ;;  %v2056_v2 = vcombine.low %v2001_v45, %v2001_v45 }
  0x40   : > { %v1091_v21 = vshll.u32 %v2056_v2, 16 }
  0x41   : > { %390 = vrot.lane.b32.xlu1 %v2024_v4, %s2328_s24 }
  0x42   : > { %388 = vrot.lane.b32.xlu0 %v2023_v6, %s2328_s24 }
  0x45   : > { %394 = vrot.lane.b32.xlu1 %v2502_v5, %s2328_s24 }
  0x46   : > { %392 = vrot.lane.b32.xlu0 %v2025_v0, %s2328_s24 }
  0x49   : > { %398 = vrot.lane.b32.xlu1 %v2510_v8, %s2328_s24 }
  0x4a   : > { %396 = vrot.lane.b32.xlu0 %v2027_v9, %s2328_s24 }
  0x4d   : > { %412 = vrot.lane.b32.xlu1 %v2441_v37, %s2329_s25 }
  0x4e   : > { %410 = vrot.lane.b32.xlu0 %v291_v46, %s2329_s25  ;;  %v619_v46 = vshrl.u32 %v2581_v26, 16 }
  0x51   : > { %416 = vrot.lane.b32.xlu1 %v2453_v53, %s2329_s25 }
  0x52   : > { %414 = vrot.lane.b32.xlu0 %v2445_v42, %s2329_s25 }
  0x55   : > { %420 = vrot.lane.b32.xlu1 %v2461_v57, %s2329_s25 }
  0x56   : > { %418 = vrot.lane.b32.xlu0 %v2450_v50, %s2329_s25 }
  0x59   : > { %424 = vrot.lane.b32.xlu1 %v2532_v16, %s2329_s25 }
  0x5a   : > { %422 = vrot.lane.b32.xlu0 %v2457_v56, %s2329_s25 }
  0x5d   : > { %429 = vrot.lane.b32.xlu1 %v2469_v59, %s2330_s26 }
  0x5e   : > { %427 = vrot.lane.b32.xlu0 %v351_v11, %s2330_s26  ;;  %v1980_v11 = vld [vmem:[%s2396_s21 + $0x6c] sm:$0x1] }
  0x5f   : > { %v2569_v20 = vcombine.low %v2560_v3, %v1980_v11 }
  0x61   : > { %433 = vrot.lane.b32.xlu1 %v2477_v61, %s2330_s26  ;;  %v593_v27 = vshll.u32 %v2569_v20, 16  ;;  %v591_v35 = vshrl.u32 %v2569_v20, 16 }
  0x62   : > { %431 = vrot.lane.b32.xlu0 %v2465_v58, %s2330_s26 }
  0x63   : > { %v595_v36 = vrot.slane %v593_v27, 1  ;;  %v1994_v27 = vld [vmem:[%s2396_s21 + $0xa4] sm:$0x1] }
  0x65   : > { %437 = vrot.lane.b32.xlu1 %v2485_v63, %s2330_s26  ;;  %v2608_v48 = vor.u32 %v595_v36, %v591_v35  ;;  %v2060_v35 = vcombine.low %v1993_v32, %v1994_v27  ;;  %v2002_v36 = vld [vmem:[%s2396_s21 + $0xc4] sm:$0x1] }
  0x66   : > { %435 = vrot.lane.b32.xlu0 %v2473_v60, %s2330_s26 }
  0x67   : > { %3850 = vst [vmem:[#allocation5_spill] sm:$0xff] %v2608_v48  ;;  %v1174_v39 = vshll.u32 %v2060_v35, 16 }
  0x69   : > { %441 = vrot.lane.b32.xlu1 %v3818_v17, %s2330_s26 }
  0x6a   : > { %439 = vrot.lane.b32.xlu0 %v2481_v62, %s2330_s26 }
  0x6d   : > { %448 = vrot.lane.b32.xlu1 %v2023_v6, %s2331_s27  ;;  %v1069_v6 = vrot.slane %v1067_v51, 7  ;;  %v1172_v51 = vshrl.u32 %v2060_v35, 16 }
  0x6e   : > { %446 = vrot.lane.b32.xlu0 %v2022_v1, %s2331_s27  ;;  %v1060_v1 = vshrl.u32 %v2052_v43, 16  ;;  %v2650_v43 = vcombine.low %v2001_v45, %v2002_v36 }
  0x71   : > { %452 = vrot.lane.b32.xlu1 %v2025_v0, %s2331_s27  ;;  %v1095_v0 = vshrl.u32 %v2057_v52, 16  ;;  %v1176_v52 = vrot.slane %v1174_v39, 1 }
  0x72   : > { %450 = vrot.lane.b32.xlu0 %v2024_v4, %s2331_s27  ;;  %v2617_v4 = vor.u32 %v623_v47, %v619_v46  ;;  %v2054_v47 = vcombine.low %v1997_v40, %v1997_v40 }
  0x73   : > { %v1097_v14 = vrot.slane %v1095_v0, 7  ;;  %v2058_v0 = vcombine.low %v2005_v55, %v2005_v55 }
  0x74   : > { %3852 = vst [vmem:[#allocation7_spill] sm:$0xff] %v2617_v4 }
  0x75   : > { %456 = vrot.lane.b32.xlu1 %v2027_v9, %s2331_s27  ;;  %v1088_v9 = vshrl.u32 %v2056_v2, 16  ;;  %v2632_v25 = vor.u32 %v1098_v15, %v1097_v14  ;;  %v1102_v22 = vshrl.u32 %v2058_v0, 16  ;;  %v1105_v39 = vshll.u32 %v2058_v0, 16 }
  0x76   : > { %454 = vrot.lane.b32.xlu0 %v2502_v5, %s2331_s27  ;;  %v1070_v5 = vshll.u32 %v2053_v38, 16  ;;  %v1181_v38 = vshll.u32 %v2638_v33, 16 }
  0x77   : > { %v1090_v19 = vrot.slane %v1088_v9, 7 }
  0x78   : > { %v2625_v13 = vor.u32 %v1070_v5, %v1069_v6  ;;  %v1183_v32 = vrot.slane %v1181_v38, 1  ;;  %v1074_v5 = vshrl.u32 %v2054_v47, 16  ;;  %v1104_v38 = vrot.slane %v1102_v22, 7 }
  0x79   : > { %460 = vrot.lane.b32.xlu1 %v2030_v34, %s2331_s27  ;;  %v2636_v29 = vor.u32 %v1091_v21, %v1090_v19  ;;  %v2004_v34 = vld [vmem:[%s2396_s21 + $0xcc] sm:$0x1]  ;;  %v1077_v21 = vshll.u32 %v2054_v47, 16 }
  0x7a   : > { %458 = vrot.lane.b32.xlu0 %v2510_v8, %s2331_s27  ;;  %v1062_v8 = vrot.slane %v1060_v1, 7  ;;  %v2648_v41 = vcombine.low %v2003_v44, %v2004_v34  ;;  %v1202_v44 = vshll.u32 %v2650_v43, 16  ;;  %v2666_v2 = vor.u32 %v1183_v32, %v1179_v31 }
  0x7b   : > { %v1076_v19 = vrot.slane %v1074_v5, 7  ;;  %v2699_v47 = vor.u32 %v1105_v39, %v1104_v38  ;;  %v2716_v5 = vld [vmem:[%s2396_s21 + $0xb8] sm:$0xf] }
  0x7c   : > { %v1065_v11 = vor.u32 %v1063_v10, %v1062_v8  ;;  %v1209_v46 = vshll.u32 %v2648_v41, 16  ;;  %v1207_v1 = vshrl.u32 %v2648_v41, 16  ;;  %v1177_v8 = vor.u32 %v1176_v52, %v1172_v51 }
  0x7d   : > { %1021 = vrot.lane.b32.xlu1 %v2608_v48, %s2327_s23  ;;  %v1200_v10 = vshrl.u32 %v2650_v43, 16  ;;  %v1204_v9 = vrot.slane %v1202_v44, 1  ;;  %v2688_v36 = vor.u32 %v1077_v21, %v1076_v19  ;;  %v2055_v19 = vcombine.low %v2716_v5, %v2716_v5 }
  0x7e   : > { %1019 = vrot.lane.b32.xlu0 %v2613_v54, %s2327_s23  ;;  %v1211_v6 = vrot.slane %v1209_v46, 1  ;;  %v1998_v46 = vld [vmem:[%s2396_s21 + $0xb4] sm:$0x1] }
  0x7f   : > { %v2680_v27 = vor.u32 %v1204_v9, %v1200_v10  ;;  %v2703_v51 = vcombine.low %v1997_v40, %v1998_v46 }
  0x81   : > { %1029 = vrot.lane.b32.xlu1 %v2617_v4, %s2327_s23  ;;  %3859 = vst [vmem:[#allocation14_spill] sm:$0xff] %v2680_v27  ;;  %v1990_v4 = vld [vmem:[%s2396_s21 + $0x94] sm:$0x1] }
  0x82   : > { %1027 = vrot.lane.b32.xlu0 %v2621_v7, %s2327_s23 }
  0x85   : > { %1117 = vrot.lane.b32.xlu1 %v2625_v13, %s2326_s22 }
  0x86   : > { %1115 = vrot.lane.b32.xlu0 %v1065_v11, %s2326_s22  ;;  %v2677_v11 = vor.u32 %v1211_v6, %v1207_v1  ;;  %v2006_v1 = vld [vmem:[%s2396_s21 + $0xd4] sm:$0x1]  ;;  %v1188_v6 = vshll.u32 %v2703_v51, 16 }
  0x87   : > { %v2718_v0 = vcombine.low %v2005_v55, %v2006_v1  ;;  %v2733_v55 = vld [vmem:[%s2396_s21 + $0xd8] sm:$0xf]  ;;  %v1081_v1 = vshrl.u32 %v2055_v19, 16 }
  0x88   : > { %3858 = vst [vmem:[#allocation13_spill] sm:$0xff] %v2677_v11  ;;  %v1190_v10 = vrot.slane %v1188_v6, 1  ;;  %v2059_v6 = vcombine.low %v2733_v55, %v2733_v55 }
  0x89   : > { %1125 = vrot.lane.b32.xlu1 %v2632_v25, %s2326_s22  ;;  %v1216_v9 = vshll.u32 %v2718_v0, 16  ;;  %v1214_v38 = vshrl.u32 %v2718_v0, 16 }
  0x8a   : > { %1123 = vrot.lane.b32.xlu0 %v2636_v29, %s2326_s22 }
  0x8b   : > { %v1218_v46 = vrot.slane %v1216_v9, 1  ;;  %v1084_v9 = vshll.u32 %v2055_v19, 16  ;;  %v2769_v19 = vld [vmem:[%s2396_s21 + $0x78] sm:$0xf] }
  0x8d   : > { %1157 = vrot.lane.b32.xlu1 %v2638_v33, %s2328_s24 }
  0x8e   : > { %1155 = vrot.lane.b32.xlu0 %v2060_v35, %s2328_s24  ;;  %v2657_v49 = vpop.permute.xlu1 %360 }
  0x8f   : > { %3854 = vst [vmem:[#allocation9_spill] sm:$0xff] %v2657_v49  ;;  %v2661_v45 = vpop.permute.xlu0 %358 }
  0x90   : > { %3855 = vst [vmem:[#allocation10_spill] sm:$0xff] %v2661_v45 }
  0x91   : > { %1165 = vrot.lane.b32.xlu1 %v2648_v41, %s2328_s24 }
  0x92   : > { %1163 = vrot.lane.b32.xlu0 %v2650_v43, %s2328_s24 }
  0x93   : > { %v2671_v14 = vpop.permute.xlu1 %338 }
  0x94   : > { %3856 = vst [vmem:[#allocation11_spill] sm:$0xff] %v2671_v14  ;;  %v2673_v15 = vpop.permute.xlu0 %334 }
  0x95   : > { %3857 = vst [vmem:[#allocation12_spill] sm:$0xff] %v2673_v15  ;;  %1229 = vrot.lane.b32.xlu1 %v2666_v2, %s2329_s25 }
  0x96   : > { %1227 = vrot.lane.b32.xlu0 %v1177_v8, %s2329_s25  ;;  %v1186_v8 = vshrl.u32 %v2703_v51, 16 }
  0x97   : > { %v2682_v34 = vpop.permute.xlu1 %340 }
  0x98   : > { %3860 = vst [vmem:[#allocation15_spill] sm:$0xff] %v2682_v34  ;;  %v2684_v35 = vpop.permute.xlu0 %336  ;;  %v2742_v39 = vor.u32 %v1190_v10, %v1186_v8  ;;  %v2754_v8 = vor.u32 %v1218_v46, %v1214_v38  ;;  %v1083_v10 = vrot.slane %v1081_v1, 7  ;;  %v1112_v38 = vshll.u32 %v2059_v6, 16  ;;  %v2775_v1 = vld [vmem:[%s2396_s21 + $0x70] sm:$0xf] }
  0x99   : > { %3861 = vst [vmem:[#allocation16_spill] sm:$0xff] %v2684_v35  ;;  %1237 = vrot.lane.b32.xlu1 %v2677_v11, %s2329_s25 }
  0x9a   : > { %1235 = vrot.lane.b32.xlu0 %v2680_v27, %s2329_s25 }
  0x9b   : > { %v2692_v31 = vpop.permute.xlu1 %344 }
  0x9c   : > { %3862 = vst [vmem:[#allocation17_spill] sm:$0xff] %v2692_v31  ;;  %v2694_v32 = vpop.permute.xlu0 %342 }
  0x9d   : > { %3863 = vst [vmem:[#allocation18_spill] sm:$0xff] %v2694_v32  ;;  %1255 = vrot.lane.b32.xlu1 %v2688_v36, %s2330_s26 }
  0x9e   : > { %1253 = vrot.lane.b32.xlu0 %v2625_v13, %s2330_s26 }
  0x9f   : > { %v2705_v52 = vpop.permute.xlu1 %348 }
  0xa0   : > { %3864 = vst [vmem:[#allocation19_spill] sm:$0xff] %v2705_v52  ;;  %v2707_v44 = vpop.permute.xlu0 %346 }
  0xa1   : > { %3865 = vst [vmem:[#allocation20_spill] sm:$0xff] %v2707_v44  ;;  %1263 = vrot.lane.b32.xlu1 %v2699_v47, %s2330_s26  ;;  %v1109_v44 = vshrl.u32 %v2059_v6, 16 }
  0xa2   : > { %1261 = vrot.lane.b32.xlu0 %v2632_v25, %s2330_s26 }
  0xa3   : > { %v2720_v13 = vpop.permute.xlu1 %364 }
  0xa4   : > { %3866 = vst [vmem:[#allocation21_spill] sm:$0xff] %v2720_v13  ;;  %v2722_v40 = vpop.permute.xlu0 %362  ;;  %v1982_v13 = vld [vmem:[%s2396_s21 + $0x74] sm:$0x1] }
  0xa5   : > { %3867 = vst [vmem:[#allocation22_spill] sm:$0xff] %v2722_v40  ;;  %1274 = vrot.lane.b32.xlu1 %v2703_v51, %s2331_s27  ;;  %v1111_v40 = vrot.slane %v1109_v44, 7 }
  0xa6   : > { %1272 = vrot.lane.b32.xlu0 %v2638_v33, %s2331_s27 }
  0xa7   : > { %v2735_v21 = vpop.permute.xlu1 %368  ;;  %v2782_v44 = vor.u32 %v1112_v38, %v1111_v40 }
  0xa8   : > { %3868 = vst [vmem:[#allocation23_spill] sm:$0xff] %v2735_v21  ;;  %v2737_v22 = vpop.permute.xlu0 %366 }
  0xa9   : > { %3869 = vst [vmem:[#allocation24_spill] sm:$0xff] %v2737_v22  ;;  %1282 = vrot.lane.b32.xlu1 %v2718_v0, %s2331_s27 }
  0xaa   : > { %1280 = vrot.lane.b32.xlu0 %v2648_v41, %s2331_s27 }
  0xab   : > { %v2748_v33 = vpop.permute.xlu1 %372 }
  0xac   : > { %3870 = vst [vmem:[#allocation25_spill] sm:$0xff] %v2748_v33  ;;  %v2750_v17 = vpop.permute.xlu0 %370 }
  0xad   : > { %3871 = vst [vmem:[#allocation26_spill] sm:$0xff] %v2750_v17  ;;  %1297 = vrot.lane.b32.xlu1 %v2742_v39, %s2332_s28  ;;  %v2764_v17 = vor.u32 %v1084_v9, %v1083_v10  ;;  %v2790_v10 = vcombine.low %v2775_v1, %v1982_v13  ;;  %v1991_v9 = vld [vmem:[%s2396_s21 + $0x98] sm:$0xf] }
  0xae   : > { %1295 = vrot.lane.b32.xlu0 %v2666_v2, %s2332_s28  ;;  %v1984_v2 = vld [vmem:[%s2396_s21 + $0x7c] sm:$0x1] }
  0xaf   : > { %v2758_v52 = vpop.permute.xlu1 %386  ;;  %v2785_v6 = vcombine.low %v2769_v19, %v1984_v2  ;;  %3877 = vst [vmem:[#allocation32_spill] sm:$0xff] %v2790_v10  ;;  %v600_v13 = vshll.u32 %v2790_v10, 16 }
  0xb0   : > { %3872 = vst [vmem:[#allocation27_spill] sm:$0xff] %v2758_v52  ;;  %v2760_v33 = vpop.permute.xlu0 %384  ;;  %v2337_v52 = vmov 0  }
  0xb1   : > { %3873 = vst [vmem:[#allocation28_spill] sm:$0xff] %v2760_v33  ;;  %1305 = vrot.lane.b32.xlu1 %v2754_v8, %s2332_s28  ;;  %3876 = vst [vmem:[#allocation31_spill] sm:$0xff] %v2785_v6  ;;  %v607_v40 = vshll.u32 %v2785_v6, 16  ;;  %v602_v21 = vrot.slane %v600_v13, 1  ;;  %1747 = vmatprep.subr.bf16.mxu0 %v2337_v52 }
  0xb2   : > { %1303 = vrot.lane.b32.xlu0 %v2677_v11, %s2332_s28  ;;  %2117 = vmatprep.subr.bf16.mxu1 %v2337_v52 }
  0xb3   : > { %v2772_v46 = vpop.permute.xlu1 %390  ;;  %v609_v22 = vrot.slane %v607_v40, 1 }
  0xb4   : > { %3874 = vst [vmem:[#allocation29_spill] sm:$0xff] %v2772_v46  ;;  %v2778_v14 = vpop.permute.xlu0 %388  ;;  %v1992_v46 = vld [vmem:[%s2396_s21 + $0x9c] sm:$0x1] }
  0xb5   : > { %3875 = vst [vmem:[#allocation30_spill] sm:$0xff] %v2778_v14  ;;  %1323 = vrot.lane.b32.xlu1 %v2764_v17, %s2333_s29  ;;  %v1989_v14 = vld [vmem:[%s2396_s21 + $0x90] sm:$0xf]  ;;  %v2803_v38 = vcombine.low %v1991_v9, %v1992_v46  ;;  %v598_v9 = vshrl.u32 %v2790_v10, 16 }
  0xb6   : > { %1321 = vrot.lane.b32.xlu0 %v2688_v36, %s2333_s29  ;;  %v2808_v2 = vcombine.low %v1989_v14, %v1990_v4 }
  0xb7   : > { %v2794_v34 = vpop.permute.xlu1 %394  ;;  %3880 = vst [vmem:[#allocation35_spill] sm:$0xff] %v2803_v38  ;;  %v1015_v46 = vshll.u32 %v2803_v38, 16  ;;  %v1013_v40 = vshrl.u32 %v2803_v38, 16  ;;  %v2949_v38 = vcombine.low %v2769_v19, %v2769_v19 }
  0xb8   : > { %3878 = vst [vmem:[#allocation33_spill] sm:$0xff] %v2794_v34  ;;  %v2798_v48 = vpop.permute.xlu0 %392  ;;  %3881 = vst [vmem:[#allocation36_spill] sm:$0xff] %v2808_v2  ;;  %v690_v4 = vshll.u32 %v2808_v2, 16  ;;  %v688_v13 = vshrl.u32 %v2808_v2, 16 }
  0xb9   : > { %3879 = vst [vmem:[#allocation34_spill] sm:$0xff] %v2798_v48  ;;  %1331 = vrot.lane.b32.xlu1 %v2782_v44, %s2333_s29  ;;  %v605_v48 = vshrl.u32 %v2785_v6, 16  ;;  %3910 = vst [vmem:[#allocation65_spill] sm:$0xff] %v2949_v38 }
  0xba   : > { %1329 = vrot.lane.b32.xlu0 %v2699_v47, %s2333_s29  ;;  %v692_v32 = vrot.slane %v690_v4, 1 }
  0xbb   : > { %v2810_v11 = vpop.permute.xlu1 %398 }
  0xbc   : > { %3882 = vst [vmem:[#allocation37_spill] sm:$0xff] %v2810_v11  ;;  %v2812_v34 = vpop.permute.xlu0 %396  ;;  %v1017_v11 = vrot.slane %v1015_v46, 1 }
  0xbd   : > { %3883 = vst [vmem:[#allocation38_spill] sm:$0xff] %v2812_v34  ;;  %474 = vrot.lane.b32.xlu1 %v2445_v42, %s2332_s28  ;;  %v2828_v42 = vor.u32 %v609_v22, %v605_v48  ;;  %v2000_v48 = vld [vmem:[%s2396_s21 + $0xbc] sm:$0x1]  ;;  %v2845_v22 = vor.u32 %v692_v32, %v688_v13 }
  0xbe   : > { %472 = vrot.lane.b32.xlu0 %v2441_v37, %s2332_s28  ;;  %v2833_v37 = vor.u32 %v602_v21, %v598_v9  ;;  %v2852_v46 = vcombine.low %v2716_v5, %v2000_v48  ;;  %v2008_v9 = vld [vmem:[%s2396_s21 + $0xdc] sm:$0x1] }
  0xbf   : > { %v2822_v14 = vpop.permute.xlu1 %412  ;;  %3889 = vst [vmem:[#allocation44_spill] sm:$0xff] %v2845_v22  ;;  %v2863_v32 = vcombine.low %v2733_v55, %v2008_v9 }
  0xc0   : > { %3884 = vst [vmem:[#allocation39_spill] sm:$0xff] %v2822_v14  ;;  %v2824_v34 = vpop.permute.xlu0 %410  ;;  %3886 = vst [vmem:[#allocation41_spill] sm:$0xff] %v2833_v37  ;;  %v1195_v9 = vshll.u32 %v2852_v46, 16  ;;  %v3833_v14 = vrot.slane %v2790_v10, 1 }
  0xc1   : > { %3885 = vst [vmem:[#allocation40_spill] sm:$0xff] %v2824_v34  ;;  %482 = vrot.lane.b32.xlu1 %v2457_v56, %s2332_s28  ;;  %v1018_v56 = vor.u32 %v1017_v11, %v1013_v40 }
  0xc2   : > { %480 = vrot.lane.b32.xlu0 %v2461_v57, %s2332_s28 }
  0xc3   : > { %v2836_v31 = vpop.permute.xlu1 %416 }
  0xc4   : > { %3887 = vst [vmem:[#allocation42_spill] sm:$0xff] %v2836_v31  ;;  %v2838_v34 = vpop.permute.xlu0 %414 }
  0xc5   : > { %3888 = vst [vmem:[#allocation43_spill] sm:$0xff] %v2838_v34  ;;  %1025 = vrot.lane.b32.xlu1 %v2828_v42, %s2327_s23 }
  0xc6   : > { %1023 = vrot.lane.b32.xlu0 %v2833_v37, %s2327_s23 }
  0xc7   : > { %v2847_v57 = vpop.permute.xlu1 %420 }
  0xc8   : > { %3890 = vst [vmem:[#allocation45_spill] sm:$0xff] %v2847_v57  ;;  %v2849_v21 = vpop.permute.xlu0 %418 }
  0xc9   : > { %3891 = vst [vmem:[#allocation46_spill] sm:$0xff] %v2849_v21  ;;  %1033 = vrot.lane.b32.xlu1 %v1018_v56, %s2327_s23 }
  0xca   : > { %1031 = vrot.lane.b32.xlu0 %v2845_v22, %s2327_s23  ;;  %s2340_s23 = smov 112  }
  0xcb   : > { %v2858_v11 = vpop.permute.xlu1 %424 }
  0xcc   : > { %3892 = vst [vmem:[#allocation47_spill] sm:$0xff] %v2858_v11  ;;  %v2860_v4 = vpop.permute.xlu0 %422 }
  0xcd   : > { %3893 = vst [vmem:[#allocation48_spill] sm:$0xff] %v2860_v4  ;;  %1342 = vrot.lane.b32.xlu1 %v2852_v46, %s2334_s30 }
  0xce   : > { %1340 = vrot.lane.b32.xlu0 %v2703_v51, %s2334_s30 }
  0xcf   : > { %v2869_v5 = vpop.permute.xlu1 %429 }
  0xd0   : > { %3894 = vst [vmem:[#allocation49_spill] sm:$0xff] %v2869_v5  ;;  %v2871_v40 = vpop.permute.xlu0 %427  ;;  %v3834_v5 = vrot.slane %v2785_v6, 1 }
  0xd1   : > { %3895 = vst [vmem:[#allocation50_spill] sm:$0xff] %v2871_v40  ;;  %1350 = vrot.lane.b32.xlu1 %v2863_v32, %s2334_s30 }
  0xd2   : > { %1348 = vrot.lane.b32.xlu0 %v2718_v0, %s2334_s30 }
  0xd3   : > { %v2877_v13 = vpop.permute.xlu1 %433 }
  0xd4   : > { %3896 = vst [vmem:[#allocation51_spill] sm:$0xff] %v2877_v13  ;;  %v2879_v55 = vpop.permute.xlu0 %431 }
  0xd5   : > { %3897 = vst [vmem:[#allocation52_spill] sm:$0xff] %v2879_v55  ;;  %491 = vrot.lane.b32.xlu1 %v2465_v58, %s2333_s29  ;;  %v1193_v58 = vshrl.u32 %v2852_v46, 16  ;;  %v1223_v55 = vshll.u32 %v2863_v32, 16 }
  0xd6   : > { %489 = vrot.lane.b32.xlu0 %v2469_v59, %s2333_s29  ;;  %v1197_v59 = vrot.slane %v1195_v9, 1 }
  0xd7   : > { %v2885_v56 = vpop.permute.xlu1 %437  ;;  %v1225_v9 = vrot.slane %v1223_v55, 1  ;;  %v1973_v55 = vld [vmem:[%s2396_s21 + $0x50] sm:$0xf] }
  0xd8   : > { %3898 = vst [vmem:[#allocation53_spill] sm:$0xff] %v2885_v56  ;;  %v2887_v48 = vpop.permute.xlu0 %435 }
  0xd9   : > { %3899 = vst [vmem:[#allocation54_spill] sm:$0xff] %v2887_v48  ;;  %499 = vrot.lane.b32.xlu1 %v2481_v62, %s2333_s29 }
  0xda   : > { %497 = vrot.lane.b32.xlu0 %v2485_v63, %s2333_s29 }
  0xdb   : > { %v2894_v4 = vpop.permute.xlu1 %441 }
  0xdc   : > { %3900 = vst [vmem:[#allocation55_spill] sm:$0xff] %v2894_v4  ;;  %v2896_v11 = vpop.permute.xlu0 %439  ;;  %v1221_v4 = vshrl.u32 %v2863_v32, 16 }
  0xdd   : > { %3901 = vst [vmem:[#allocation56_spill] sm:$0xff] %v2896_v11  ;;  %1121 = vrot.lane.b32.xlu1 %v2764_v17, %s2326_s22  ;;  %v2910_v11 = vor.u32 %v1197_v59, %v1193_v58  ;;  %v1975_v58 = vld [vmem:[%s2396_s21 + $0x58] sm:$0xf] }
  0xde   : > { %1119 = vrot.lane.b32.xlu0 %v2688_v36, %s2326_s22  ;;  %v2921_v34 = vor.u32 %v1225_v9, %v1221_v4  ;;  %v2032_v4 = vcombine.low %v1973_v55, %v1973_v55 }
  0xdf   : > { %v2904_v62 = vpop.permute.xlu1 %448 }
  0xe0   : > { %3902 = vst [vmem:[#allocation57_spill] sm:$0xff] %v2904_v62  ;;  %v2906_v63 = vpop.permute.xlu0 %446 }
  0xe1   : > { %3903 = vst [vmem:[#allocation58_spill] sm:$0xff] %v2906_v63  ;;  %1129 = vrot.lane.b32.xlu1 %v2782_v44, %s2326_s22 }
  0xe2   : > { %1127 = vrot.lane.b32.xlu0 %v2699_v47, %s2326_s22  ;;  %v2933_v47 = vcombine.low %v1975_v58, %v1975_v58 }
  0xe3   : > { %v2915_v13 = vpop.permute.xlu1 %452 }
  0xe4   : > { %3904 = vst [vmem:[#allocation59_spill] sm:$0xff] %v2915_v13  ;;  %v2917_v36 = vpop.permute.xlu0 %450  ;;  %v1974_v13 = vld [vmem:[%s2396_s21 + $0x54] sm:$0x1] }
  0xe5   : > { %3905 = vst [vmem:[#allocation60_spill] sm:$0xff] %v2917_v36  ;;  %1365 = vrot.lane.b32.xlu1 %v2910_v11, %s2335_s3  ;;  %v1976_v36 = vld [vmem:[%s2396_s21 + $0x5c] sm:$0x1] }
  0xe6   : > { %1363 = vrot.lane.b32.xlu0 %v2742_v39, %s2335_s3  ;;  %v2943_v2 = vcombine.low %v1975_v58, %v1976_v36 }
  0xe7   : > { %v2926_v59 = vpop.permute.xlu1 %456 }
  0xe8   : > { %3906 = vst [vmem:[#allocation61_spill] sm:$0xff] %v2926_v59  ;;  %v2929_v31 = vpop.permute.xlu0 %454  ;;  %v2954_v59 = vcombine.low %v2775_v1, %v2775_v1  ;;  %v579_v36 = vshll.u32 %v2943_v2, 16  ;;  %v577_v1 = vshrl.u32 %v2943_v2, 16 }
  0xe9   : > { %3907 = vst [vmem:[#allocation62_spill] sm:$0xff] %v2929_v31  ;;  %1373 = vrot.lane.b32.xlu1 %v2921_v34, %s2335_s3  ;;  %v2040_v31 = vcombine.low %v1973_v55, %v1974_v13 }
  0xea   : > { %1371 = vrot.lane.b32.xlu0 %v2754_v8, %s2335_s3  ;;  %3911 = vst [vmem:[#allocation66_spill] sm:$0xff] %v2954_v59  ;;  %v581_v55 = vrot.slane %v579_v36, 1 }
  0xeb   : > { %v2938_v9 = vpop.permute.xlu1 %460  ;;  %v572_v19 = vshll.u32 %v2040_v31, 16  ;;  %v641_v62 = vrot.slane %v2040_v31, 1 }
  0xec   : > { %3908 = vst [vmem:[#allocation63_spill] sm:$0xff] %v2938_v9  ;;  %v2941_v22 = vpop.permute.xlu0 %458 }
  0xed   : > { %3909 = vst [vmem:[#allocation64_spill] sm:$0xff] %v2941_v22  ;;  %531 = vrot.lane.b32.xlu1 %v2933_v47, %s2334_s30  ;;  %v574_v22 = vrot.slane %v572_v19, 1 }
  0xee   : > { %529 = vrot.lane.b32.xlu0 %v2032_v4, %s2334_s30  ;;  %v570_v4 = vshrl.u32 %v2040_v31, 16 }
  0xef   : > { %v2956_v9 = vpop.permute.xlu1 %1021 }
  0xf0   : > { %v2958_v48 = vpop.permute.xlu0 %1019  ;;  %v575_v57 = vor.u32 %v574_v22, %v570_v4  ;;  %v3832_v4 = vrot.slane %v2943_v2, 1 }
  0xf1   : > { %539 = vrot.lane.b32.xlu1 %v2949_v38, %s2334_s30 }
  0xf2   : > { %537 = vrot.lane.b32.xlu0 %v2954_v59, %s2334_s30  ;;  %v2980_v59 = vor.u32 %v581_v55, %v577_v1 }
  0xf3   : > { %v2965_v13 = vpop.permute.xlu1 %1029 }
  0xf4   : > { %v2967_v58 = vpop.permute.xlu0 %1027 }
  0xf5   : > { %1161 = vrot.lane.b32.xlu1 %v2852_v46, %s2328_s24 }
  0xf6   : > { %1159 = vrot.lane.b32.xlu0 %v2703_v51, %s2328_s24 }
  0xf7   : > { %v2974_v56 = vpop.permute.xlu1 %1117 }
  0xf8   : > { %v2976_v21 = vpop.permute.xlu0 %1115 }
  0xf9   : > { %1169 = vrot.lane.b32.xlu1 %v2863_v32, %s2328_s24 }
  0xfa   : > { %1167 = vrot.lane.b32.xlu0 %v2718_v0, %s2328_s24 }
  0xfb   : > { %v2984_v36 = vpop.permute.xlu1 %1125 }
  0xfc   : > { %v2986_v63 = vpop.permute.xlu0 %1123 }
  0xfd   : > { %627 = vrot.lane.b32.xlu1 %v2980_v59, %s2335_s3 }
  0xfe   : > { %625 = vrot.lane.b32.xlu0 %v575_v57, %s2335_s3  ;;  %v3008_v57 = vld [vmem:[%s2396_s21 + $0xe0] sm:$0xf] }
  0xff   : > { %v2991_v51 = vpop.permute.xlu1 %1157 }
 0x100   : > { %v2993_v19 = vpop.permute.xlu0 %1155 }
 0x101   : > { %635 = vrot.lane.b32.xlu1 %v2828_v42, %s2335_s3 }
 0x102   : > { %633 = vrot.lane.b32.xlu0 %v2833_v37, %s2335_s3  ;;  %v2068_v37 = vcombine.low %v3008_v57, %v3008_v57 }
 0x103   : > { %v2999_v0 = vpop.permute.xlu1 %1165 }
 0x104   : > { %v3001_v22 = vpop.permute.xlu0 %1163  ;;  %v1247_v12 = vshrl.u32 %v2068_v37, 16  ;;  %v1250_v45 = vshll.u32 %v2068_v37, 16 }
 0x105   : > { %1233 = vrot.lane.b32.xlu1 %v2910_v11, %s2329_s25 }
 0x106   : > { %1231 = vrot.lane.b32.xlu0 %v2742_v39, %s2329_s25  ;;  %v1249_v31 = vrot.slane %v1247_v12, 7 }
 0x107   : > { %v3010_v1 = vpop.permute.xlu1 %1229 }
 0x108   : > { %v3012_v55 = vpop.permute.xlu0 %1227  ;;  %v3052_v12 = vor.u32 %v1250_v45, %v1249_v31  ;;  %v3069_v45 = vcombine.low %v2564_v18, %v2564_v18  ;;  %v2262_v31 = vld [vmem:[%s3816_s1 + $0x10] sm:$0xff]   ;;  %v3086_v18 = vcombine.low %v2578_v24, %v2578_v24  ;;  %v2010_v24 = vld [vmem:[%s2396_s21 + $0xe4] sm:$0x1] }
 0x109   : > { %1241 = vrot.lane.b32.xlu1 %v2921_v34, %s2329_s25  ;;  %v3116_v15 = vcombine.low %v3008_v57, %v2010_v24  ;;  %v2267_v57 = vld [vmem:[%s3816_s1 + $0x30] sm:$0xff]  }
 0x10a   : > { %1239 = vrot.lane.b32.xlu0 %v2754_v8, %s2329_s25 }
 0x10b   : > { %v3021_v40 = vpop.permute.xlu1 %1237 }
 0x10c   : > { %v3023_v39 = vpop.permute.xlu0 %1235 }
 0x10d   : > { %651 = vrot.lane.b32.xlu1 %v3832_v4, %s2336_s4 }
 0x10e   : > { %649 = vrot.lane.b32.xlu0 %v641_v62, %s2336_s4  ;;  %v2260_v62 = vld [vmem:[%s3816_s1] sm:$0xff]  }
 0x10f   : > { %v3031_v33 = vpop.permute.xlu1 %1255  ;;  %1748 = vmatpush1.bf16.msra.mxu0 %v2260_v62  ;;  %2131 = vmatpush1.bf16.msra.mxu1 %v2260_v62 }
 0x110   : > { %v3033_v8 = vpop.permute.xlu0 %1253  ;;  %1749 = vmatprep.subr.bf16.mxu0 %v2337_v52  ;;  %2118 = vmatprep.subr.bf16.mxu1 %v2337_v52 }
 0x111   : > { %659 = vrot.lane.b32.xlu1 %v3834_v5, %s2336_s4 }
 0x112   : > { %657 = vrot.lane.b32.xlu0 %v3833_v14, %s2336_s4  ;;  %v2261_v14 = vld [vmem:[%s3816_s1 + $0x8] sm:$0xff]  }
 0x113   : > { %v3041_v4 = vpop.permute.xlu1 %1263  ;;  %1750 = vmatpush1.bf16.msra.mxu0 %v2261_v14  ;;  %2132 = vmatpush1.bf16.msra.mxu1 %v2261_v14  ;;  %v2263_v14 = vld [vmem:[%s3816_s1 + $0x18] sm:$0xff]  }
 0x114   : > { %v3048_v49 = vpop.permute.xlu0 %1261  ;;  %1751 = vmatprep.subr.bf16.mxu0 %v2337_v52  ;;  %2119 = vmatprep.subr.bf16.mxu1 %v2337_v52 }
 0x115   : > { %1259 = vrot.lane.b32.xlu1 %v2636_v29, %s2330_s26 }
 0x116   : > { %1257 = vrot.lane.b32.xlu0 %v2764_v17, %s2330_s26 }
 0x117   : > { %v3057_v37 = vpop.permute.xlu1 %1274  ;;  %1752 = vmatpush1.bf16.msra.mxu0 %v2262_v31  ;;  %2133 = vmatpush1.bf16.msra.mxu1 %v2262_v31  ;;  %v2264_v31 = vld [vmem:[%s3816_s1 + $0x20] sm:$0xff]  }
 0x118   : > { %v3062_v5 = vpop.permute.xlu0 %1272  ;;  %1753 = vmatprep.subr.bf16.mxu0 %v2337_v52  ;;  %2120 = vmatprep.subr.bf16.mxu1 %v2337_v52 }
 0x119   : > { %1267 = vrot.lane.b32.xlu1 %v3052_v12, %s2330_s26 }
 0x11a   : > { %1265 = vrot.lane.b32.xlu0 %v2782_v44, %s2330_s26 }
 0x11b   : > { %v3074_v17 = vpop.permute.xlu1 %1282  ;;  %1754 = vmatpush1.bf16.msra.mxu0 %v2263_v14  ;;  %2134 = vmatpush1.bf16.msra.mxu1 %v2263_v14 }
 0x11c   : > { %v3079_v62 = vpop.permute.xlu0 %1280  ;;  %1755 = vmatprep.subr.bf16.mxu0 %v2337_v52  ;;  %2121 = vmatprep.subr.bf16.mxu1 %v2337_v52 }
 0x11d   : > { %670 = vrot.lane.b32.xlu1 %v3069_v45, %s2338_s18 }
 0x11e   : > { %668 = vrot.lane.b32.xlu0 %v2933_v47, %s2338_s18 }
 0x11f   : > { %v3091_v44 = vpop.permute.xlu1 %1297  ;;  %1756 = vmatpush1.bf16.msra.mxu0 %v2264_v31  ;;  %2135 = vmatpush1.bf16.msra.mxu1 %v2264_v31  ;;  %v1291_v31 = vshll.u32 %v3116_v15, 16 }
 0x120   : > { %v3096_v10 = vpop.permute.xlu0 %1295  ;;  %1757 = vmatprep.subr.bf16.mxu0 %v2337_v52  ;;  %2122 = vmatprep.subr.bf16.mxu1 %v2337_v52 }
 0x121   : > { %678 = vrot.lane.b32.xlu1 %v3086_v18, %s2338_s18 }
 0x122   : > { %676 = vrot.lane.b32.xlu0 %v2949_v38, %s2338_s18  ;;  %v2265_v38 = vld [vmem:[%s3816_s1 + $0x28] sm:$0xff]  }
 0x123   : > { %v3105_v47 = vpop.permute.xlu1 %1305  ;;  %1758 = vmatpush1.bf16.msra.mxu0 %v2265_v38  ;;  %2136 = vmatpush1.bf16.msra.mxu1 %v2265_v38 }
 0x124   : > { %v3110_v61 = vpop.permute.xlu0 %1303  ;;  %1759 = vmatprep.subr.bf16.mxu0 %v2337_v52  ;;  %2123 = vmatprep.subr.bf16.mxu1 %v2337_v52 }
 0x125   : > { %1278 = vrot.lane.b32.xlu1 %v2650_v43, %s2331_s27 }
 0x126   : > { %1276 = vrot.lane.b32.xlu0 %v2852_v46, %s2331_s27 }
 0x127   : > { %v3121_v14 = vpop.permute.xlu1 %1323  ;;  %1760 = vmatpush1.bf16.msra.mxu0 %v2267_v57  ;;  %2137 = vmatpush1.bf16.msra.mxu1 %v2267_v57 }
 0x128   : > { %v3126_v60 = vpop.permute.xlu0 %1321  ;;  %1761 = vmatprep.subr.bf16.mxu0 %v2337_v52  ;;  %2124 = vmatprep.subr.bf16.mxu1 %v2337_v52 }
 0x129   : > { %1286 = vrot.lane.b32.xlu1 %v3116_v15, %s2331_s27 }
 0x12a   : > { %1284 = vrot.lane.b32.xlu0 %v2863_v32, %s2331_s27  ;;  %v2268_v32 = vld [vmem:[%s3816_s1 + $0x38] sm:$0xff]  }
 0x12b   : > { %v3134_v46 = vpop.permute.xlu1 %1331  ;;  %1762 = vmatpush1.bf16.msra.mxu0 %v2268_v32  ;;  %2138 = vmatpush1.bf16.msra.mxu1 %v2268_v32 }
 0x12c   : > { %v3139_v24 = vpop.permute.xlu0 %1329  ;;  %1763 = vmatprep.subr.bf16.mxu0 %v2337_v52  ;;  %2125 = vmatprep.subr.bf16.mxu1 %v2337_v52 }
 0x12d   : > { %696 = vrot.lane.b32.xlu1 %v2613_v54, %s2339_s6  ;;  %v1289_v54 = vshrl.u32 %v3116_v15, 16 }
 0x12e   : > { %694 = vrot.lane.b32.xlu0 %v2980_v59, %s2339_s6  ;;  %v1293_v59 = vrot.slane %v1291_v31, 1 }
 0x12f   : > { %v3148_v38 = vpop.permute.xlu1 %474 }
 0x130   : > { %3912 = vst [vmem:[#allocation67_spill] sm:$0xff] %v3148_v38  ;;  %v3153_v35 = vpop.permute.xlu0 %472  ;;  %v3172_v31 = vor.u32 %v1293_v59, %v1289_v54  ;;  %v3843_v54 = vrot.slane %v2575_v23, 1  ;;  %v2271_v59 = vld [vmem:[%s3816_s1 + $0x50] sm:$0xff]  }
 0x131   : > { %3913 = vst [vmem:[#allocation68_spill] sm:$0xff] %v3153_v35  ;;  %704 = vrot.lane.b32.xlu1 %v2621_v7, %s2339_s6  ;;  %v2269_v35 = vld [vmem:[%s3816_s1 + $0x40] sm:$0xff]   ;;  %v2270_v7 = vld [vmem:[%s3816_s1 + $0x48] sm:$0xff]  }
 0x132   : > { %702 = vrot.lane.b32.xlu0 %v2828_v42, %s2339_s6  ;;  %3916 = vst [vmem:[#allocation71_spill] sm:$0xff] %v3172_v31  ;;  %1764 = vmatpush1.bf16.msra.mxu0 %v2269_v35  ;;  %v3177_v42 = vld [vmem:[%s2396_s21 + $0xe8] sm:$0xf] }
 0x133   : > { %v3162_v57 = vpop.permute.xlu1 %482  ;;  %1765 = vmatprep.subr.bf16.mxu0 %v2337_v52  ;;  %2139 = vmatpush1.bf16.msra.mxu1 %v2269_v35 }
 0x134   : > { %3914 = vst [vmem:[#allocation69_spill] sm:$0xff] %v3162_v57  ;;  %v3167_v38 = vpop.permute.xlu0 %480  ;;  %2126 = vmatprep.subr.bf16.mxu1 %v2337_v52 }
 0x135   : > { %3915 = vst [vmem:[#allocation70_spill] sm:$0xff] %v3167_v38  ;;  %1301 = vrot.lane.b32.xlu1 %v2680_v27, %s2332_s28 }
 0x136   : > { %1299 = vrot.lane.b32.xlu0 %v2910_v11, %s2332_s28  ;;  %v2070_v11 = vcombine.low %v3177_v42, %v3177_v42  ;;  %1766 = vmatpush1.bf16.msra.mxu0 %v2270_v7 }
 0x137   : > { %v3180_v32 = vpop.permute.xlu1 %1025  ;;  %1767 = vmatprep.subr.bf16.mxu0 %v2337_v52  ;;  %2140 = vmatpush1.bf16.msra.mxu1 %v2270_v7  ;;  %v3921_v7 = vrot.slane %v2943_v2, 1 }
 0x138   : > { %3917 = vst [vmem:[#allocation72_spill] sm:$0xff] %v3180_v32  ;;  %v3185_v38 = vpop.permute.xlu0 %1023  ;;  %2127 = vmatprep.subr.bf16.mxu1 %v2337_v52  ;;  %v1315_v32 = vshrl.u32 %v2070_v11, 16 }
 0x139   : > { %3918 = vst [vmem:[#allocation73_spill] sm:$0xff] %v3185_v38  ;;  %1309 = vrot.lane.b32.xlu1 %v3172_v31, %s2332_s28  ;;  %v189_v31 = vld [vmem:[%s2396_s21 + $0x4c] sm:$0x1] }
 0x13a   : > { %1307 = vrot.lane.b32.xlu0 %v2921_v34, %s2332_s28  ;;  %v3845_v34 = vrot.slane %v2591_v30, 1  ;;  %1768 = vmatpush1.bf16.msra.mxu0 %v2271_v59  ;;  %v1317_v2 = vrot.slane %v1315_v32, 7 }
 0x13b   : > { %v3196_v35 = vpop.permute.xlu1 %1033  ;;  %1769 = vmatprep.subr.bf16.mxu0 %v2337_v52  ;;  %2141 = vmatpush1.bf16.msra.mxu1 %v2271_v59  ;;  %v3922_v59 = vrot.slane %v2785_v6, 1 }
 0x13c   : > { %3919 = vst [vmem:[#allocation74_spill] sm:$0xff] %v3196_v35  ;;  %v3201_v38 = vpop.permute.xlu0 %1031  ;;  %2128 = vmatprep.subr.bf16.mxu1 %v2337_v52 }
 0x13d   : > { %3920 = vst [vmem:[#allocation75_spill] sm:$0xff] %v3201_v38  ;;  %713 = vrot.lane.b32.xlu1 %v3843_v54, %s2340_s23  ;;  %v2272_v38 = vld [vmem:[%s3816_s1 + $0x58] sm:$0xff]   ;;  %v3222_v54 = vcombine.low %v2587_v28, %v189_v31  ;;  %v2273_v28 = vld [vmem:[%s3816_s1 + $0x60] sm:$0xff]  }
 0x13e   : > { %711 = vrot.lane.b32.xlu0 %v3921_v7, %s2340_s23  ;;  %v1318_v7 = vshll.u32 %v2070_v11, 16  ;;  %1770 = vmatpush1.bf16.msra.mxu0 %v2272_v38 }
 0x13f   : > { %v3213_v35 = vpop.permute.xlu1 %1342  ;;  %1771 = vmatprep.subr.bf16.mxu0 %v2337_v52  ;;  %2142 = vmatpush1.bf16.msra.mxu1 %v2272_v38  ;;  %v468_v11 = vshll.u32 %v3222_v54, 16  ;;  %v2274_v38 = vld [vmem:[%s3816_s1 + $0x68] ss:$0 sps:$4 sm:$0xff]  }
 0x140   : > { %v3218_v57 = vpop.permute.xlu0 %1340  ;;  %2129 = vmatprep.subr.bf16.mxu1 %v2337_v52  ;;  %v1320_v32 = vor.u32 %v1318_v7, %v1317_v2  ;;  %v466_v2 = vshrl.u32 %v3222_v54, 16 }
 0x141   : > { %721 = vrot.lane.b32.xlu1 %v3845_v34, %s2340_s23 }
 0x142   : > { %719 = vrot.lane.b32.xlu0 %v3922_v59, %s2340_s23  ;;  %1772 = vmatpush1.bf16.msra.mxu0 %v2273_v28 }
 0x143   : > { %v3231_v27 = vpop.permute.xlu1 %1350  ;;  %1773 = vmatprep.subr.bf16.mxu0 %v2337_v52  ;;  %2143 = vmatpush1.bf16.msra.mxu1 %v2273_v28 }
 0x144   : > { %v3236_v31 = vpop.permute.xlu0 %1348  ;;  %2130 = vmatprep.subr.bf16.mxu1 %v2337_v52  ;;  %v1382_v52 = vsel %vm746_vm1, %v2569_v20, %v2956_v9 }
 0x145   : > { %1327 = vrot.lane.b32.xlu1 %v2632_v25, %s2333_s29  ;;  %v1745_v25 = vsel %vm1743_vm0, %v2274_v38, 0  ;;  %v3284_v38 = vcombine.low %v2560_v3, %v2560_v3  ;;  %vm1860_vm0 = vcmask 93184  }
 0x146   : > { %1325 = vrot.lane.b32.xlu0 %v2636_v29, %s2333_s29  ;;  %v470_v29 = vrot.slane %v468_v11, 1  ;;  %1774 = vmatpush1.bf16.msra.mxu0 %v1745_v25 }
 0x147   : > { %v3248_v59 = vpop.permute.xlu1 %491  ;;  %2144 = vmatpush1.bf16.msra.mxu1 %v1745_v25 }
 0x148   : > { %v3250_v34 = vpop.permute.xlu0 %489  ;;  %v471_v28 = vor.u32 %v470_v29, %v466_v2 }
 0x149   : > { %1335 = vrot.lane.b32.xlu1 %v1320_v32, %s2333_s29  ;;  %v1398_v32 = vsel %vm771_vm2, %v1382_v52, %v2974_v56 }
 0x14a   : > { %1333 = vrot.lane.b32.xlu0 %v3052_v12, %s2333_s29  ;;  %v1414_v9 = vsel %vm788_vm3, %v1398_v32, %v2991_v51 }
 0x14b   : > { %v3257_v7 = vpop.permute.xlu1 %499 }
 0x14c   : > { %v3259_v6 = vpop.permute.xlu0 %497 }
 0x14d   : > { %478 = vrot.lane.b32.xlu1 %v2450_v50, %s2332_s28  ;;  %v1380_v50 = vsel %vm746_vm1, %v2575_v23, %v2958_v48  ;;  %v1430_v48 = vsel %vm805_vm4, %v1414_v9, %v3010_v1 }
 0x14e   : > { %476 = vrot.lane.b32.xlu0 %v2453_v53, %s2332_s28  ;;  %v1396_v11 = vsel %vm771_vm2, %v1380_v50, %v2976_v21  ;;  %v1390_v21 = vsel %vm746_vm1, %v2581_v26, %v2965_v13  ;;  %v1446_v3 = vsel %vm822_vm5, %v1430_v48, %v3031_v33 }
 0x14f   : > { %v3268_v12 = vpop.permute.xlu1 %1121  ;;  %v1412_v56 = vsel %vm788_vm3, %v1396_v11, %v2993_v19  ;;  %v2275_v19 = vld [vmem:[%s2396_s21 + $0x88] sm:$0xf]  ;;  %v1406_v1 = vsel %vm771_vm2, %v1390_v21, %v2984_v36 }
 0x150   : > { %v3275_v53 = vpop.permute.xlu0 %1119  ;;  %v1428_v51 = vsel %vm805_vm4, %v1412_v56, %v3012_v55  ;;  %v3302_v2 = vcombine.low %v2275_v19, %v2275_v19  ;;  %v1462_v55 = vsel %vm839_vm6, %v1446_v3, %v3057_v37 }
 0x151   : > { %486 = vrot.lane.b32.xlu1 %v471_v28, %s2332_s28  ;;  %v1444_v13 = vsel %vm822_vm5, %v1428_v51, %v3033_v8  ;;  %v1422_v28 = vsel %vm788_vm3, %v1406_v1, %v2999_v0  ;;  %v1478_v36 = vsel %vm856_vm7, %v1462_v55, %v3091_v44 }
 0x152   : > { %484 = vrot.lane.b32.xlu0 %v2532_v16, %s2332_s28  ;;  %v1388_v16 = vsel %vm746_vm1, %v2591_v30, %v2967_v58  ;;  %v1460_v58 = vsel %vm839_vm6, %v1444_v13, %v3062_v5  ;;  %s2341_s28 = smov 120   ;;  %v1438_v37 = vsel %vm805_vm4, %v1422_v28, %v3021_v40  ;;  %v1494_v0 = vsel %vm873_vm8, %v1478_v36, %v3121_v14 }
 0x153   : > { %v3299_v25 = vpop.permute.xlu1 %1129  ;;  %v1404_v33 = vsel %vm771_vm2, %v1388_v16, %v2986_v63  ;;  %v1476_v63 = vsel %vm856_vm7, %v1460_v58, %v3096_v10  ;;  %v1454_v44 = vsel %vm822_vm5, %v1438_v37, %v3041_v4  ;;  %v1510_v40 = vsel %vm890_vm9, %v1494_v0, %v3213_v35 }
 0x154   : > { %v3313_v29 = vpop.permute.xlu0 %1127  ;;  %v1420_v8 = vsel %vm788_vm3, %v1404_v33, %v3001_v22  ;;  %v1492_v22 = vsel %vm873_vm8, %v1476_v63, %v3126_v60  ;;  %v1470_v52 = vsel %vm839_vm6, %v1454_v44, %v3074_v17  ;;  %v3923_v44 = vld [vmem:[#allocation16_spill] sm:$0xff] }
 0x155   : > { %732 = vrot.lane.b32.xlu1 %v3284_v38, %s2341_s28  ;;  %v1436_v5 = vsel %vm805_vm4, %v1420_v8, %v3023_v39  ;;  %v1508_v39 = vsel %vm890_vm9, %v1492_v22, %v3218_v57  ;;  %v1486_v35 = vsel %vm856_vm7, %v1470_v52, %v3105_v47  ;;  %v3925_v52 = vld [vmem:[#allocation12_spill] sm:$0xff] }
 0x156   : > { %730 = vrot.lane.b32.xlu0 %v3069_v45, %s2341_s28  ;;  %v1452_v14 = vsel %vm822_vm5, %v1436_v5, %v3048_v49  ;;  %v1502_v17 = vsel %vm873_vm8, %v1486_v35, %v3134_v46  ;;  %v2276_v5 = vld [vmem:[%s2396_s21 + $0x8] sm:$0xf] }
 0x157   : > { %v1366_v10 = vpop.permute.xlu1 %1365  ;;  %v1468_v60 = vsel %vm839_vm6, %v1452_v14, %v3079_v62  ;;  %v2012_v62 = vld [vmem:[%s2396_s21 + $0xec] sm:$0x1]  ;;  %v1518_v9 = vsel %vm890_vm9, %v1502_v17, %v3231_v27  ;;  %v752_v22 = vsel %vm746_vm1, %v2276_v5, %v3923_v44 }
 0x158   : > { %v1526_v50 = vsel %vm907_vm10, %v1510_v40, %v1366_v10  ;;  %v1364_v4 = vpop.permute.xlu0 %1363  ;;  %v1484_v49 = vsel %vm856_vm7, %v1468_v60, %v3110_v61  ;;  %v3924_v40 = vld [vmem:[#allocation2_spill] sm:$0xff]  ;;  %v488_v10 = vrot.slane %v3222_v54, 1  ;;  %v3927_v60 = vld [vmem:[#allocation9_spill] sm:$0xff]  ;;  %v3928_v54 = vld [vmem:[#allocation27_spill] sm:$0xff] }
 0x159   : > { %v1547_v32 = vshll.u32 %v1526_v50, 16  ;;  %v1524_v11 = vsel %vm907_vm10, %v1508_v39, %v1364_v4  ;;  %740 = vrot.lane.b32.xlu1 %v3302_v2, %s2341_s28  ;;  %v1500_v47 = vsel %vm873_vm8, %v1484_v49, %v3139_v24  ;;  %v1545_v56 = vshrl.u32 %v1526_v50, 16  ;;  %v3926_v50 = vld [vmem:[#allocation3_spill] sm:$0xff]  ;;  %v3929_v49 = vld [vmem:[#allocation10_spill] sm:$0xff] }
 0x15a   : > { %v1541_v57 = vshll.u32 %v1524_v11, 16  ;;  %738 = vrot.lane.b32.xlu0 %v3086_v18, %s2341_s28  ;;  %v1516_v61 = vsel %vm890_vm9, %v1500_v47, %v3236_v31  ;;  %v1539_v51 = vshrl.u32 %v1524_v11, 16  ;;  %v2071_v24 = vcombine.low %v3177_v42, %v2012_v62  ;;  %v3930_v47 = vld [vmem:[#allocation28_spill] sm:$0xff] }
 0x15b   : > { %v1549_v48 = vrot.slane %v1547_v32, 1  ;;  %v1374_v21 = vpop.permute.xlu1 %1373  ;;  %v775_v35 = vsel %vm771_vm2, %v752_v22, %v3927_v60  ;;  %v3942_v22 = vld [vmem:[#allocation33_spill] sm:$0xff]  ;;  %v3946_v60 = vld [vmem:[#allocation34_spill] sm:$0xff] }
 0x15c   : > { %v1543_v3 = vrot.slane %v1541_v57, 1  ;;  %v1534_v46 = vsel %vm907_vm10, %v1518_v9, %v1374_v21  ;;  %v1372_v19 = vpop.permute.xlu0 %1371  ;;  %v1359_v14 = vshll.u32 %v2071_v24, 16  ;;  %v792_v11 = vsel %vm788_vm3, %v775_v35, %v3928_v54  ;;  %v3932_v21 = vld [vmem:[#allocation4_spill] sm:$0xff]  ;;  %v3947_v54 = vld [vmem:[#allocation45_spill] sm:$0xff] }
 0x15d   : > { %v1571_v16 = vshll.u32 %v1534_v46, 16  ;;  %v1532_v1 = vsel %vm907_vm10, %v1516_v61, %v1372_v19  ;;  %1346 = vrot.lane.b32.xlu1 %v2648_v41, %s2334_s30  ;;  %v1550_v27 = vor.u32 %v1549_v48, %v1545_v56  ;;  %v1569_v31 = vshrl.u32 %v1534_v46, 16  ;;  %v3931_v56 = vld [vmem:[#allocation39_spill] sm:$0xff]  ;;  %v2279_v19 = vld [vmem:[%s2396_s21 + $0x20] sm:$0xf] }
 0x15e   : > { %v1565_v13 = vshll.u32 %v1532_v1, 16  ;;  %1344 = vrot.lane.b32.xlu0 %v2650_v43, %s2334_s30  ;;  %v1544_v55 = vor.u32 %v1543_v3, %v1539_v51  ;;  %v1563_v58 = vshrl.u32 %v1532_v1, 16  ;;  %v1357_v57 = vshrl.u32 %v2071_v24, 16  ;;  %v2278_v51 = vld [vmem:[%s2396_s21 + $0x28] sm:$0xf]  ;;  %v3934_v3 = vld [vmem:[#allocation17_spill] sm:$0xff] }
 0x15f   : > { %v1573_v33 = vrot.slane %v1571_v16, 1  ;;  %v532_v28 = vpop.permute.xlu1 %531  ;;  %v1361_v62 = vrot.slane %v1359_v14, 1  ;;  %v809_v48 = vsel %vm805_vm4, %v792_v11, %v3931_v56  ;;  %v3933_v61 = vrot.slane %v3932_v21, 1  ;;  %v3935_v16 = vld [vmem:[#allocation18_spill] sm:$0xff]  ;;  %v3951_v21 = vld [vmem:[#allocation53_spill] sm:$0xff] }
 0x160   : > { %v1567_v36 = vrot.slane %v1565_v13, 1  ;;  %v530_v8 = vpop.permute.xlu0 %529  ;;  %v2073_v37 = vcombine.low %v1544_v55, %v1550_v27  ;;  %v764_v46 = vsel %vm746_vm1, %v2278_v51, %v3934_v3  ;;  %v761_v1 = vsel %vm746_vm1, %v2279_v19, %v3935_v16  ;;  %v3937_v13 = vld [vmem:[#allocation49_spill] sm:$0xff]  ;;  %v3950_v56 = vld [vmem:[#allocation46_spill] sm:$0xff] }
 0x161   : > { %1354 = vrot.lane.b32.xlu1 %v2071_v24, %s2334_s30  ;;  %v1574_v41 = vor.u32 %v1573_v33, %v1569_v31  ;;  %v3936_v24 = vld [vmem:[#allocation40_spill] sm:$0xff]  ;;  %v826_v55 = vsel %vm822_vm5, %v809_v48, %v3937_v13  ;;  %v3938_v33 = vld [vmem:[#allocation23_spill] sm:$0xff]  ;;  %v3952_v3 = vld [vmem:[#allocation54_spill] sm:$0xff] }
 0x162   : > { %1352 = vrot.lane.b32.xlu0 %v3116_v15, %s2334_s30  ;;  %2094 = vmatprep.mubr.msk.bf16.mxu0 %vm924_vm11, %v2073_v37  ;;  %v1568_v43 = vor.u32 %v1567_v36, %v1563_v58  ;;  %v2277_v15 = vld [vmem:[%s2396_s21] sm:$0xf]  ;;  %v783_v58 = vsel %vm771_vm2, %v764_v46, %v3938_v33  ;;  %v3939_v36 = vld [vmem:[#allocation24_spill] sm:$0xff]  ;;  %v3953_v19 = vld [vmem:[#allocation61_spill] sm:$0xff] }
 0x163   : > { %v3381_v42 = vpop.permute.xlu1 %539  ;;  %v749_v39 = vsel %vm746_vm1, %v2277_v15, %v3925_v52  ;;  %v781_v37 = vsel %vm771_vm2, %v761_v1, %v3939_v36  ;;  %v3944_v15 = vld [vmem:[#allocation67_spill] sm:$0xff]  ;;  %v3956_v33 = vld [vmem:[#allocation70_spill] sm:$0xff] }
 0x164   : > { %v3383_v63 = vpop.permute.xlu0 %537  ;;  %v2077_v0 = vcombine.low %v1568_v43, %v1574_v41  ;;  %v773_v17 = vsel %vm771_vm2, %v749_v39, %v3929_v49  ;;  %v3940_v41 = vld [vmem:[#allocation50_spill] sm:$0xff]  ;;  %v3945_v39 = vld [vmem:[#allocation13_spill] sm:$0xff]  ;;  %v798_v35 = vsel %vm788_vm3, %v781_v37, %v3946_v60  ;;  %v3948_v49 = vld [vmem:[#allocation68_spill] sm:$0xff] }
 0x165   : > { %495 = vrot.lane.b32.xlu1 %v3924_v40, %s2333_s29  ;;  %v790_v9 = vsel %vm788_vm3, %v773_v17, %v3930_v47  ;;  %v800_v40 = vsel %vm788_vm3, %v783_v58, %v3942_v22  ;;  %v815_v48 = vsel %vm805_vm4, %v798_v35, %v3950_v56 }
 0x166   : > { %493 = vrot.lane.b32.xlu0 %v3926_v50, %s2333_s29  ;;  %2096 = vmatprep.mubr.msk.bf16.mxu1 %vm924_vm11, %v2077_v0  ;;  %v807_v27 = vsel %vm805_vm4, %v790_v9, %v3936_v24  ;;  %v3941_v0 = vld [vmem:[#allocation57_spill] sm:$0xff]  ;;  %v1362_v50 = vor.u32 %v1361_v62, %v1357_v57  ;;  %v817_v11 = vsel %vm805_vm4, %v800_v40, %v3947_v54  ;;  %v3949_v9 = vld [vmem:[#allocation14_spill] sm:$0xff]  ;;  %v3958_v40 = vld [vmem:[#allocation72_spill] sm:$0xff] }
 0x167   : > { %v3397_v4 = vpop.permute.xlu1 %1161  ;;  %v824_v43 = vsel %vm822_vm5, %v807_v27, %v3940_v41  ;;  %v843_v5 = vsel %vm839_vm6, %v826_v55, %v3941_v0  ;;  %v834_v57 = vsel %vm822_vm5, %v817_v11, %v3951_v21  ;;  %v832_v46 = vsel %vm822_vm5, %v815_v48, %v3952_v3  ;;  %v3954_v27 = vld [vmem:[#allocation62_spill] sm:$0xff]  ;;  %v3955_v55 = vld [vmem:[#allocation69_spill] sm:$0xff] }
 0x168   : > { %v3401_v32 = vpop.permute.xlu0 %1159  ;;  %v860_v52 = vsel %vm856_vm7, %v843_v5, %v3944_v15  ;;  %v849_v13 = vsel %vm839_vm6, %v832_v46, %v3954_v27  ;;  %v3961_v15 = vld [vmem:[#allocation32_spill] sm:$0xff]  ;;  %v3962_v11 = vld [vmem:[#allocation74_spill] sm:$0xff]  ;;  %v644_v3 = vrot.slane %v2569_v20, 1  ;;  %v3970_v27 = vrot.slane %v2575_v23, 1 }
 0x169   : > { %503 = vrot.lane.b32.xlu1 %v488_v10, %s2333_s29  ;;  %v3943_v10 = vld [vmem:[#allocation58_spill] sm:$0xff]  ;;  %v877_v47 = vsel %vm873_vm8, %v860_v52, %v3248_v59  ;;  %v851_v59 = vsel %vm839_vm6, %v834_v57, %v3953_v19  ;;  %v866_v58 = vsel %vm856_vm7, %v849_v13, %v3956_v33  ;;  %v3969_v46 = vld [vmem:[#allocation8_spill] sm:$0xff] }
 0x16a   : > { %501 = vrot.lane.b32.xlu0 %v3933_v61, %s2333_s29  ;;  %v841_v14 = vsel %vm839_vm6, %v824_v43, %v3943_v10  ;;  %v894_v61 = vsel %vm890_vm9, %v877_v47, %v532_v28  ;;  %v883_v37 = vsel %vm873_vm8, %v866_v58, %v3259_v6  ;;  %v3959_v10 = vld [vmem:[#allocation31_spill] sm:$0xff]  ;;  %v3960_v6 = vld [vmem:[#allocation73_spill] sm:$0xff]  ;;  %v3972_v23 = vld [vmem:[#allocation66_spill] sm:$0xff]  ;;  %s1970_s29 = sshll.u32 %s4012_s10, 5 }
 0x16b   : > { %v1170_v31 = vpop.permute.xlu1 %1169  ;;  %v858_v17 = vsel %vm856_vm7, %v841_v14, %v3948_v49  ;;  %v900_v0 = vsel %vm890_vm9, %v883_v37, %v3383_v63  ;;  %v3963_v49 = vld [vmem:[#allocation35_spill] sm:$0xff] }
 0x16c   : > { %v1168_v44 = vpop.permute.xlu0 %1167  ;;  %v875_v62 = vsel %vm873_vm8, %v858_v17, %v3250_v34  ;;  %v868_v34 = vsel %vm856_vm7, %v851_v59, %v3955_v55 }
 0x16d   : > { %1369 = vrot.lane.b32.xlu1 %v3945_v39, %s2335_s3  ;;  %v892_v16 = vsel %vm890_vm9, %v875_v62, %v530_v8  ;;  %v885_v36 = vsel %vm873_vm8, %v868_v34, %v3257_v7  ;;  %v3957_v8 = vld [vmem:[#allocation71_spill] sm:$0xff]  ;;  %v1386_v7 = vsel %vm746_vm1, %v3959_v10, %v3958_v40 }
 0x16e   : > { %1367 = vrot.lane.b32.xlu0 %v3949_v9, %s2335_s3  ;;  %v902_v41 = vsel %vm890_vm9, %v885_v36, %v3381_v42  ;;  %v1384_v42 = vsel %vm746_vm1, %v3961_v15, %v3960_v6  ;;  %v1402_v52 = vsel %vm771_vm2, %v1386_v7, %v3268_v12  ;;  %v1394_v12 = vsel %vm746_vm1, %v3963_v49, %v3962_v11  ;;  %v3974_v7 = vld [vmem:[#allocation44_spill] sm:$0xff]  ;;  %v2281_v11 = vld [vmem:[%s2396_s21 + $0x98] sm:$0xf] }
 0x16f   : > { %v628_v51 = vpop.permute.xlu1 %627  ;;  %v1400_v63 = vsel %vm771_vm2, %v1384_v42, %v3275_v53  ;;  %v1418_v39 = vsel %vm788_vm3, %v1402_v52, %v3397_v4  ;;  %v3965_v53 = vld [vmem:[#allocation36_spill] sm:$0xff]  ;;  %v1410_v47 = vsel %vm771_vm2, %v1394_v12, %v3299_v25  ;;  %v3967_v25 = vld [vmem:[#allocation6_spill] sm:$0xff]  ;;  %v3975_v52 = vrot.slane %v3961_v15, 1 }
 0x170   : > { %v911_v1 = vsel %vm907_vm10, %v894_v61, %v628_v51  ;;  %v626_v24 = vpop.permute.xlu0 %625  ;;  %v1416_v60 = vsel %vm788_vm3, %v1400_v63, %v3401_v32  ;;  %v1426_v9 = vsel %vm788_vm3, %v1410_v47, %v1170_v31  ;;  %v3966_v61 = vld [vmem:[#allocation5_spill] sm:$0xff]  ;;  %v710_v63 = vrot.slane %v3965_v53, 1 }
 0x171   : > { %v909_v28 = vsel %vm907_vm10, %v892_v16, %v626_v24  ;;  %1377 = vrot.lane.b32.xlu1 %v1362_v50, %s2335_s3  ;;  %v648_v24 = vrot.slane %v2581_v26, 1  ;;  %v2050_v49 = vcombine.low %v2281_v11, %v2281_v11 }
 0x172   : > { %1375 = vrot.lane.b32.xlu0 %v3957_v8, %s2335_s3  ;;  %v2280_v8 = vld [vmem:[%s2396_s21 + $0x90] sm:$0xf] }
 0x173   : > { %v636_v43 = vpop.permute.xlu1 %635  ;;  %v2048_v37 = vcombine.low %v2280_v8, %v2280_v8 }
 0x174   : > { %v919_v5 = vsel %vm907_vm10, %v902_v41, %v636_v43  ;;  %v634_v22 = vpop.permute.xlu0 %633 }
 0x175   : > { %v917_v14 = vsel %vm907_vm10, %v900_v0, %v634_v22  ;;  %535 = vrot.lane.b32.xlu1 %v3284_v38, %s2334_s30 }
 0x176   : > { %533 = vrot.lane.b32.xlu0 %v3069_v45, %s2334_s30  ;;  %v3964_v45 = vld [vmem:[#allocation75_spill] sm:$0xff] }
 0x177   : > { %v1234_v50 = vpop.permute.xlu1 %1233  ;;  %v1392_v4 = vsel %vm746_vm1, %v3965_v53, %v3964_v45 }
 0x178   : > { %v1434_v35 = vsel %vm805_vm4, %v1418_v39, %v1234_v50  ;;  %v1232_v54 = vpop.permute.xlu0 %1231  ;;  %v1408_v32 = vsel %vm771_vm2, %v1392_v4, %v3313_v29 }
 0x179   : > { %v1432_v17 = vsel %vm805_vm4, %v1416_v60, %v1232_v54  ;;  %543 = vrot.lane.b32.xlu1 %v3302_v2, %s2334_s30  ;;  %v1424_v48 = vsel %vm788_vm3, %v1408_v32, %v1168_v44  ;;  %v3968_v44 = vld [vmem:[#allocation7_spill] sm:$0xff]  ;;  %v3976_v54 = vld [vmem:[#allocation65_spill] sm:$0xff] }
 0x17a   : > { %541 = vrot.lane.b32.xlu0 %v3086_v18, %s2334_s30 }
 0x17b   : > { %v1242_v56 = vpop.permute.xlu1 %1241 }
 0x17c   : > { %v1442_v21 = vsel %vm805_vm4, %v1426_v9, %v1242_v56  ;;  %v1240_v57 = vpop.permute.xlu0 %1239 }
 0x17d   : > { %v1440_v62 = vsel %vm805_vm4, %v1424_v48, %v1240_v57  ;;  %631 = vrot.lane.b32.xlu1 %v3966_v61, %s2335_s3 }
 0x17e   : > { %629 = vrot.lane.b32.xlu0 %v3967_v25, %s2335_s3 }
 0x17f   : > { %v652_v18 = vpop.permute.xlu1 %651 }
 0x180   : > { %v3527_v51 = vsel %vm924_vm11, %v911_v1, %v652_v18  ;;  %v650_v29 = vpop.permute.xlu0 %649 }
 0x181   : > { %v3530_v31 = vsel %vm924_vm11, %v909_v28, %v650_v29  ;;  %639 = vrot.lane.b32.xlu1 %v3968_v44, %s2335_s3  ;;  %v3971_v28 = vrot.slane %v2591_v30, 1 }
 0x182   : > { %637 = vrot.lane.b32.xlu0 %v3969_v46, %s2335_s3 }
 0x183   : > { %v660_v19 = vpop.permute.xlu1 %659 }
 0x184   : > { %v3538_v59 = vsel %vm924_vm11, %v919_v5, %v660_v19  ;;  %v658_v16 = vpop.permute.xlu0 %657  ;;  %v3973_v5 = vld [vmem:[#allocation41_spill] sm:$0xff] }
 0x185   : > { %v3541_v1 = vsel %vm924_vm11, %v917_v14, %v658_v16  ;;  %655 = vrot.lane.b32.xlu1 %v644_v3, %s2336_s4 }
 0x186   : > { %653 = vrot.lane.b32.xlu0 %v3970_v27, %s2336_s4 }
 0x187   : > { %v1260_v20 = vpop.permute.xlu1 %1259 }
 0x188   : > { %v1450_v13 = vsel %vm822_vm5, %v1434_v35, %v1260_v20  ;;  %v1258_v55 = vpop.permute.xlu0 %1257 }
 0x189   : > { %v1448_v34 = vsel %vm822_vm5, %v1432_v17, %v1258_v55  ;;  %663 = vrot.lane.b32.xlu1 %v648_v24, %s2336_s4 }
 0x18a   : > { %661 = vrot.lane.b32.xlu0 %v3971_v28, %s2336_s4 }
 0x18b   : > { %v1268_v33 = vpop.permute.xlu1 %1267 }
 0x18c   : > { %v1458_v58 = vsel %vm822_vm5, %v1442_v21, %v1268_v33  ;;  %v1266_v26 = vpop.permute.xlu0 %1265 }
 0x18d   : > { %v1456_v36 = vsel %vm822_vm5, %v1440_v62, %v1266_v26  ;;  %674 = vrot.lane.b32.xlu1 %v3972_v23, %s2338_s18 }
 0x18e   : > { %672 = vrot.lane.b32.xlu0 %v3284_v38, %s2338_s18 }
 0x18f   : > { %v671_v41 = vpop.permute.xlu1 %670 }
 0x190   : > { %v669_v43 = vpop.permute.xlu0 %668  ;;  %v945_v18 = vsel %vm941_vm12, %v3527_v51, %v671_v41 }
 0x191   : > { %682 = vrot.lane.b32.xlu1 %v2048_v37, %s2338_s18  ;;  %v943_v29 = vsel %vm941_vm12, %v3530_v31, %v669_v43 }
 0x192   : > { %680 = vrot.lane.b32.xlu0 %v3302_v2, %s2338_s18 }
 0x193   : > { %v679_v30 = vpop.permute.xlu1 %678 }
 0x194   : > { %v677_v0 = vpop.permute.xlu0 %676  ;;  %v953_v20 = vsel %vm941_vm12, %v3538_v59, %v679_v30 }
 0x195   : > { %700 = vrot.lane.b32.xlu1 %v3973_v5, %s2339_s6  ;;  %v951_v31 = vsel %vm941_vm12, %v3541_v1, %v677_v0 }
 0x196   : > { %698 = vrot.lane.b32.xlu0 %v3966_v61, %s2339_s6 }
 0x197   : > { %v1279_v22 = vpop.permute.xlu1 %1278 }
 0x198   : > { %v3569_v40 = vsel %vm839_vm6, %v1450_v13, %v1279_v22  ;;  %v1277_v38 = vpop.permute.xlu0 %1276 }
 0x199   : > { %v3572_v10 = vsel %vm839_vm6, %v1448_v34, %v1277_v38  ;;  %708 = vrot.lane.b32.xlu1 %v3974_v7, %s2339_s6 }
 0x19a   : > { %706 = vrot.lane.b32.xlu0 %v3968_v44, %s2339_s6 }
 0x19b   : > { %v1287_v2 = vpop.permute.xlu1 %1286 }
 0x19c   : > { %v3579_v14 = vsel %vm839_vm6, %v1458_v58, %v1287_v2  ;;  %v1285_v6 = vpop.permute.xlu0 %1284 }
 0x19d   : > { %v3582_v42 = vsel %vm839_vm6, %v1456_v36, %v1285_v6  ;;  %717 = vrot.lane.b32.xlu1 %v3975_v52, %s2340_s23 }
 0x19e   : > { %715 = vrot.lane.b32.xlu0 %v644_v3, %s2340_s23 }
 0x19f   : > { %v697_v39 = vpop.permute.xlu1 %696 }
 0x1a0   : > { %v695_v50 = vpop.permute.xlu0 %694  ;;  %v962_v44 = vsel %vm958_vm13, %v945_v18, %v697_v39 }
 0x1a1   : > { %725 = vrot.lane.b32.xlu1 %v710_v63, %s2340_s23  ;;  %v960_v3 = vsel %vm958_vm13, %v943_v29, %v695_v50 }
 0x1a2   : > { %723 = vrot.lane.b32.xlu0 %v648_v24, %s2340_s23 }
 0x1a3   : > { %v705_v60 = vpop.permute.xlu1 %704 }
 0x1a4   : > { %v703_v35 = vpop.permute.xlu0 %702  ;;  %v970_v13 = vsel %vm958_vm13, %v953_v20, %v705_v60 }
 0x1a5   : > { %736 = vrot.lane.b32.xlu1 %v3976_v54, %s2341_s28  ;;  %v968_v34 = vsel %vm958_vm13, %v951_v31, %v703_v35 }
 0x1a6   : > { %734 = vrot.lane.b32.xlu0 %v3972_v23, %s2341_s28 }
 0x1a7   : > { %v1302_v15 = vpop.permute.xlu1 %1301 }
 0x1a8   : > { %v1300_v12 = vpop.permute.xlu0 %1299  ;;  %v1482_v22 = vsel %vm856_vm7, %v3569_v40, %v1302_v15 }
 0x1a9   : > { %744 = vrot.lane.b32.xlu1 %v2050_v49, %s2341_s28  ;;  %v1480_v38 = vsel %vm856_vm7, %v3572_v10, %v1300_v12 }
 0x1aa   : > { %742 = vrot.lane.b32.xlu0 %v2048_v37, %s2341_s28 }
 0x1ab   : > { %v1310_v17 = vpop.permute.xlu1 %1309 }
 0x1ac   : > { %v1308_v45 = vpop.permute.xlu0 %1307  ;;  %v1490_v60 = vsel %vm856_vm7, %v3579_v14, %v1310_v17 }
 0x1ad   : > { %v1488_v10 = vsel %vm856_vm7, %v3582_v42, %v1308_v45 }
 0x1af   : > { %v714_v53 = vpop.permute.xlu1 %713 }
 0x1b0   : > { %v712_v4 = vpop.permute.xlu0 %711  ;;  %v979_v46 = vsel %vm975_vm14, %v962_v44, %v714_v53 }
 0x1b1   : > { %v977_v16 = vsel %vm975_vm14, %v960_v3, %v712_v4 }
 0x1b3   : > { %v722_v47 = vpop.permute.xlu1 %721 }
 0x1b4   : > { %v720_v32 = vpop.permute.xlu0 %719  ;;  %v987_v28 = vsel %vm975_vm14, %v970_v13, %v722_v47 }
 0x1b5   : > { %v985_v58 = vsel %vm975_vm14, %v968_v34, %v720_v32 }
 0x1b7   : > { %v1328_v9 = vpop.permute.xlu1 %1327 }
 0x1b8   : > { %v1326_v56 = vpop.permute.xlu0 %1325  ;;  %v1498_v7 = vsel %vm873_vm8, %v1482_v22, %v1328_v9  ;;  %v2282_v22 = vld [vmem:[%s2396_s21 + $0x18] sm:$0xf] }
 0x1b9   : > { %v1496_v2 = vsel %vm873_vm8, %v1480_v38, %v1326_v56  ;;  %v3977_v38 = vld [vmem:[#allocation15_spill] sm:$0xff] }
 0x1bb   : > { %v1336_v48 = vpop.permute.xlu1 %1335 }
 0x1bc   : > { %v1334_v21 = vpop.permute.xlu0 %1333  ;;  %v1506_v54 = vsel %vm873_vm8, %v1490_v60, %v1336_v48  ;;  %v3980_v60 = vld [vmem:[#allocation22_spill] sm:$0xff] }
 0x1bd   : > { %v1504_v49 = vsel %vm873_vm8, %v1488_v10, %v1334_v21 }
 0x1bf   : > { %v3598_v57 = vpop.permute.xlu1 %478 }
 0x1c0   : > { %v3600_v62 = vpop.permute.xlu0 %476 }
 0x1c3   : > { %v3602_v61 = vpop.permute.xlu1 %486 }
 0x1c4   : > { %v3604_v25 = vpop.permute.xlu0 %484 }
 0x1c7   : > { %v733_v19 = vpop.permute.xlu1 %732 }
 0x1c8   : > { %v996_v24 = vsel %vm992_vm15, %v979_v46, %v733_v19  ;;  %v731_v27 = vpop.permute.xlu0 %730 }
 0x1c9   : > { %v994_v51 = vsel %vm992_vm15, %v977_v16, %v731_v27 }
 0x1ca   : > { %v2072_v55 = vcombine.low %v994_v51, %v996_v24 }
 0x1cb   : > { %v741_v33 = vpop.permute.xlu1 %740 }
 0x1cc   : > { %v1004_v26 = vsel %vm992_vm15, %v987_v28, %v741_v33  ;;  %1780 = vmatmul.mubr.bf16.vlgmr.msra.gmra.mrb[0].mxu0 %v2072_v55  ;;  %v739_v36 = vpop.permute.xlu0 %738 }
 0x1cd   : > { %v1002_v59 = vsel %vm992_vm15, %v985_v58, %v739_v36 }
 0x1ce   : > { %v2076_v23 = vcombine.low %v1002_v59, %v1004_v26 }
 0x1cf   : > { %v1347_v8 = vpop.permute.xlu1 %1346 }
 0x1d0   : > { %1796 = vmatmul.mubr.bf16.vlgmr.msra.gmra.mrb[0].mxu1 %v2076_v23  ;;  %v1345_v1 = vpop.permute.xlu0 %1344  ;;  %v1514_v6 = vsel %vm890_vm9, %v1498_v7, %v1347_v8  ;;  %v758_v7 = vsel %vm746_vm1, %v2282_v22, %v3977_v38  ;;  %v3993_v38 = vld [vmem:[#allocation60_spill] sm:$0xff] }
 0x1d1   : > { %v1512_v63 = vsel %vm890_vm9, %v1496_v2, %v1345_v1  ;;  %v2283_v2 = vld [vmem:[%s2396_s21 + $0x10] sm:$0xf] }
 0x1d3   : > { %v1355_v37 = vpop.permute.xlu1 %1354 }
 0x1d4   : > { %v1353_v41 = vpop.permute.xlu0 %1352  ;;  %v1522_v15 = vsel %vm890_vm9, %v1506_v54, %v1355_v37 }
 0x1d5   : > { %v1520_v47 = vsel %vm890_vm9, %v1504_v49, %v1353_v41 }
 0x1d7   : > { %v3626_v43 = vpop.permute.xlu1 %495 }
 0x1d8   : > { %v3628_v30 = vpop.permute.xlu0 %493 }
 0x1db   : > { %v3630_v0 = vpop.permute.xlu1 %503 }
 0x1dc   : > { %v3632_v5 = vpop.permute.xlu0 %501 }
 0x1df   : > { %v1370_v52 = vpop.permute.xlu1 %1369 }
 0x1e0   : > { %v1530_v39 = vsel %vm907_vm10, %v1514_v6, %v1370_v52  ;;  %v1368_v50 = vpop.permute.xlu0 %1367  ;;  %v3978_v6 = vld [vmem:[#allocation11_spill] sm:$0xff] }
 0x1e1   : > { %v1559_v35 = vshll.u32 %v1530_v39, 16  ;;  %v1528_v40 = vsel %vm907_vm10, %v1512_v63, %v1368_v50  ;;  %v1557_v12 = vshrl.u32 %v1530_v39, 16  ;;  %v755_v52 = vsel %vm746_vm1, %v2283_v2, %v3978_v6  ;;  %v3979_v63 = vld [vmem:[#allocation21_spill] sm:$0xff] }
 0x1e2   : > { %v1553_v11 = vshll.u32 %v1528_v40, 16  ;;  %v1551_v32 = vshrl.u32 %v1528_v40, 16  ;;  %v779_v39 = vsel %vm771_vm2, %v758_v7, %v3979_v63  ;;  %v3981_v40 = vld [vmem:[#allocation29_spill] sm:$0xff] }
 0x1e3   : > { %v1561_v53 = vrot.slane %v1559_v35, 1  ;;  %v1378_v4 = vpop.permute.xlu1 %1377  ;;  %v777_v35 = vsel %vm771_vm2, %v755_v52, %v3980_v60  ;;  %v796_v10 = vsel %vm788_vm3, %v779_v39, %v3981_v40  ;;  %v3994_v52 = vld [vmem:[#allocation38_spill] sm:$0xff]  ;;  %v3995_v39 = vld [vmem:[#allocation47_spill] sm:$0xff] }
 0x1e4   : > { %v1555_v14 = vrot.slane %v1553_v11, 1  ;;  %v1538_v17 = vsel %vm907_vm10, %v1522_v15, %v1378_v4  ;;  %v1376_v9 = vpop.permute.xlu0 %1375  ;;  %v3982_v11 = vld [vmem:[#allocation30_spill] sm:$0xff]  ;;  %v3984_v4 = vld [vmem:[#allocation19_spill] sm:$0xff] }
 0x1e5   : > { %v1562_v56 = vor.u32 %v1561_v53, %v1557_v12  ;;  %v1583_v18 = vshll.u32 %v1538_v17, 16  ;;  %v1536_v42 = vsel %vm907_vm10, %v1520_v47, %v1376_v9  ;;  %v1581_v29 = vshrl.u32 %v1538_v17, 16  ;;  %v3983_v15 = vld [vmem:[#allocation42_spill] sm:$0xff]  ;;  %v2284_v53 = vld [vmem:[%s2396_s21 + $0x38] sm:$0xf]  ;;  %v3986_v17 = vld [vmem:[#allocation51_spill] sm:$0xff] }
 0x1e6   : > { %v1556_v45 = vor.u32 %v1555_v14, %v1551_v32  ;;  %v1577_v48 = vshll.u32 %v1536_v42, 16  ;;  %v1575_v46 = vshrl.u32 %v1536_v42, 16  ;;  %v794_v49 = vsel %vm788_vm3, %v777_v35, %v3982_v11  ;;  %v3985_v32 = vld [vmem:[#allocation43_spill] sm:$0xff] }
 0x1e7   : > { %v1585_v21 = vrot.slane %v1583_v18, 1  ;;  %v536_v44 = vpop.permute.xlu1 %535  ;;  %v813_v12 = vsel %vm805_vm4, %v796_v10, %v3983_v15  ;;  %v770_v47 = vsel %vm746_vm1, %v2284_v53, %v3984_v4  ;;  %v811_v14 = vsel %vm805_vm4, %v794_v49, %v3985_v32  ;;  %v3987_v18 = vld [vmem:[#allocation20_spill] sm:$0xff]  ;;  %v3997_v49 = vld [vmem:[#allocation55_spill] sm:$0xff] }
 0x1e8   : > { %v2075_v3 = vcombine.low %v1556_v45, %v1562_v56  ;;  %v1579_v19 = vrot.slane %v1577_v48, 1  ;;  %v534_v16 = vpop.permute.xlu0 %533  ;;  %v830_v9 = vsel %vm822_vm5, %v813_v12, %v3986_v17  ;;  %v2285_v56 = vld [vmem:[%s2396_s21 + $0x30] sm:$0xf]  ;;  %v3988_v45 = vld [vmem:[#allocation25_spill] sm:$0xff]  ;;  %s1969_s21 = sshll.u32 %s4014_s9, 3 }
 0x1e9   : > { %v1586_v24 = vor.u32 %v1585_v21, %v1581_v29  ;;  %v767_v42 = vsel %vm746_vm1, %v2285_v56, %v3987_v18  ;;  %v787_v48 = vsel %vm771_vm2, %v770_v47, %v3988_v45  ;;  %v3989_v29 = vld [vmem:[#allocation52_spill] sm:$0xff]  ;;  %v3999_v47 = vld [vmem:[#allocation63_spill] sm:$0xff]  ;;  %s163_s30 = sadd.s32 %s1970_s29, %s1969_s21 }
 0x1ea   : > { %v1580_v27 = vor.u32 %v1579_v19, %v1575_v46  ;;  %2095 = vmatprep.mubr.msk.bf16.mxu0 %vm924_vm11, %v2075_v3  ;;  %v828_v21 = vsel %vm822_vm5, %v811_v14, %v3989_v29  ;;  %v3990_v3 = vld [vmem:[#allocation59_spill] sm:$0xff]  ;;  %v3996_v10 = vld [vmem:[#allocation48_spill] sm:$0xff]  ;;  %s1971_s3 = sshll.u32 %s163_s30, 2 }
 0x1eb   : > { %v3655_v20 = vpop.permute.xlu1 %543  ;;  %v847_v46 = vsel %vm839_vm6, %v830_v9, %v3990_v3  ;;  %v845_v7 = vsel %vm839_vm6, %v828_v21, %v3993_v38  ;;  %v3998_v53 = vld [vmem:[#allocation56_spill] sm:$0xff]  ;;  %s3782_s6 = scalar_lea.vmem %s3817_s2, %s1971_s3 }
 0x1ec   : > { %v2079_v51 = vcombine.low %v1580_v27, %v1586_v24  ;;  %v3657_v31 = vpop.permute.xlu0 %541  ;;  %v3991_v24 = vld [vmem:[#allocation26_spill] sm:$0xff]  ;;  %v864_v2 = vsel %vm856_vm7, %v847_v46, %v3598_v57  ;;  %v862_v35 = vsel %vm856_vm7, %v845_v7, %v3600_v62  ;;  %v4000_v17 = vld [vmem:[#allocation64_spill] sm:$0xff] }
 0x1ed   : > { %v785_v27 = vsel %vm771_vm2, %v767_v42, %v3991_v24  ;;  %v881_v40 = vsel %vm873_vm8, %v864_v2, %v3626_v43  ;;  %v879_v57 = vsel %vm873_vm8, %v862_v35, %v3628_v30 }
 0x1ee   : > { %2097 = vmatprep.mubr.msk.bf16.mxu1 %vm924_vm11, %v2079_v51  ;;  %v3992_v51 = vld [vmem:[#allocation37_spill] sm:$0xff]  ;;  %v802_v63 = vsel %vm788_vm3, %v785_v27, %v3994_v52  ;;  %v898_v12 = vsel %vm890_vm9, %v881_v40, %v536_v44  ;;  %v896_v32 = vsel %vm890_vm9, %v879_v57, %v534_v16 }
 0x1ef   : > { %v632_v13 = vpop.permute.xlu1 %631  ;;  %v804_v22 = vsel %vm788_vm3, %v787_v48, %v3992_v51  ;;  %v819_v11 = vsel %vm805_vm4, %v802_v63, %v3996_v10 }
 0x1f0   : > { %v630_v55 = vpop.permute.xlu0 %629  ;;  %v821_v60 = vsel %vm805_vm4, %v804_v22, %v3995_v39  ;;  %v836_v4 = vsel %vm822_vm5, %v819_v11, %v3998_v53  ;;  %v915_v43 = vsel %vm907_vm10, %v898_v12, %v632_v13 }
 0x1f1   : > { %v838_v15 = vsel %vm822_vm5, %v821_v60, %v3997_v49  ;;  %v853_v9 = vsel %vm839_vm6, %v836_v4, %v4000_v17  ;;  %v913_v30 = vsel %vm907_vm10, %v896_v32, %v630_v55 }
 0x1f2   : > { %v855_v62 = vsel %vm839_vm6, %v838_v15, %v3999_v47  ;;  %v870_v42 = vsel %vm856_vm7, %v853_v9, %v3604_v25 }
 0x1f3   : > { %v3660_v34 = vpop.permute.xlu1 %639  ;;  %v872_v56 = vsel %vm856_vm7, %v855_v62, %v3602_v61  ;;  %v887_v48 = vsel %vm873_vm8, %v870_v42, %v3632_v5 }
 0x1f4   : > { %v3662_v28 = vpop.permute.xlu0 %637  ;;  %v889_v16 = vsel %vm873_vm8, %v872_v56, %v3630_v0  ;;  %v904_v25 = vsel %vm890_vm9, %v887_v48, %v3657_v31 }
 0x1f5   : > { %v906_v61 = vsel %vm890_vm9, %v889_v16, %v3655_v20  ;;  %v921_v5 = vsel %vm907_vm10, %v904_v25, %v3662_v28 }
 0x1f6   : > { %v923_v0 = vsel %vm907_vm10, %v906_v61, %v3660_v34 }
 0x1f7   : > { %v656_v33 = vpop.permute.xlu1 %655 }
 0x1f8   : > { %v654_v58 = vpop.permute.xlu0 %653  ;;  %v932_v44 = vsel %vm924_vm11, %v915_v43, %v656_v33 }
 0x1f9   : > { %v930_v13 = vsel %vm924_vm11, %v913_v30, %v654_v58 }
 0x1fb   : > { %v3664_v26 = vpop.permute.xlu1 %663 }
 0x1fc   : > { %v3666_v36 = vpop.permute.xlu0 %661  ;;  %v940_v20 = vsel %vm924_vm11, %v923_v0, %v3664_v26 }
 0x1fd   : > { %v938_v31 = vsel %vm924_vm11, %v921_v5, %v3666_v36 }
 0x1ff   : > { %v675_v59 = vpop.permute.xlu1 %674 }
 0x200   : > { %v673_v23 = vpop.permute.xlu0 %672  ;;  %v949_v45 = vsel %vm941_vm12, %v932_v44, %v675_v59 }
 0x201   : > { %v947_v55 = vsel %vm941_vm12, %v930_v13, %v673_v23 }
 0x203   : > { %v3668_v8 = vpop.permute.xlu1 %682 }
 0x204   : > { %v3670_v1 = vpop.permute.xlu0 %680  ;;  %v957_v34 = vsel %vm941_vm12, %v940_v20, %v3668_v8 }
 0x205   : > { %v955_v28 = vsel %vm941_vm12, %v938_v31, %v3670_v1 }
 0x207   : > { %v701_v37 = vpop.permute.xlu1 %700 }
 0x208   : > { %v699_v41 = vpop.permute.xlu0 %698  ;;  %v966_v33 = vsel %vm958_vm13, %v949_v45, %v701_v37 }
 0x209   : > { %v964_v58 = vsel %vm958_vm13, %v947_v55, %v699_v41 }
 0x20b   : > { %v709_v50 = vpop.permute.xlu1 %708 }
 0x20c   : > { %v707_v54 = vpop.permute.xlu0 %706  ;;  %v974_v26 = vsel %vm958_vm13, %v957_v34, %v709_v50 }
 0x20d   : > { %v972_v46 = vsel %vm958_vm13, %v955_v28, %v707_v54 }
 0x20f   : > { %v718_v19 = vpop.permute.xlu1 %717 }
 0x210   : > { %v716_v6 = vpop.permute.xlu0 %715  ;;  %v983_v59 = vsel %vm975_vm14, %v966_v33, %v718_v19 }
 0x211   : > { %v981_v23 = vsel %vm975_vm14, %v964_v58, %v716_v6 }
 0x213   : > { %v726_v14 = vpop.permute.xlu1 %725 }
 0x214   : > { %v724_v18 = vpop.permute.xlu0 %723  ;;  %v991_v19 = vsel %vm975_vm14, %v974_v26, %v726_v14 }
 0x215   : > { %v989_v36 = vsel %vm975_vm14, %v972_v46, %v724_v18 }
 0x217   : > { %v737_v29 = vpop.permute.xlu1 %736 }
 0x218   : > { %v1000_v37 = vsel %vm992_vm15, %v983_v59, %v737_v29  ;;  %v735_v21 = vpop.permute.xlu0 %734 }
 0x219   : > { %v998_v41 = vsel %vm992_vm15, %v981_v23, %v735_v21 }
 0x21a   : > { %v2074_v3 = vcombine.low %v998_v41, %v1000_v37 }
 0x21b   : > { %v745_v24 = vpop.permute.xlu1 %744 }
 0x21c   : > { %v1008_v27 = vsel %vm992_vm15, %v991_v19, %v745_v24  ;;  %1788 = vmatmul.mubr.bf16.gmra.mrb[4].mxu0 %v2074_v3  ;;  %v743_v8 = vpop.permute.xlu0 %742 }
 0x21d   : > { %v1006_v51 = vsel %vm992_vm15, %v989_v36, %v743_v8 }
 0x21e   : > { %v2078_v22 = vcombine.low %v1006_v51, %v1008_v27 }
 0x220   : > { %1804 = vmatmul.mubr.bf16.gmra.mrb[4].mxu1 %v2078_v22 }
 0x29f   : > { %v1781_v1 = vpop.f32.mrb[0].mxu0 }
 0x2a0   : > { %v1812_v50 = vmul.f32 0.999995, %v1781_v1  ;;  %v1783_v54 = vpop.f32.mrb[1].mxu0 }
 0x2a1   : > { %v1784_v38 = vpop.f32.mrb[2].mxu0 }
 0x2a2   : > { %v1820_v7 = vmax.f32 %v1812_v50, 0.0  ;;  %v1813_v2 = vmul.f32 0.999995, %v1784_v38  ;;  %v1786_v6 = vpop.f32.mrb[3].mxu0 }
 0x2a3   : > { %v1797_v52 = vpop.f32.mrb[0].mxu1 }
 0x2a4   : > { %v2109_v63 = vpack.c.bf16 %v1820_v7, %v1820_v7  ;;  %v1821_v39 = vmax.f32 %v1813_v2, 0.0  ;;  %v1816_v60 = vmul.f32 0.999995, %v1797_v52  ;;  %v1799_v35 = vpop.f32.mrb[1].mxu1 }
 0x2a5   : > { %v1800_v40 = vpop.f32.mrb[2].mxu1 }
 0x2a6   : > { %1861 = vst.msk [vmem:[%s3782_s6] sm:$0xf] %vm1860_vm0, %v2109_v63  ;;  %v2110_v10 = vpack.c.bf16 %v1821_v39, %v1821_v39  ;;  %v1824_v11 = vmax.f32 %v1816_v60, 0.0  ;;  %v1817_v49 = vmul.f32 0.999995, %v1800_v40  ;;  %v1802_v15 = vpop.f32.mrb[3].mxu1 }
 0x2a8   : > { %1862 = vst.msk [vmem:[%s3782_s6 + $0x4] sm:$0xf] %vm1860_vm0, %v2110_v10  ;;  %v2113_v57 = vpack.c.bf16 %v1824_v11, %v1824_v11  ;;  %v1825_v12 = vmax.f32 %v1817_v49, 0.0 }
 0x2aa   : > { %1865 = vst.msk [vmem:[%s3782_s6 + $0x10] sm:$0xf] %vm1860_vm0, %v2113_v57  ;;  %v2114_v53 = vpack.c.bf16 %v1825_v12, %v1825_v12 }
 0x2ac   : > { %1866 = vst.msk [vmem:[%s3782_s6 + $0x14] sm:$0xf] %vm1860_vm0, %v2114_v53 }
 0x2ef   : > { %v1789_v4 = vpop.f32.mrb[4].mxu0 }
 0x2f0   : > { %v1814_v47 = vmul.f32 0.999995, %v1789_v4  ;;  %v1791_v62 = vpop.f32.mrb[5].mxu0 }
 0x2f1   : > { %v1792_v32 = vpop.f32.mrb[6].mxu0 }
 0x2f2   : > { %v1822_v43 = vmax.f32 %v1814_v47, 0.0  ;;  %v1815_v14 = vmul.f32 0.999995, %v1792_v32  ;;  %v1794_v17 = vpop.f32.mrb[7].mxu0 }
 0x2f3   : > { %v1805_v9 = vpop.f32.mrb[4].mxu1 }
 0x2f4   : > { %v2111_v56 = vpack.c.bf16 %v1822_v43, %v1822_v43  ;;  %v1823_v30 = vmax.f32 %v1815_v14, 0.0  ;;  %v1818_v44 = vmul.f32 0.999995, %v1805_v9  ;;  %v1807_v18 = vpop.f32.mrb[5].mxu1 }
 0x2f5   : > { %v1808_v42 = vpop.f32.mrb[6].mxu1 }
 0x2f6   : > { %1863 = vst.msk [vmem:[%s3782_s6 + $0x8] sm:$0xf] %vm1860_vm0, %v2111_v56  ;;  %v2112_v16 = vpack.c.bf16 %v1823_v30, %v1823_v30  ;;  %v1826_v13 = vmax.f32 %v1818_v44, 0.0  ;;  %v1819_v45 = vmul.f32 0.999995, %v1808_v42  ;;  %v1810_v48 = vpop.f32.mrb[7].mxu1 }
 0x2f8   : > { %1864 = vst.msk [vmem:[%s3782_s6 + $0xc] sm:$0xf] %vm1860_vm0, %v2112_v16  ;;  %v2115_v61 = vpack.c.bf16 %v1826_v13, %v1826_v13  ;;  %v1827_v55 = vmax.f32 %v1819_v45, 0.0 }
 0x2fa   : > { %1867 = vst.msk [vmem:[%s3782_s6 + $0x18] sm:$0xf] %vm1860_vm0, %v2115_v61  ;;  %v2116_v33 = vpack.c.bf16 %v1827_v55, %v1827_v55 }
 0x2fc   : > { %1868 = vst.msk [vmem:[%s3782_s6 + $0x1c] sm:$0xf] %vm1860_vm0, %v2116_v33 }
 0x2fd PF: > { %s12_s13 = sadd.s32 1, %s2324_s13   ;;  %s4001_s9 = smov %s2316_s11 }
 0x2fe   : > { %p9_p7 = scmp.ge.s32.totalorder %s12_s13, 10   ;;  %s4002_s10 = smov %s2320_s12 }
 0x2ff   : > { %s4003_s11 = smov %s4006_s14  ;;  %s4004_s12 = smov %s4010_s15 }
 0x300   :  { %11 = sbr.rel (!%p9_p7) target bundleno = 3 (0x3), region = 61 }

// kernel: a_call__.5
= control target key start
LH: loop header
LB: loop body
LE: loop exit
PB: predicated region body
PF: predicated region fallthrough
CT: control target
= control target key end

     0   :  { %s2323_s9 = smov 0   ;;  %s2325_s10 = smov 0   ;;  %s3827_s0 = inlined_call_operand.vmem [shape: bf16[2,6,10,10,4], index: 0, kind: input, shape index: {}]   ;;  %s3828_s1 = inlined_call_operand.vmem [shape: bf16[108,8], index: 1, kind: input, shape index: {}]   ;;  %s3829_s2 = inlined_call_operand.vmem [shape: bf16[2,4,64,8], index: 2, kind: output, shape index: {}]  }
   0x1   :  { %s2327_s11 = smov 0   ;;  %s2329_s12 = smov 0  }
   0x2   :  { %s2331_s13 = smov 0  }
   0x3 LB: > { %s21_s14 = sadd.s32 1, %s2282_s11  ;;  %s24_s15 = sadd.s32 1, %s2286_s12  ;;  %s2290_s13 = sphi %s2331_s13, %s12_s13   ;;  %s2286_s12 = sphi %s2329_s12, %s4076_s12   ;;  %s2282_s11 = sphi %s2327_s11, %s4075_s11   ;;  %s2278_s10 = sphi %s2325_s10, %s4074_s10   ;;  %s2274_s9 = sphi %s2323_s9, %s4073_s9  }
   0x4   : > { %p22_p0 = scmp.ge.s32.totalorder %s21_s14, 4  ;;  %p1932_p1 = scmp.ge.s32.totalorder %s2290_s13, 1 }
   0x5   : > { %p126_p2 = scmp.lt.s32.totalorder %s2290_s13, 9 }
   0x6   : > { %s4078_s14 = smov (%p22_p0, %s21_s14), 0  ;;  %s4080_s15 = smov (!%p22_p0, %s24_s15), %s2286_s12 }
   0x7   : > { %p127_p3 = pnand %p1932_p1, %p126_p2  ;;  %p26_p4 = scmp.ge.s32.totalorder %s4080_s15, 2 }
   0x9   : > { %s4082_s15 = smov (%p26_p4, %s4080_s15), 0  ;;  %130 = sbr.rel (%p127_p3) target bundleno = 783 (0x30f), region = 28 }
  0x10   : > { %p152_p5 = scmp.lt.s32.totalorder %s2278_s10, 1  ;;  %s2062_s16 = smul.u32 80, %s2274_s9  ;;  %vm746_vm0 = vcmask 31744   ;;  %vm771_vm1 = vcmask 64512   ;;  %vm788_vm2 = vcmask 97280   ;;  %vm805_vm3 = vcmask 130048  }
  0x11   : > { %s2292_s22 = smov 8   ;;  %s2293_s23 = smov 4   ;;  %vm822_vm4 = vcmask 162816   ;;  %vm839_vm5 = vcmask 195584   ;;  %vm856_vm6 = vcmask 228352   ;;  %vm873_vm7 = vcmask 261120  }
  0x12   : > { %s4084_s10 = smov (!%p152_p5, %s2278_s10), 1  ;;  %s2294_s24 = smov 12   ;;  %vm890_vm8 = vcmask 293888   ;;  %vm907_vm9 = vcmask 326656   ;;  %vm1708_vm10 = vcmask 1045504   ;;  %vm924_vm11 = vcmask 359424  }
  0x13   : > { %s2120_s17 = smul.u32 480, %s4084_s10  ;;  %s2295_s25 = smov 16   ;;  %vm941_vm12 = vcmask 392192   ;;  %vm958_vm13 = vcmask 424960   ;;  %vm975_vm14 = vcmask 457728   ;;  %vm992_vm15 = vcmask 490496  }
  0x14   : > { %s2296_s26 = smov 20   ;;  %s2297_s27 = smov 24  }
  0x15   : > { %s156_s20 = scalar_lea.vmem %s3827_s0, %s2120_s17  ;;  %s2298_s28 = smov 28  }
  0x16   : > { %s2362_s21 = scalar_lea.vmem %s156_s20, %s2062_s16  ;;  %s2299_s29 = smov 32  }
  0x17   : > { %v2365_v0 = vld [vmem:[%s2362_s21 + $0x8] sm:$0xf]  ;;  %v173_v1 = vld [vmem:[%s2362_s21 + $0xc] sm:$0x1]  ;;  %v170_v2 = vld [vmem:[%s2362_s21] sm:$0xf] }
  0x18   : > { %v2370_v3 = vcombine.low %v2365_v0, %v173_v1  ;;  %v171_v4 = vld [vmem:[%s2362_s21 + $0x4] sm:$0x1]  ;;  %v2374_v5 = vld [vmem:[%s2362_s21 + $0x10] sm:$0xf]  ;;  %v175_v6 = vld [vmem:[%s2362_s21 + $0x14] sm:$0x1] }
  0x19   : > { %v1978_v7 = vcombine.low %v170_v2, %v171_v4  ;;  %v1980_v8 = vcombine.low %v2374_v5, %v175_v6  ;;  %v2379_v9 = vld [vmem:[%s2362_s21 + $0x18] sm:$0xf]  ;;  %v177_v10 = vld [vmem:[%s2362_s21 + $0x1c] sm:$0x1]  ;;  %v2386_v14 = vld [vmem:[%s2362_s21 + $0x28] sm:$0xf]  ;;  %v2457_v1 = vcombine.low %v2374_v5, %v2374_v5  ;;  %v1986_v2 = vcombine.low %v2365_v0, %v2365_v0 }
  0x1a   : > { %v3830_v11 = vrot.slane %v2370_v3, 1  ;;  %v1981_v12 = vcombine.low %v2379_v9, %v177_v10  ;;  %v288_v13 = vshll.u32 %v2370_v3, 16  ;;  %v181_v15 = vld [vmem:[%s2362_s21 + $0x2c] sm:$0x1]  ;;  %v286_v19 = vshrl.u32 %v2370_v3, 16  ;;  %s2300_s30 = smov 36  }
  0x1b   : > { %v350_v16 = vrot.slane %v1978_v7, 1  ;;  %v293_v17 = vshrl.u32 %v1980_v8, 16  ;;  %v295_v18 = vshll.u32 %v1980_v8, 16  ;;  %v2391_v20 = vld [vmem:[%s2362_s21 + $0x20] sm:$0xf]  ;;  %v279_v21 = vshrl.u32 %v1978_v7, 16 }
  0x1c   : > { %360 = vrot.lane.b32.xlu1 %v3830_v11, %s2292_s22  ;;  %v281_v22 = vshll.u32 %v1978_v7, 16  ;;  %v300_v23 = vshrl.u32 %v1981_v12, 16  ;;  %v302_v24 = vshll.u32 %v1981_v12, 16  ;;  %v179_v25 = vld [vmem:[%s2362_s21 + $0x24] sm:$0x1]  ;;  %v290_v27 = vrot.slane %v288_v13, 1 }
  0x1d   : > { %358 = vrot.lane.b32.xlu0 %v350_v16, %s2292_s22  ;;  %v297_v26 = vrot.slane %v295_v18, 1  ;;  %v1983_v28 = vcombine.low %v2386_v14, %v181_v15  ;;  %v1982_v29 = vcombine.low %v2391_v20, %v179_v25  ;;  %v2401_v30 = vld [vmem:[%s2362_s21 + $0x38] sm:$0xf]  ;;  %v185_v31 = vld [vmem:[%s2362_s21 + $0x3c] sm:$0x1]  ;;  %v2431_v58 = vrot.slane %v1981_v12, 1 }
  0x1e   : > { %v283_v32 = vrot.slane %v281_v22, 1  ;;  %v304_v33 = vrot.slane %v302_v24, 1  ;;  %v1985_v34 = vcombine.low %v2401_v30, %v185_v31  ;;  %v182_v35 = vld [vmem:[%s2362_s21 + $0x30] sm:$0xf]  ;;  %v183_v36 = vld [vmem:[%s2362_s21 + $0x34] sm:$0x1]  ;;  %v291_v46 = vor.u32 %v290_v27, %v286_v19 }
  0x1f   : > { %v2407_v37 = vor.u32 %v297_v26, %v293_v17  ;;  %v316_v38 = vshll.u32 %v1983_v28, 16  ;;  %v314_v40 = vshrl.u32 %v1983_v28, 16  ;;  %v309_v41 = vshll.u32 %v1982_v29, 16  ;;  %v2485_v7 = vld [vmem:[%s2362_s21 + $0x40] sm:$0xf]  ;;  %s2301_s3 = smov 40  }
  0x20   : > { %v284_v39 = vor.u32 %v283_v32, %v279_v21  ;;  %v2411_v42 = vor.u32 %v304_v33, %v300_v23  ;;  %v330_v44 = vshll.u32 %v1985_v34, 16  ;;  %v1984_v45 = vcombine.low %v182_v35, %v183_v36  ;;  %v2500_v10 = vld [vmem:[%s2362_s21 + $0x68] sm:$0xf]  ;;  %v1945_v12 = vld [vmem:[%s2362_s21 + $0x6c] sm:$0x1]  ;;  %s2302_s4 = smov 44  }
  0x21   : > { %338 = vrot.lane.b32.xlu1 %v2407_v37, %s2293_s23  ;;  %v318_v43 = vrot.slane %v316_v38, 1  ;;  %v307_v47 = vshrl.u32 %v1982_v29, 16  ;;  %v311_v48 = vrot.slane %v309_v41, 1  ;;  %v328_v51 = vshrl.u32 %v1985_v34, 16  ;;  %v2504_v13 = vld [vmem:[%s2362_s21 + $0x60] sm:$0xf] }
  0x22   : > { %334 = vrot.lane.b32.xlu0 %v284_v39, %s2293_s23  ;;  %v323_v49 = vshll.u32 %v1984_v45, 16  ;;  %v332_v52 = vrot.slane %v330_v44, 1  ;;  %v321_v54 = vshrl.u32 %v1984_v45, 16  ;;  %v2435_v59 = vrot.slane %v1980_v8, 1  ;;  %v2518_v17 = vld [vmem:[%s2362_s21 + $0x88] sm:$0xf] }
  0x23   : > { %v2416_v50 = vor.u32 %v318_v43, %v314_v40  ;;  %v2419_v53 = vor.u32 %v311_v48, %v307_v47  ;;  %v2439_v60 = vrot.slane %v1983_v28, 1  ;;  %v2443_v61 = vrot.slane %v1982_v29, 1  ;;  %v1953_v18 = vld [vmem:[%s2362_s21 + $0x8c] sm:$0x1]  ;;  %v2522_v19 = vld [vmem:[%s2362_s21 + $0x80] sm:$0xf] }
  0x24   : > { %v325_v55 = vrot.slane %v323_v49, 1  ;;  %v2423_v56 = vor.u32 %v332_v52, %v328_v51  ;;  %v2447_v62 = vrot.slane %v1985_v34, 1  ;;  %v2451_v63 = vrot.slane %v1984_v45, 1  ;;  %v2537_v25 = vld [vmem:[%s2362_s21 + $0x78] sm:$0xf]  ;;  %s2303_s5 = smov 48  }
  0x25   : > { %340 = vrot.lane.b32.xlu1 %v2411_v42, %s2293_s23  ;;  %v2467_v4 = vcombine.low %v2391_v20, %v2391_v20  ;;  %v2472_v5 = vcombine.low %v2379_v9, %v2379_v9  ;;  %v2476_v0 = vcombine.low %v182_v35, %v182_v35  ;;  %v2482_v6 = vcombine.low %v2386_v14, %v2386_v14  ;;  %v1943_v14 = vld [vmem:[%s2362_s21 + $0x64] sm:$0x1]  ;;  %v1949_v26 = vld [vmem:[%s2362_s21 + $0x7c] sm:$0x1]  ;;  %v2541_v27 = vld [vmem:[%s2362_s21 + $0x70] sm:$0xf] }
  0x26   : > { %336 = vrot.lane.b32.xlu0 %v291_v46, %s2293_s23  ;;  %v2427_v57 = vor.u32 %v325_v55, %v321_v54  ;;  %v2491_v8 = vcombine.low %v2485_v7, %v2485_v7  ;;  %v2497_v9 = vcombine.low %v2401_v30, %v2401_v30  ;;  %v2510_v15 = vcombine.low %v2500_v10, %v1945_v12  ;;  %v1951_v20 = vld [vmem:[%s2362_s21 + $0x84] sm:$0x1]  ;;  %v1947_v28 = vld [vmem:[%s2362_s21 + $0x74] sm:$0x1]  ;;  %v1956_v33 = vld [vmem:[%s2362_s21 + $0x98] sm:$0xf] }
  0x27   : > { %v2515_v16 = vcombine.low %v2504_v13, %v1943_v14  ;;  %v2529_v22 = vcombine.low %v2518_v17, %v1953_v18  ;;  %v2534_v24 = vcombine.low %v2522_v19, %v1951_v20  ;;  %v2549_v32 = vcombine.low %v2537_v25, %v1949_v26  ;;  %v1957_v39 = vld [vmem:[%s2362_s21 + $0x9c] sm:$0x1]  ;;  %v2561_v40 = vld [vmem:[%s2362_s21 + $0x90] sm:$0xf]  ;;  %v1955_v41 = vld [vmem:[%s2362_s21 + $0x94] sm:$0x1] }
  0x28   : > { %3864 = vst [vmem:[#allocation2_spill] sm:$0xff] %v2510_v15  ;;  %v593_v21 = vshll.u32 %v2510_v15, 16  ;;  %v591_v29 = vshrl.u32 %v2510_v15, 16  ;;  %v2557_v38 = vcombine.low %v2541_v27, %v1947_v28  ;;  %3870 = vst [vmem:[#allocation8_spill] sm:$0xff] %v2561_v40  ;;  %v2571_v48 = vcombine.low %v1956_v33, %v1957_v39  ;;  %v2582_v55 = vld [vmem:[%s2362_s21 + $0xa8] sm:$0xf] }
  0x29   : > { %344 = vrot.lane.b32.xlu1 %v2416_v50, %s2293_s23  ;;  %3865 = vst [vmem:[#allocation3_spill] sm:$0xff] %v2515_v16  ;;  %3866 = vst [vmem:[#allocation4_spill] sm:$0xff] %v2529_v22  ;;  %v586_v23 = vshll.u32 %v2515_v16, 16  ;;  %v621_v31 = vshll.u32 %v2529_v22, 16  ;;  %v584_v34 = vshrl.u32 %v2515_v16, 16  ;;  %v614_v36 = vshll.u32 %v2534_v24, 16 }
  0x2a   : > { %342 = vrot.lane.b32.xlu0 %v2419_v53, %s2293_s23  ;;  %3867 = vst [vmem:[#allocation5_spill] sm:$0xff] %v2534_v24  ;;  %v595_v30 = vrot.slane %v593_v21, 1  ;;  %3868 = vst [vmem:[#allocation6_spill] sm:$0xff] %v2549_v32  ;;  %v619_v43 = vshrl.u32 %v2529_v22, 16  ;;  %v612_v44 = vshrl.u32 %v2534_v24, 16  ;;  %v607_v47 = vshll.u32 %v2549_v32, 16 }
  0x2b   : > { %v588_v35 = vrot.slane %v586_v23, 1  ;;  %3869 = vst [vmem:[#allocation7_spill] sm:$0xff] %v2557_v38  ;;  %3871 = vst [vmem:[#allocation9_spill] sm:$0xff] %v2571_v48  ;;  %v616_v51 = vrot.slane %v614_v36, 1  ;;  %v600_v52 = vshll.u32 %v2557_v38, 16  ;;  %v2579_v54 = vcombine.low %v2561_v40, %v1955_v41  ;;  %s2304_s6 = smov 52  }
  0x2c   : > { %v2568_v45 = vor.u32 %v595_v30, %v591_v29  ;;  %v605_v12 = vshrl.u32 %v2549_v32, 16  ;;  %v598_v14 = vshrl.u32 %v2557_v38, 16  ;;  %v609_v20 = vrot.slane %v607_v47, 1  ;;  %v2597_v26 = vld [vmem:[%s2362_s21 + $0xc8] sm:$0xf]  ;;  %s2305_s7 = smov 56  }
  0x2d   : > { %348 = vrot.lane.b32.xlu1 %v2423_v56, %s2293_s23  ;;  %v2575_v49 = vor.u32 %v588_v35, %v584_v34  ;;  %3872 = vst [vmem:[#allocation10_spill] sm:$0xff] %v2579_v54  ;;  %v1015_v21 = vshll.u32 %v2571_v48, 16  ;;  %v2018_v23 = vcombine.low %v2582_v55, %v2582_v55  ;;  %v2601_v28 = vor.u32 %v616_v51, %v612_v44  ;;  %v2607_v33 = vld [vmem:[%s2362_s21 + $0xc0] sm:$0xf]  ;;  %v1972_v24 = vld [vmem:[%s2362_s21 + $0xd8] sm:$0xf] }
  0x2e   : > { %346 = vrot.lane.b32.xlu0 %v2427_v57, %s2293_s23  ;;  %v602_v29 = vrot.slane %v600_v52, 1  ;;  %v690_v30 = vshll.u32 %v2579_v54, 16  ;;  %v1013_v34 = vshrl.u32 %v2571_v48, 16  ;;  %v2022_v35 = vcombine.low %v2597_v26, %v2597_v26  ;;  %v2624_v52 = vld [vmem:[%s2362_s21 + $0xb8] sm:$0xf]  ;;  %p159_p6 = scmp.lt.s32.totalorder %s2274_s9, 3 }
  0x2f   : > { %3873 = vst [vmem:[#allocation11_spill] sm:$0xff] %v2601_v28  ;;  %v2614_v36 = vor.u32 %v609_v20, %v605_v12  ;;  %v1017_v39 = vrot.slane %v1015_v21, 1  ;;  %v688_v41 = vshrl.u32 %v2579_v54, 16  ;;  %v2021_v51 = vcombine.low %v2607_v33, %v2607_v33  ;;  %v2627_v12 = vld [vmem:[%s2362_s21 + $0xb0] sm:$0xf] }
  0x30   : > { %v2619_v44 = vor.u32 %v602_v29, %v598_v14  ;;  %v1070_v20 = vshll.u32 %v2018_v23, 16  ;;  %v1095_v21 = vshrl.u32 %v2022_v35, 16  ;;  %v2020_v29 = vcombine.low %v2624_v52, %v2624_v52  ;;  %v1970_v22 = vld [vmem:[%s2362_s21 + $0xd0] sm:$0xf]  ;;  %s4086_s9 = smov (!%p159_p6, %s2274_s9), 3 }
  0x31   : > { %364 = vrot.lane.b32.xlu1 %v2431_v58, %s2292_s22  ;;  %v1018_v11 = vor.u32 %v1017_v39, %v1013_v34  ;;  %v1088_v40 = vshrl.u32 %v2021_v51, 16  ;;  %v1098_v15 = vshll.u32 %v2022_v35, 16  ;;  %v1091_v34 = vshll.u32 %v2021_v51, 16 }
  0x32   : > { %362 = vrot.lane.b32.xlu0 %v2435_v59, %s2292_s22  ;;  %v1097_v16 = vrot.slane %v1095_v21, 7  ;;  %v1081_v39 = vshrl.u32 %v2020_v29, 16  ;;  %v2023_v38 = vcombine.low %v1970_v22, %v1970_v22  ;;  %v1084_v21 = vshll.u32 %v2020_v29, 16 }
  0x34   : > { %v2648_v32 = vor.u32 %v1098_v15, %v1097_v16  ;;  %v1083_v35 = vrot.slane %v1081_v39, 7 }
  0x35   : > { %368 = vrot.lane.b32.xlu1 %v2439_v60, %s2292_s22 }
  0x36   : > { %366 = vrot.lane.b32.xlu0 %v2443_v61, %s2292_s22 }
  0x39   : > { %372 = vrot.lane.b32.xlu1 %v2447_v62, %s2292_s22 }
  0x3a   : > { %370 = vrot.lane.b32.xlu0 %v2451_v63, %s2292_s22 }
  0x3d   : > { %386 = vrot.lane.b32.xlu1 %v2457_v1, %s2294_s24 }
  0x3e   : > { %384 = vrot.lane.b32.xlu0 %v1986_v2, %s2294_s24  ;;  %v2585_v2 = vld [vmem:[%s2362_s21 + $0xa0] sm:$0xf] }
  0x41   : > { %390 = vrot.lane.b32.xlu1 %v2467_v4, %s2294_s24 }
  0x42   : > { %388 = vrot.lane.b32.xlu0 %v2472_v5, %s2294_s24 }
  0x45   : > { %394 = vrot.lane.b32.xlu1 %v2476_v0, %s2294_s24 }
  0x46   : > { %392 = vrot.lane.b32.xlu0 %v2482_v6, %s2294_s24 }
  0x49   : > { %398 = vrot.lane.b32.xlu1 %v2491_v8, %s2294_s24 }
  0x4a   : > { %396 = vrot.lane.b32.xlu0 %v2497_v9, %s2294_s24 }
  0x4d   : > { %412 = vrot.lane.b32.xlu1 %v2407_v37, %s2295_s25 }
  0x4e   : > { %410 = vrot.lane.b32.xlu0 %v291_v46, %s2295_s25  ;;  %v623_v46 = vrot.slane %v621_v31, 1  ;;  %v2017_v31 = vcombine.low %v2585_v2, %v2585_v2 }
  0x50   : > { %v2591_v18 = vor.u32 %v623_v46, %v619_v43  ;;  %v1067_v43 = vshrl.u32 %v2018_v23, 16  ;;  %v692_v46 = vrot.slane %v690_v30, 1  ;;  %v1060_v47 = vshrl.u32 %v2017_v31, 16 }
  0x51   : > { %416 = vrot.lane.b32.xlu1 %v2419_v53, %s2295_s25  ;;  %v1063_v14 = vshll.u32 %v2017_v31, 16  ;;  %v2019_v23 = vcombine.low %v2627_v12, %v2627_v12 }
  0x52   : > { %414 = vrot.lane.b32.xlu0 %v2411_v42, %s2295_s25  ;;  %v1069_v54 = vrot.slane %v1067_v43, 7  ;;  %v2635_v30 = vor.u32 %v692_v46, %v688_v41  ;;  %v1062_v48 = vrot.slane %v1060_v47, 7  ;;  %v2024_v43 = vcombine.low %v1972_v24, %v1972_v24 }
  0x53   : > { %v1090_v46 = vrot.slane %v1088_v40, 7  ;;  %v1074_v47 = vshrl.u32 %v2019_v23, 16  ;;  %v2655_v40 = vor.u32 %v1084_v21, %v1083_v35  ;;  %v1967_v35 = vld [vmem:[%s2362_s21 + $0xc4] sm:$0x1] }
  0x54   : > { %3874 = vst [vmem:[#allocation12_spill] sm:$0xff] %v2635_v30  ;;  %v2642_v31 = vor.u32 %v1070_v20, %v1069_v54  ;;  %v1065_v41 = vor.u32 %v1063_v14, %v1062_v48  ;;  %v1077_v20 = vshll.u32 %v2019_v23, 16  ;;  %v1102_v48 = vshrl.u32 %v2023_v38, 16 }
  0x55   : > { %420 = vrot.lane.b32.xlu1 %v2427_v57, %s2295_s25  ;;  %v2651_v54 = vor.u32 %v1091_v34, %v1090_v46  ;;  %v1076_v51 = vrot.slane %v1074_v47, 7  ;;  %v1112_v16 = vshll.u32 %v2024_v43, 16  ;;  %v1105_v34 = vshll.u32 %v2023_v38, 16  ;;  %v1969_v46 = vld [vmem:[%s2362_s21 + $0xcc] sm:$0x1] }
  0x56   : > { %418 = vrot.lane.b32.xlu0 %v2416_v50, %s2295_s25  ;;  %v1104_v29 = vrot.slane %v1102_v48, 7  ;;  %v2682_v21 = vcombine.low %v2597_v26, %v1969_v46  ;;  %v1973_v48 = vld [vmem:[%s2362_s21 + $0xdc] sm:$0x1] }
  0x57   : > { %v2659_v14 = vor.u32 %v1077_v20, %v1076_v51  ;;  %v1965_v51 = vld [vmem:[%s2362_s21 + $0xbc] sm:$0x1] }
  0x58   : > { %v2667_v39 = vor.u32 %v1105_v34, %v1104_v29  ;;  %v2693_v20 = vcombine.low %v2624_v52, %v1965_v51  ;;  %v1209_v34 = vshll.u32 %v2682_v21, 16 }
  0x59   : > { %1021 = vrot.lane.b32.xlu1 %v2568_v45, %s2293_s23 }
  0x5a   : > { %1019 = vrot.lane.b32.xlu0 %v2575_v49, %s2293_s23  ;;  %v1211_v51 = vrot.slane %v1209_v34, 1 }
  0x5d   : > { %1029 = vrot.lane.b32.xlu1 %v2591_v18, %s2293_s23 }
  0x5e   : > { %1027 = vrot.lane.b32.xlu0 %v2601_v28, %s2293_s23 }
  0x61   : > { %1025 = vrot.lane.b32.xlu1 %v2614_v36, %s2293_s23 }
  0x62   : > { %1023 = vrot.lane.b32.xlu0 %v2619_v44, %s2293_s23 }
  0x65   : > { %1033 = vrot.lane.b32.xlu1 %v1018_v11, %s2293_s23  ;;  %v1109_v11 = vshrl.u32 %v2024_v43, 16  ;;  %v1961_v43 = vld [vmem:[%s2362_s21 + $0xac] sm:$0x1] }
  0x66   : > { %1031 = vrot.lane.b32.xlu0 %v2635_v30, %s2293_s23  ;;  %v2674_v38 = vcombine.low %v2582_v55, %v1961_v43  ;;  %v1963_v55 = vld [vmem:[%s2362_s21 + $0xb4] sm:$0x1] }
  0x67   : > { %v1111_v15 = vrot.slane %v1109_v11, 7  ;;  %v2687_v11 = vcombine.low %v2607_v33, %v1967_v35  ;;  %v2699_v26 = vcombine.low %v2627_v12, %v1963_v55  ;;  %v1207_v35 = vshrl.u32 %v2682_v21, 16 }
  0x68   : > { %v1179_v52 = vshrl.u32 %v2674_v38, 16  ;;  %v1195_v55 = vshll.u32 %v2693_v20, 16 }
  0x69   : > { %1117 = vrot.lane.b32.xlu1 %v2642_v31, %s2292_s22  ;;  %v2663_v23 = vor.u32 %v1112_v16, %v1111_v15  ;;  %v1971_v15 = vld [vmem:[%s2362_s21 + $0xd4] sm:$0x1]  ;;  %v2705_v16 = vcombine.low %v1972_v24, %v1973_v48  ;;  %v1202_v46 = vshll.u32 %v2687_v11, 16  ;;  %v1188_v48 = vshll.u32 %v2699_v26, 16 }
  0x6a   : > { %1115 = vrot.lane.b32.xlu0 %v1065_v41, %s2292_s22  ;;  %v1959_v41 = vld [vmem:[%s2362_s21 + $0xa4] sm:$0x1]  ;;  %v2711_v43 = vcombine.low %v1970_v22, %v1971_v15  ;;  %v1193_v15 = vshrl.u32 %v2693_v20, 16 }
  0x6b   : > { %v2025_v47 = vcombine.low %v2585_v2, %v1959_v41  ;;  %v1181_v2 = vshll.u32 %v2674_v38, 16 }
  0x6d   : > { %1125 = vrot.lane.b32.xlu1 %v2648_v32, %s2292_s22  ;;  %v1174_v33 = vshll.u32 %v2025_v47, 16  ;;  %v1183_v29 = vrot.slane %v1181_v2, 1  ;;  %v1172_v12 = vshrl.u32 %v2025_v47, 16  ;;  %v1200_v2 = vshrl.u32 %v2687_v11, 16 }
  0x6e   : > { %1123 = vrot.lane.b32.xlu0 %v2651_v54, %s2292_s22 }
  0x6f   : > { %v1176_v41 = vrot.slane %v1174_v33, 1  ;;  %v2718_v24 = vor.u32 %v1183_v29, %v1179_v52  ;;  %v2728_v33 = vor.u32 %v1211_v51, %v1207_v35  ;;  %v1197_v52 = vrot.slane %v1195_v55, 1 }
  0x70   : > { %v1223_v29 = vshll.u32 %v2705_v16, 16  ;;  %v1221_v51 = vshrl.u32 %v2705_v16, 16 }
  0x71   : > { %1121 = vrot.lane.b32.xlu1 %v2655_v40, %s2292_s22  ;;  %v1177_v22 = vor.u32 %v1176_v41, %v1172_v12  ;;  %v1186_v12 = vshrl.u32 %v2699_v26, 16  ;;  %v1190_v41 = vrot.slane %v1188_v48, 1  ;;  %v2739_v35 = vor.u32 %v1197_v52, %v1193_v15 }
  0x72   : > { %1119 = vrot.lane.b32.xlu0 %v2659_v14, %s2292_s22  ;;  %v1225_v55 = vrot.slane %v1223_v29, 1  ;;  %v1974_v29 = vld [vmem:[%s2362_s21 + $0xe0] sm:$0xf] }
  0x74   : > { %v2753_v15 = vor.u32 %v1225_v55, %v1221_v51 }
  0x75   : > { %1129 = vrot.lane.b32.xlu1 %v2663_v23, %s2292_s22 }
  0x76   : > { %1127 = vrot.lane.b32.xlu0 %v2667_v39, %s2292_s22 }
  0x79   : > { %1157 = vrot.lane.b32.xlu1 %v2674_v38, %s2294_s24 }
  0x7a   : > { %1155 = vrot.lane.b32.xlu0 %v2025_v47, %s2294_s24  ;;  %v1204_v47 = vrot.slane %v1202_v46, 1  ;;  %v1216_v46 = vshll.u32 %v2711_v43, 16 }
  0x7c   : > { %v2733_v34 = vor.u32 %v1204_v47, %v1200_v2  ;;  %v2746_v2 = vor.u32 %v1190_v41, %v1186_v12  ;;  %v1214_v47 = vshrl.u32 %v2711_v43, 16  ;;  %v1218_v48 = vrot.slane %v1216_v46, 1 }
  0x7d   : > { %1165 = vrot.lane.b32.xlu1 %v2682_v21, %s2294_s24  ;;  %v2033_v41 = vcombine.low %v1974_v29, %v1974_v29 }
  0x7e   : > { %1163 = vrot.lane.b32.xlu0 %v2687_v11, %s2294_s24  ;;  %v2757_v52 = vor.u32 %v1218_v48, %v1214_v47 }
  0x7f   : > { %v1247_v55 = vshrl.u32 %v2033_v41, 16 }
  0x81   : > { %1161 = vrot.lane.b32.xlu1 %v2693_v20, %s2294_s24 }
  0x82   : > { %1159 = vrot.lane.b32.xlu0 %v2699_v26, %s2294_s24 }
  0x85   : > { %1169 = vrot.lane.b32.xlu1 %v2705_v16, %s2294_s24 }
  0x86   : > { %1167 = vrot.lane.b32.xlu0 %v2711_v43, %s2294_s24  ;;  %s2306_s24 = smov 60  }
  0x89   : > { %1229 = vrot.lane.b32.xlu1 %v2718_v24, %s2295_s25 }
  0x8a   : > { %1227 = vrot.lane.b32.xlu0 %v1177_v22, %s2295_s25 }
  0x8d   : > { %1237 = vrot.lane.b32.xlu1 %v2728_v33, %s2295_s25 }
  0x8e   : > { %1235 = vrot.lane.b32.xlu0 %v2733_v34, %s2295_s25  ;;  %v2744_v22 = vpop.permute.xlu1 %360 }
  0x8f   : > { %3875 = vst [vmem:[#allocation13_spill] sm:$0xff] %v2744_v22  ;;  %v2749_v30 = vpop.permute.xlu0 %358 }
  0x90   : > { %3876 = vst [vmem:[#allocation14_spill] sm:$0xff] %v2749_v30  ;;  %v1250_v30 = vshll.u32 %v2033_v41, 16 }
  0x91   : > { %1233 = vrot.lane.b32.xlu1 %v2739_v35, %s2295_s25 }
  0x92   : > { %1231 = vrot.lane.b32.xlu0 %v2746_v2, %s2295_s25 }
  0x93   : > { %v2760_v28 = vpop.permute.xlu1 %338 }
  0x94   : > { %3877 = vst [vmem:[#allocation15_spill] sm:$0xff] %v2760_v28  ;;  %v2762_v12 = vpop.permute.xlu0 %334  ;;  %v1249_v28 = vrot.slane %v1247_v55, 7 }
  0x95   : > { %3878 = vst [vmem:[#allocation16_spill] sm:$0xff] %v2762_v12  ;;  %1241 = vrot.lane.b32.xlu1 %v2753_v15, %s2295_s25 }
  0x96   : > { %1239 = vrot.lane.b32.xlu0 %v2757_v52, %s2295_s25 }
  0x97   : > { %v2768_v46 = vpop.permute.xlu1 %340 }
  0x98   : > { %3879 = vst [vmem:[#allocation17_spill] sm:$0xff] %v2768_v46  ;;  %v2770_v51 = vpop.permute.xlu0 %336 }
  0x99   : > { %1255 = vrot.lane.b32.xlu1 %v2659_v14, %s2296_s26 }
  0x9a   : > { %1253 = vrot.lane.b32.xlu0 %v2642_v31, %s2296_s26  ;;  %v2790_v31 = vor.u32 %v1250_v30, %v1249_v28 }
  0x9b   : > { %v2776_v47 = vpop.permute.xlu1 %344 }
  0x9c   : > { %3880 = vst [vmem:[#allocation18_spill] sm:$0xff] %v2776_v47  ;;  %v2778_v48 = vpop.permute.xlu0 %342 }
  0x9d   : > { %3881 = vst [vmem:[#allocation19_spill] sm:$0xff] %v2778_v48  ;;  %1263 = vrot.lane.b32.xlu1 %v2667_v39, %s2296_s26 }
  0x9e   : > { %1261 = vrot.lane.b32.xlu0 %v2648_v32, %s2296_s26 }
  0x9f   : > { %v2784_v46 = vpop.permute.xlu1 %348 }
  0xa0   : > { %v2786_v22 = vpop.permute.xlu0 %346 }
  0xa1   : > { %3882 = vst [vmem:[#allocation20_spill] sm:$0xff] %v2786_v22  ;;  %1259 = vrot.lane.b32.xlu1 %v2651_v54, %s2296_s26 }
  0xa2   : > { %1257 = vrot.lane.b32.xlu0 %v2655_v40, %s2296_s26 }
  0xa3   : > { %v2794_v48 = vpop.permute.xlu1 %364 }
  0xa4   : > { %3883 = vst [vmem:[#allocation21_spill] sm:$0xff] %v2794_v48  ;;  %v2796_v55 = vpop.permute.xlu0 %362 }
  0xa5   : > { %3884 = vst [vmem:[#allocation22_spill] sm:$0xff] %v2796_v55  ;;  %1267 = vrot.lane.b32.xlu1 %v2790_v31, %s2296_s26  ;;  %v1975_v55 = vld [vmem:[%s2362_s21 + $0xe4] sm:$0x1] }
  0xa6   : > { %1265 = vrot.lane.b32.xlu0 %v2663_v23, %s2296_s26 }
  0xa7   : > { %v2802_v41 = vpop.permute.xlu1 %368 }
  0xa8   : > { %3885 = vst [vmem:[#allocation23_spill] sm:$0xff] %v2802_v41  ;;  %v2804_v47 = vpop.permute.xlu0 %366  ;;  %v2825_v41 = vcombine.low %v1974_v29, %v1975_v55 }
  0xa9   : > { %3886 = vst [vmem:[#allocation24_spill] sm:$0xff] %v2804_v47  ;;  %1274 = vrot.lane.b32.xlu1 %v2699_v26, %s2297_s27 }
  0xaa   : > { %1272 = vrot.lane.b32.xlu0 %v2674_v38, %s2297_s27  ;;  %v1291_v29 = vshll.u32 %v2825_v41, 16 }
  0xab   : > { %v2810_v28 = vpop.permute.xlu1 %372 }
  0xac   : > { %3887 = vst [vmem:[#allocation25_spill] sm:$0xff] %v2810_v28  ;;  %v2812_v30 = vpop.permute.xlu0 %370 }
  0xad   : > { %3888 = vst [vmem:[#allocation26_spill] sm:$0xff] %v2812_v30  ;;  %1282 = vrot.lane.b32.xlu1 %v2711_v43, %s2297_s27 }
  0xae   : > { %1280 = vrot.lane.b32.xlu0 %v2682_v21, %s2297_s27 }
  0xaf   : > { %v2819_v48 = vpop.permute.xlu1 %386 }
  0xb0   : > { %3889 = vst [vmem:[#allocation27_spill] sm:$0xff] %v2819_v48  ;;  %v2821_v47 = vpop.permute.xlu0 %384 }
  0xb1   : > { %3890 = vst [vmem:[#allocation28_spill] sm:$0xff] %v2821_v47  ;;  %1278 = vrot.lane.b32.xlu1 %v2687_v11, %s2297_s27 }
  0xb2   : > { %1276 = vrot.lane.b32.xlu0 %v2693_v20, %s2297_s27 }
  0xb3   : > { %v2829_v38 = vpop.permute.xlu1 %390 }
  0xb4   : > { %3891 = vst [vmem:[#allocation29_spill] sm:$0xff] %v2829_v38  ;;  %v2831_v30 = vpop.permute.xlu0 %388  ;;  %v1289_v38 = vshrl.u32 %v2825_v41, 16 }
  0xb5   : > { %3892 = vst [vmem:[#allocation30_spill] sm:$0xff] %v2831_v30  ;;  %1286 = vrot.lane.b32.xlu1 %v2825_v41, %s2297_s27 }
  0xb6   : > { %1284 = vrot.lane.b32.xlu0 %v2705_v16, %s2297_s27 }
  0xb7   : > { %v2837_v48 = vpop.permute.xlu1 %394 }
  0xb8   : > { %3893 = vst [vmem:[#allocation31_spill] sm:$0xff] %v2837_v48  ;;  %v2839_v47 = vpop.permute.xlu0 %392 }
  0xb9   : > { %3894 = vst [vmem:[#allocation32_spill] sm:$0xff] %v2839_v47  ;;  %1297 = vrot.lane.b32.xlu1 %v2746_v2, %s2298_s28  ;;  %v1293_v47 = vrot.slane %v1291_v29, 1 }
  0xba   : > { %1295 = vrot.lane.b32.xlu0 %v2718_v24, %s2298_s28 }
  0xbb   : > { %v2846_v55 = vpop.permute.xlu1 %398  ;;  %v2861_v24 = vor.u32 %v1293_v47, %v1289_v38 }
  0xbc   : > { %3895 = vst [vmem:[#allocation33_spill] sm:$0xff] %v2846_v55  ;;  %v2848_v30 = vpop.permute.xlu0 %396 }
  0xbd   : > { %3896 = vst [vmem:[#allocation34_spill] sm:$0xff] %v2848_v30  ;;  %1305 = vrot.lane.b32.xlu1 %v2757_v52, %s2298_s28  ;;  %v1976_v30 = vld [vmem:[%s2362_s21 + $0xe8] sm:$0xf] }
  0xbe   : > { %1303 = vrot.lane.b32.xlu0 %v2728_v33, %s2298_s28  ;;  %v2035_v29 = vcombine.low %v1976_v30, %v1976_v30 }
  0xbf   : > { %v2855_v48 = vpop.permute.xlu1 %412 }
  0xc0   : > { %3897 = vst [vmem:[#allocation35_spill] sm:$0xff] %v2855_v48  ;;  %v2857_v12 = vpop.permute.xlu0 %410  ;;  %v1315_v47 = vshrl.u32 %v2035_v29, 16  ;;  %v1318_v22 = vshll.u32 %v2035_v29, 16 }
  0xc1   : > { %3898 = vst [vmem:[#allocation36_spill] sm:$0xff] %v2857_v12  ;;  %1301 = vrot.lane.b32.xlu1 %v2733_v34, %s2298_s28 }
  0xc2   : > { %1299 = vrot.lane.b32.xlu0 %v2739_v35, %s2298_s28 }
  0xc3   : > { %v2866_v55 = vpop.permute.xlu1 %416 }
  0xc4   : > { %3899 = vst [vmem:[#allocation37_spill] sm:$0xff] %v2866_v55  ;;  %v2868_v28 = vpop.permute.xlu0 %414  ;;  %v1317_v55 = vrot.slane %v1315_v47, 7 }
  0xc5   : > { %3900 = vst [vmem:[#allocation38_spill] sm:$0xff] %v2868_v28  ;;  %1309 = vrot.lane.b32.xlu1 %v2861_v24, %s2298_s28 }
  0xc6   : > { %1307 = vrot.lane.b32.xlu0 %v2753_v15, %s2298_s28 }
  0xc7   : > { %v2874_v12 = vpop.permute.xlu1 %420 }
  0xc8   : > { %3901 = vst [vmem:[#allocation39_spill] sm:$0xff] %v2874_v12  ;;  %v2876_v48 = vpop.permute.xlu0 %418 }
  0xc9   : > { %3902 = vst [vmem:[#allocation40_spill] sm:$0xff] %v2876_v48  ;;  %1323 = vrot.lane.b32.xlu1 %v2655_v40, %s2299_s29  ;;  %v1320_v40 = vor.u32 %v1318_v22, %v1317_v55  ;;  %v1977_v22 = vld [vmem:[%s2362_s21 + $0xec] sm:$0x1] }
  0xca   : > { %1321 = vrot.lane.b32.xlu0 %v2659_v14, %s2299_s29 }
  0xcb   : > { %v2882_v38 = vpop.permute.xlu1 %1021 }
  0xcc   : > { %v2884_v28 = vpop.permute.xlu0 %1019 }
  0xcd   : > { %1331 = vrot.lane.b32.xlu1 %v2663_v23, %s2299_s29 }
  0xce   : > { %1329 = vrot.lane.b32.xlu0 %v2667_v39, %s2299_s29 }
  0xcf   : > { %v2890_v48 = vpop.permute.xlu1 %1029 }
  0xd0   : > { %v2892_v12 = vpop.permute.xlu0 %1027 }
  0xd1   : > { %1327 = vrot.lane.b32.xlu1 %v2648_v32, %s2299_s29 }
  0xd2   : > { %1325 = vrot.lane.b32.xlu0 %v2651_v54, %s2299_s29 }
  0xd3   : > { %v2898_v14 = vpop.permute.xlu1 %1025 }
  0xd4   : > { %v2900_v23 = vpop.permute.xlu0 %1023 }
  0xd5   : > { %1335 = vrot.lane.b32.xlu1 %v1320_v40, %s2299_s29 }
  0xd6   : > { %1333 = vrot.lane.b32.xlu0 %v2790_v31, %s2299_s29 }
  0xd7   : > { %v2905_v39 = vpop.permute.xlu1 %1033 }
  0xd8   : > { %v2907_v29 = vpop.permute.xlu0 %1031 }
  0xd9   : > { %1342 = vrot.lane.b32.xlu1 %v2693_v20, %s2300_s30  ;;  %v2036_v20 = vcombine.low %v1976_v30, %v1977_v22 }
  0xda   : > { %1340 = vrot.lane.b32.xlu0 %v2699_v26, %s2300_s30 }
  0xdb   : > { %v2913_v32 = vpop.permute.xlu1 %1117 }
  0xdc   : > { %v2915_v54 = vpop.permute.xlu0 %1115 }
  0xdd   : > { %1350 = vrot.lane.b32.xlu1 %v2705_v16, %s2300_s30  ;;  %v187_v16 = vld [vmem:[%s2362_s21 + $0x44] sm:$0x1] }
  0xde   : > { %1348 = vrot.lane.b32.xlu0 %v2711_v43, %s2300_s30 }
  0xdf   : > { %v2922_v31 = vpop.permute.xlu1 %1125 }
  0xe0   : > { %v2924_v55 = vpop.permute.xlu0 %1123 }
  0xe1   : > { %1346 = vrot.lane.b32.xlu1 %v2682_v21, %s2300_s30  ;;  %v2943_v21 = vcombine.low %v2485_v7, %v187_v16 }
  0xe2   : > { %1344 = vrot.lane.b32.xlu0 %v2687_v11, %s2300_s30  ;;  %v1359_v11 = vshll.u32 %v2036_v20, 16 }
  0xe3   : > { %v2930_v26 = vpop.permute.xlu1 %1121  ;;  %v406_v7 = vshll.u32 %v2943_v21, 16 }
  0xe4   : > { %v2932_v47 = vpop.permute.xlu0 %1119 }
  0xe5   : > { %1354 = vrot.lane.b32.xlu1 %v2036_v20, %s2300_s30 }
  0xe6   : > { %1352 = vrot.lane.b32.xlu0 %v2825_v41, %s2300_s30  ;;  %v1357_v41 = vshrl.u32 %v2036_v20, 16 }
  0xe7   : > { %v2938_v43 = vpop.permute.xlu1 %1129 }
  0xe8   : > { %v2940_v40 = vpop.permute.xlu0 %1127 }
  0xe9   : > { %3903 = vst [vmem:[#allocation41_spill] sm:$0xff] %v2940_v40  ;;  %1365 = vrot.lane.b32.xlu1 %v2739_v35, %s2301_s3  ;;  %v1361_v40 = vrot.slane %v1359_v11, 1 }
  0xea   : > { %1363 = vrot.lane.b32.xlu0 %v2746_v2, %s2301_s3 }
  0xeb   : > { %v2949_v30 = vpop.permute.xlu1 %1157  ;;  %v1362_v2 = vor.u32 %v1361_v40, %v1357_v41 }
  0xec   : > { %3904 = vst [vmem:[#allocation42_spill] sm:$0xff] %v2949_v30  ;;  %v2951_v22 = vpop.permute.xlu0 %1155  ;;  %v408_v30 = vrot.slane %v406_v7, 1 }
  0xed   : > { %3905 = vst [vmem:[#allocation43_spill] sm:$0xff] %v2951_v22  ;;  %1373 = vrot.lane.b32.xlu1 %v2753_v15, %s2301_s3  ;;  %v404_v22 = vshrl.u32 %v2943_v21, 16 }
  0xee   : > { %1371 = vrot.lane.b32.xlu0 %v2757_v52, %s2301_s3 }
  0xef   : > { %v2958_v16 = vpop.permute.xlu1 %1165  ;;  %v409_v52 = vor.u32 %v408_v30, %v404_v22  ;;  %v3906_v30 = vrot.slane %v2370_v3, 1  ;;  %v3850_v3 = vrot.slane %v2943_v21, 1 }
  0xf0   : > { %v2960_v35 = vpop.permute.xlu0 %1163 }
  0xf1   : > { %1369 = vrot.lane.b32.xlu1 %v2728_v33, %s2301_s3 }
  0xf2   : > { %1367 = vrot.lane.b32.xlu0 %v2733_v34, %s2301_s3 }
  0xf3   : > { %v2967_v15 = vpop.permute.xlu1 %1161 }
  0xf4   : > { %v2969_v20 = vpop.permute.xlu0 %1159 }
  0xf5   : > { %1377 = vrot.lane.b32.xlu1 %v1362_v2, %s2301_s3 }
  0xf6   : > { %1375 = vrot.lane.b32.xlu0 %v2861_v24, %s2301_s3 }
  0xf7   : > { %v2974_v11 = vpop.permute.xlu1 %1169 }
  0xf8   : > { %v2976_v33 = vpop.permute.xlu0 %1167 }
  0xf9   : > { %424 = vrot.lane.b32.xlu1 %v409_v52, %s2295_s25 }
  0xfa   : > { %422 = vrot.lane.b32.xlu0 %v2423_v56, %s2295_s25 }
  0xfb   : > { %v2981_v34 = vpop.permute.xlu1 %1229 }
  0xfc   : > { %v2983_v40 = vpop.permute.xlu0 %1227 }
  0xfd   : > { %429 = vrot.lane.b32.xlu1 %v2435_v59, %s2296_s26 }
  0xfe   : > { %427 = vrot.lane.b32.xlu0 %v3906_v30, %s2296_s26 }
  0xff   : > { %v2990_v24 = vpop.permute.xlu1 %1237 }
 0x100   : > { %v2992_v22 = vpop.permute.xlu0 %1235 }
 0x101   : > { %437 = vrot.lane.b32.xlu1 %v2451_v63, %s2296_s26 }
 0x102   : > { %435 = vrot.lane.b32.xlu0 %v2439_v60, %s2296_s26 }
 0x103   : > { %v2998_v41 = vpop.permute.xlu1 %1233 }
 0x104   : > { %3907 = vst [vmem:[#allocation44_spill] sm:$0xff] %v2998_v41  ;;  %v3000_v7 = vpop.permute.xlu0 %1231 }
 0x105   : > { %3908 = vst [vmem:[#allocation45_spill] sm:$0xff] %v3000_v7  ;;  %433 = vrot.lane.b32.xlu1 %v2443_v61, %s2296_s26 }
 0x106   : > { %431 = vrot.lane.b32.xlu0 %v2431_v58, %s2296_s26 }
 0x107   : > { %v3007_v2 = vpop.permute.xlu1 %1241 }
 0x108   : > { %3909 = vst [vmem:[#allocation46_spill] sm:$0xff] %v3007_v2  ;;  %v3009_v30 = vpop.permute.xlu0 %1239 }
 0x109   : > { %3910 = vst [vmem:[#allocation47_spill] sm:$0xff] %v3009_v30  ;;  %441 = vrot.lane.b32.xlu1 %v3850_v3, %s2296_s26  ;;  %v188_v3 = vld [vmem:[%s2362_s21 + $0x48] sm:$0xf] }
 0x10a   : > { %439 = vrot.lane.b32.xlu0 %v2447_v62, %s2296_s26 }
 0x10b   : > { %v3016_v7 = vpop.permute.xlu1 %1255 }
 0x10c   : > { %3911 = vst [vmem:[#allocation48_spill] sm:$0xff] %v3016_v7  ;;  %v3018_v41 = vpop.permute.xlu0 %1253 }
 0x10d   : > { %3912 = vst [vmem:[#allocation49_spill] sm:$0xff] %v3018_v41  ;;  %448 = vrot.lane.b32.xlu1 %v2472_v5, %s2297_s27  ;;  %v1995_v5 = vcombine.low %v188_v3, %v188_v3 }
 0x10e   : > { %446 = vrot.lane.b32.xlu0 %v2457_v1, %s2297_s27  ;;  %v189_v1 = vld [vmem:[%s2362_s21 + $0x4c] sm:$0x1] }
 0x10f   : > { %v3024_v2 = vpop.permute.xlu1 %1263 }
 0x110   : > { %3913 = vst [vmem:[#allocation50_spill] sm:$0xff] %v3024_v2  ;;  %v3026_v30 = vpop.permute.xlu0 %1261 }
 0x111   : > { %3914 = vst [vmem:[#allocation51_spill] sm:$0xff] %v3026_v30  ;;  %456 = vrot.lane.b32.xlu1 %v2497_v9, %s2297_s27  ;;  %v1996_v9 = vcombine.low %v188_v3, %v189_v1 }
 0x112   : > { %454 = vrot.lane.b32.xlu0 %v2476_v0, %s2297_s27 }
 0x113   : > { %v3033_v7 = vpop.permute.xlu1 %1259  ;;  %v466_v3 = vshrl.u32 %v1996_v9, 16 }
 0x114   : > { %3915 = vst [vmem:[#allocation52_spill] sm:$0xff] %v3033_v7  ;;  %v3035_v41 = vpop.permute.xlu0 %1257  ;;  %v3978_v7 = vld [vmem:[#allocation33_spill] sm:$0xff] }
 0x115   : > { %3916 = vst [vmem:[#allocation53_spill] sm:$0xff] %v3035_v41  ;;  %452 = vrot.lane.b32.xlu1 %v2482_v6, %s2297_s27  ;;  %v468_v6 = vshll.u32 %v1996_v9, 16 }
 0x116   : > { %450 = vrot.lane.b32.xlu0 %v2467_v4, %s2297_s27 }
 0x117   : > { %v3042_v30 = vpop.permute.xlu1 %1267 }
 0x118   : > { %3917 = vst [vmem:[#allocation54_spill] sm:$0xff] %v3042_v30  ;;  %v3044_v2 = vpop.permute.xlu0 %1265 }
 0x119   : > { %3918 = vst [vmem:[#allocation55_spill] sm:$0xff] %v3044_v2  ;;  %460 = vrot.lane.b32.xlu1 %v1995_v5, %s2297_s27 }
 0x11a   : > { %458 = vrot.lane.b32.xlu0 %v2491_v8, %s2297_s27  ;;  %v470_v8 = vrot.slane %v468_v6, 1 }
 0x11b   : > { %v3049_v0 = vpop.permute.xlu1 %1274 }
 0x11c   : > { %3919 = vst [vmem:[#allocation56_spill] sm:$0xff] %v3049_v0  ;;  %v3051_v41 = vpop.permute.xlu0 %1272  ;;  %v3976_v0 = vld [vmem:[#allocation16_spill] sm:$0xff] }
 0x11d   : > { %3920 = vst [vmem:[#allocation57_spill] sm:$0xff] %v3051_v41  ;;  %474 = vrot.lane.b32.xlu1 %v2411_v42, %s2298_s28  ;;  %v2246_v41 = vld [vmem:[%s2362_s21] sm:$0xf] }
 0x11e   : > { %472 = vrot.lane.b32.xlu0 %v2407_v37, %s2298_s28  ;;  %v471_v37 = vor.u32 %v470_v8, %v466_v3  ;;  %v1938_v8 = vld [vmem:[%s2362_s21 + $0x50] sm:$0xf] }
 0x11f   : > { %v3057_v4 = vpop.permute.xlu1 %1282 }
 0x120   : > { %3921 = vst [vmem:[#allocation58_spill] sm:$0xff] %v3057_v4  ;;  %v3059_v2 = vpop.permute.xlu0 %1280  ;;  %v3975_v4 = vld [vmem:[#allocation25_spill] sm:$0xff] }
 0x121   : > { %3922 = vst [vmem:[#allocation59_spill] sm:$0xff] %v3059_v2  ;;  %482 = vrot.lane.b32.xlu1 %v2423_v56, %s2298_s28 }
 0x122   : > { %480 = vrot.lane.b32.xlu0 %v2427_v57, %s2298_s28 }
 0x123   : > { %v3065_v5 = vpop.permute.xlu1 %1278 }
 0x124   : > { %3923 = vst [vmem:[#allocation60_spill] sm:$0xff] %v3065_v5  ;;  %v3067_v1 = vpop.permute.xlu0 %1276  ;;  %v3974_v5 = vld [vmem:[#allocation20_spill] sm:$0xff] }
 0x125   : > { %3924 = vst [vmem:[#allocation61_spill] sm:$0xff] %v3067_v1  ;;  %478 = vrot.lane.b32.xlu1 %v2416_v50, %s2298_s28  ;;  %v2245_v1 = vld [vmem:[%s2362_s21 + $0x30] sm:$0xf] }
 0x126   : > { %476 = vrot.lane.b32.xlu0 %v2419_v53, %s2298_s28 }
 0x127   : > { %v3073_v42 = vpop.permute.xlu1 %1286 }
 0x128   : > { %3925 = vst [vmem:[#allocation62_spill] sm:$0xff] %v3073_v42  ;;  %v3075_v2 = vpop.permute.xlu0 %1284 }
 0x129   : > { %3926 = vst [vmem:[#allocation63_spill] sm:$0xff] %v3075_v2  ;;  %486 = vrot.lane.b32.xlu1 %v471_v37, %s2298_s28  ;;  %v3935_v37 = vrot.slane %v2943_v21, 1  ;;  %v3132_v21 = vcombine.low %v2541_v27, %v2541_v27  ;;  %v3149_v27 = vcombine.low %v2504_v13, %v2504_v13  ;;  %v3166_v13 = vcombine.low %v2522_v19, %v2522_v19 }
 0x12a   : > { %484 = vrot.lane.b32.xlu0 %v409_v52, %s2298_s28 }
 0x12b   : > { %v3079_v56 = vpop.permute.xlu1 %1297  ;;  %3939 = vst [vmem:[#allocation75_spill] sm:$0xff] %v3132_v21  ;;  %3943 = vst [vmem:[#allocation79_spill] sm:$0xff] %v3149_v27 }
 0x12c   : > { %3927 = vst [vmem:[#allocation64_spill] sm:$0xff] %v3079_v56  ;;  %v3081_v57 = vpop.permute.xlu0 %1295  ;;  %3946 = vst [vmem:[#allocation82_spill] sm:$0xff] %v3166_v13 }
 0x12d   : > { %3928 = vst [vmem:[#allocation65_spill] sm:$0xff] %v3081_v57  ;;  %491 = vrot.lane.b32.xlu1 %v2431_v58, %s2299_s29  ;;  %v488_v58 = vrot.slane %v1996_v9, 1 }
 0x12e   : > { %489 = vrot.lane.b32.xlu0 %v2435_v59, %s2299_s29  ;;  %v1940_v59 = vld [vmem:[%s2362_s21 + $0x58] sm:$0xf] }
 0x12f   : > { %v3087_v50 = vpop.permute.xlu1 %1305 }
 0x130   : > { %3929 = vst [vmem:[#allocation66_spill] sm:$0xff] %v3087_v50  ;;  %v3089_v53 = vpop.permute.xlu0 %1303 }
 0x131   : > { %3930 = vst [vmem:[#allocation67_spill] sm:$0xff] %v3089_v53  ;;  %499 = vrot.lane.b32.xlu1 %v2447_v62, %s2299_s29 }
 0x132   : > { %497 = vrot.lane.b32.xlu0 %v2451_v63, %s2299_s29  ;;  %v3110_v63 = vcombine.low %v1940_v59, %v1940_v59 }
 0x133   : > { %v3095_v52 = vpop.permute.xlu1 %1301 }
 0x134   : > { %3931 = vst [vmem:[#allocation68_spill] sm:$0xff] %v3095_v52  ;;  %v3097_v6 = vpop.permute.xlu0 %1299  ;;  %v1939_v52 = vld [vmem:[%s2362_s21 + $0x54] sm:$0x1] }
 0x135   : > { %3932 = vst [vmem:[#allocation69_spill] sm:$0xff] %v3097_v6  ;;  %495 = vrot.lane.b32.xlu1 %v2439_v60, %s2299_s29  ;;  %v1941_v6 = vld [vmem:[%s2362_s21 + $0x5c] sm:$0x1]  ;;  %v1997_v60 = vcombine.low %v1938_v8, %v1938_v8 }
 0x136   : > { %493 = vrot.lane.b32.xlu0 %v2443_v61, %s2299_s29  ;;  %v3121_v53 = vcombine.low %v1940_v59, %v1941_v6  ;;  %v3142_v6 = vcombine.low %v2500_v10, %v2500_v10  ;;  %v3159_v10 = vcombine.low %v2518_v17, %v2518_v17 }
 0x137   : > { %v3104_v3 = vpop.permute.xlu1 %1309 }
 0x138   : > { %3933 = vst [vmem:[#allocation70_spill] sm:$0xff] %v3104_v3  ;;  %v3107_v62 = vpop.permute.xlu0 %1307  ;;  %3942 = vst [vmem:[#allocation78_spill] sm:$0xff] %v3142_v6 }
 0x139   : > { %3934 = vst [vmem:[#allocation71_spill] sm:$0xff] %v3107_v62  ;;  %503 = vrot.lane.b32.xlu1 %v488_v58, %s2299_s29  ;;  %v3127_v58 = vcombine.low %v2537_v25, %v2537_v25  ;;  %v2005_v62 = vcombine.low %v1938_v8, %v1939_v52  ;;  %v579_v25 = vshll.u32 %v3121_v53, 16 }
 0x13a   : > { %501 = vrot.lane.b32.xlu0 %v3935_v37, %s2299_s29 }
 0x13b   : > { %v3116_v9 = vpop.permute.xlu1 %1323  ;;  %3938 = vst [vmem:[#allocation74_spill] sm:$0xff] %v3127_v58  ;;  %v572_v52 = vshll.u32 %v2005_v62, 16 }
 0x13c   : > { %3936 = vst [vmem:[#allocation72_spill] sm:$0xff] %v3116_v9  ;;  %v3119_v61 = vpop.permute.xlu0 %1321 }
 0x13d   : > { %3937 = vst [vmem:[#allocation73_spill] sm:$0xff] %v3119_v61  ;;  %531 = vrot.lane.b32.xlu1 %v3110_v63, %s2300_s30 }
 0x13e   : > { %529 = vrot.lane.b32.xlu0 %v1997_v60, %s2300_s30  ;;  %v577_v60 = vshrl.u32 %v3121_v53, 16 }
 0x13f   : > { %v3134_v37 = vpop.permute.xlu1 %1331 }
 0x140   : > { %3940 = vst [vmem:[#allocation76_spill] sm:$0xff] %v3134_v37  ;;  %v3136_v3 = vpop.permute.xlu0 %1329  ;;  %v574_v37 = vrot.slane %v572_v52, 1 }
 0x141   : > { %3941 = vst [vmem:[#allocation77_spill] sm:$0xff] %v3136_v3  ;;  %539 = vrot.lane.b32.xlu1 %v3127_v58, %s2300_s30  ;;  %v581_v3 = vrot.slane %v579_v25, 1 }
 0x142   : > { %537 = vrot.lane.b32.xlu0 %v3132_v21, %s2300_s30 }
 0x143   : > { %v3151_v59 = vpop.permute.xlu1 %1327  ;;  %v3174_v17 = vor.u32 %v581_v3, %v577_v60 }
 0x144   : > { %3944 = vst [vmem:[#allocation80_spill] sm:$0xff] %v3151_v59  ;;  %v3153_v8 = vpop.permute.xlu0 %1325  ;;  %v570_v59 = vshrl.u32 %v2005_v62, 16 }
 0x145   : > { %3945 = vst [vmem:[#allocation81_spill] sm:$0xff] %v3153_v8  ;;  %535 = vrot.lane.b32.xlu1 %v3142_v6, %s2300_s30 }
 0x146   : > { %533 = vrot.lane.b32.xlu0 %v3149_v27, %s2300_s30  ;;  %v575_v25 = vor.u32 %v574_v37, %v570_v59 }
 0x147   : > { %v3168_v8 = vpop.permute.xlu1 %1335 }
 0x148   : > { %3947 = vst [vmem:[#allocation83_spill] sm:$0xff] %v3168_v8  ;;  %v3170_v50 = vpop.permute.xlu0 %1333 }
 0x149   : > { %3948 = vst [vmem:[#allocation84_spill] sm:$0xff] %v3170_v50  ;;  %543 = vrot.lane.b32.xlu1 %v3159_v10, %s2300_s30  ;;  %v3957_v50 = vld [vmem:[#allocation11_spill] sm:$0xff] }
 0x14a   : > { %541 = vrot.lane.b32.xlu0 %v3166_v13, %s2300_s30  ;;  %s2307_s30 = smov 64  }
 0x14b   : > { %v3178_v2 = vpop.permute.xlu1 %1342 }
 0x14c   : > { %3949 = vst [vmem:[#allocation85_spill] sm:$0xff] %v3178_v2  ;;  %v3180_v61 = vpop.permute.xlu0 %1340 }
 0x14d   : > { %3950 = vst [vmem:[#allocation86_spill] sm:$0xff] %v3180_v61  ;;  %627 = vrot.lane.b32.xlu1 %v3174_v17, %s2301_s3 }
 0x14e   : > { %625 = vrot.lane.b32.xlu0 %v575_v25, %s2301_s3  ;;  %v3851_v25 = vrot.slane %v3121_v53, 1 }
 0x14f   : > { %v3185_v19 = vpop.permute.xlu1 %1350 }
 0x150   : > { %3951 = vst [vmem:[#allocation87_spill] sm:$0xff] %v3185_v19  ;;  %v3187_v52 = vpop.permute.xlu0 %1348 }
 0x151   : > { %3952 = vst [vmem:[#allocation88_spill] sm:$0xff] %v3187_v52  ;;  %635 = vrot.lane.b32.xlu1 %v2614_v36, %s2301_s3 }
 0x152   : > { %633 = vrot.lane.b32.xlu0 %v2619_v44, %s2301_s3 }
 0x153   : > { %v3193_v3 = vpop.permute.xlu1 %1346 }
 0x154   : > { %3953 = vst [vmem:[#allocation89_spill] sm:$0xff] %v3193_v3  ;;  %v3195_v37 = vpop.permute.xlu0 %1344  ;;  %v641_v3 = vrot.slane %v2005_v62, 1  ;;  %v3964_v62 = vld [vmem:[#allocation2_spill] sm:$0xff] }
 0x155   : > { %3954 = vst [vmem:[#allocation90_spill] sm:$0xff] %v3195_v37  ;;  %631 = vrot.lane.b32.xlu1 %v2568_v45, %s2301_s3 }
 0x156   : > { %629 = vrot.lane.b32.xlu0 %v2575_v49, %s2301_s3 }
 0x157   : > { %v3201_v59 = vpop.permute.xlu1 %1354 }
 0x158   : > { %3955 = vst [vmem:[#allocation91_spill] sm:$0xff] %v3201_v59  ;;  %v3203_v60 = vpop.permute.xlu0 %1352  ;;  %v3960_v59 = vld [vmem:[#allocation6_spill] sm:$0xff] }
 0x159   : > { %3956 = vst [vmem:[#allocation92_spill] sm:$0xff] %v3203_v60  ;;  %639 = vrot.lane.b32.xlu1 %v2591_v18, %s2301_s3  ;;  %v3852_v52 = vrot.slane %v3960_v59, 1  ;;  %v3961_v60 = vld [vmem:[#allocation7_spill] sm:$0xff] }
 0x15a   : > { %637 = vrot.lane.b32.xlu0 %v3957_v50, %s2301_s3  ;;  %v3853_v19 = vrot.slane %v3961_v60, 1  ;;  %s1934_s3 = sshll.u32 %s4086_s9, 3 }
 0x15b   : > { %v3210_v37 = vpop.permute.xlu1 %1365 }
 0x15c   : > { %3958 = vst [vmem:[#allocation11_spill] sm:$0xff] %v3210_v37  ;;  %v3212_v8 = vpop.permute.xlu0 %1363  ;;  %v3854_v37 = vrot.slane %v3964_v62, 1 }
 0x15d   : > { %3959 = vst [vmem:[#allocation93_spill] sm:$0xff] %v3212_v8  ;;  %651 = vrot.lane.b32.xlu1 %v3851_v25, %s2302_s4  ;;  %v3965_v8 = vld [vmem:[#allocation3_spill] sm:$0xff] }
 0x15e   : > { %649 = vrot.lane.b32.xlu0 %v641_v3, %s2302_s4  ;;  %v3855_v9 = vrot.slane %v3965_v8, 1  ;;  %v3968_v3 = vld [vmem:[#allocation4_spill] sm:$0xff] }
 0x15f   : > { %v3218_v61 = vpop.permute.xlu1 %1373 }
 0x160   : > { %3962 = vst [vmem:[#allocation6_spill] sm:$0xff] %v3218_v61  ;;  %v3220_v2 = vpop.permute.xlu0 %1371  ;;  %v3856_v61 = vrot.slane %v3968_v3, 1 }
 0x161   : > { %3963 = vst [vmem:[#allocation7_spill] sm:$0xff] %v3220_v2  ;;  %659 = vrot.lane.b32.xlu1 %v3852_v52, %s2302_s4  ;;  %v3969_v52 = vld [vmem:[#allocation5_spill] sm:$0xff] }
 0x162   : > { %657 = vrot.lane.b32.xlu0 %v3853_v19, %s2302_s4  ;;  %v3857_v2 = vrot.slane %v3969_v52, 1 }
 0x163   : > { %v3228_v25 = vpop.permute.xlu1 %1369 }
 0x164   : > { %3966 = vst [vmem:[#allocation2_spill] sm:$0xff] %v3228_v25  ;;  %v3230_v42 = vpop.permute.xlu0 %1367  ;;  %v2243_v25 = vld [vmem:[%s2362_s21 + $0x38] sm:$0xf] }
 0x165   : > { %3967 = vst [vmem:[#allocation3_spill] sm:$0xff] %v3230_v42  ;;  %655 = vrot.lane.b32.xlu1 %v3854_v37, %s2302_s4 }
 0x166   : > { %653 = vrot.lane.b32.xlu0 %v3855_v9, %s2302_s4 }
 0x167   : > { %v3238_v57 = vpop.permute.xlu1 %1377 }
 0x168   : > { %3970 = vst [vmem:[#allocation4_spill] sm:$0xff] %v3238_v57  ;;  %v3240_v56 = vpop.permute.xlu0 %1375 }
 0x169   : > { %3971 = vst [vmem:[#allocation5_spill] sm:$0xff] %v3240_v56  ;;  %663 = vrot.lane.b32.xlu1 %v3856_v61, %s2302_s4 }
 0x16a   : > { %661 = vrot.lane.b32.xlu0 %v3857_v2, %s2302_s4  ;;  %v3972_v2 = vld [vmem:[#allocation8_spill] sm:$0xff]  ;;  %s1935_s4 = sshll.u32 %s4084_s10, 5 }
 0x16b   : > { %v425_v19 = vpop.permute.xlu1 %424  ;;  %v3257_v57 = vcombine.low %v3972_v2, %v3972_v2  ;;  %v767_v2 = vsel %vm746_vm0, %v2245_v1, %v3974_v5  ;;  %v3979_v5 = vld [vmem:[#allocation34_spill] sm:$0xff] }
 0x16c   : > { %v423_v37 = vpop.permute.xlu0 %422 }
 0x16d   : > { %670 = vrot.lane.b32.xlu1 %v3149_v27, %s2303_s5  ;;  %3973 = vst [vmem:[#allocation8_spill] sm:$0xff] %v3257_v57  ;;  %v2244_v27 = vld [vmem:[%s2362_s21 + $0x8] sm:$0xf] }
 0x16e   : > { %668 = vrot.lane.b32.xlu0 %v3110_v63, %s2303_s5 }
 0x16f   : > { %v430_v9 = vpop.permute.xlu1 %429 }
 0x170   : > { %v428_v42 = vpop.permute.xlu0 %427 }
 0x171   : > { %678 = vrot.lane.b32.xlu1 %v3166_v13, %s2303_s5 }
 0x172   : > { %676 = vrot.lane.b32.xlu0 %v3127_v58, %s2303_s5  ;;  %v770_v58 = vsel %vm746_vm0, %v2243_v25, %v2784_v46  ;;  %v749_v46 = vsel %vm746_vm0, %v2246_v41, %v3976_v0  ;;  %v3977_v25 = vld [vmem:[#allocation26_spill] sm:$0xff] }
 0x173   : > { %v3250_v61 = vpop.permute.xlu1 %437  ;;  %v785_v30 = vsel %vm771_vm1, %v767_v2, %v3977_v25 }
 0x174   : > { %v3252_v56 = vpop.permute.xlu0 %435  ;;  %v802_v1 = vsel %vm788_vm2, %v785_v30, %v3979_v5 }
 0x175   : > { %674 = vrot.lane.b32.xlu1 %v3132_v21, %s2303_s5  ;;  %v752_v21 = vsel %vm746_vm0, %v2244_v27, %v2770_v51  ;;  %v3980_v27 = vld [vmem:[#allocation13_spill] sm:$0xff]  ;;  %v819_v0 = vsel %vm805_vm3, %v802_v1, %v423_v37  ;;  %v3984_v37 = vld [vmem:[#allocation35_spill] sm:$0xff] }
 0x176   : > { %672 = vrot.lane.b32.xlu0 %v3142_v6, %s2303_s5  ;;  %v787_v6 = vsel %vm771_vm1, %v770_v58, %v3975_v4  ;;  %v775_v41 = vsel %vm771_vm1, %v752_v21, %v3980_v27  ;;  %v2247_v1 = vld [vmem:[%s2362_s21 + $0x28] sm:$0xf] }
 0x177   : > { %v3260_v63 = vpop.permute.xlu1 %433  ;;  %v804_v51 = vsel %vm788_vm2, %v787_v6, %v3978_v7  ;;  %v3981_v6 = vld [vmem:[#allocation27_spill] sm:$0xff] }
 0x178   : > { %v3265_v13 = vpop.permute.xlu0 %431  ;;  %v821_v4 = vsel %vm805_vm3, %v804_v51, %v425_v19  ;;  %v792_v25 = vsel %vm788_vm2, %v775_v41, %v3981_v6  ;;  %v3983_v19 = vld [vmem:[#allocation28_spill] sm:$0xff]  ;;  %v2248_v41 = vld [vmem:[%s2362_s21 + $0x20] sm:$0xf]  ;;  %v3988_v6 = vld [vmem:[#allocation23_spill] sm:$0xff] }
 0x179   : > { %682 = vrot.lane.b32.xlu1 %v3257_v57, %s2303_s5  ;;  %v3982_v57 = vld [vmem:[#allocation14_spill] sm:$0xff]  ;;  %v809_v51 = vsel %vm805_vm3, %v792_v25, %v3984_v37  ;;  %v3989_v37 = vld [vmem:[#allocation24_spill] sm:$0xff] }
 0x17a   : > { %680 = vrot.lane.b32.xlu0 %v3159_v10, %s2303_s5  ;;  %v773_v30 = vsel %vm771_vm1, %v749_v46, %v3982_v57  ;;  %v3986_v57 = vld [vmem:[#allocation36_spill] sm:$0xff]  ;;  %s163_s5 = sadd.s32 %s1935_s4, %s1934_s3 }
 0x17b   : > { %v442_v58 = vpop.permute.xlu1 %441  ;;  %v790_v21 = vsel %vm788_vm2, %v773_v30, %v3983_v19 }
 0x17c   : > { %v838_v2 = vsel %vm822_vm4, %v821_v4, %v442_v58  ;;  %v440_v7 = vpop.permute.xlu0 %439  ;;  %v3985_v4 = vld [vmem:[#allocation18_spill] sm:$0xff]  ;;  %v807_v46 = vsel %vm805_vm3, %v790_v21, %v3986_v57  ;;  %v3992_v57 = vld [vmem:[#allocation39_spill] sm:$0xff] }
 0x17d   : > { %v836_v5 = vsel %vm822_vm4, %v819_v0, %v440_v7  ;;  %696 = vrot.lane.b32.xlu1 %v2575_v49, %s2304_s6  ;;  %v764_v58 = vsel %vm746_vm0, %v2247_v1, %v3985_v4  ;;  %v826_v49 = vsel %vm822_vm4, %v809_v51, %v430_v9  ;;  %v3987_v0 = vld [vmem:[#allocation19_spill] sm:$0xff]  ;;  %v3991_v4 = vld [vmem:[#allocation32_spill] sm:$0xff] }
 0x17e   : > { %694 = vrot.lane.b32.xlu0 %v3174_v17, %s2304_s6  ;;  %v761_v7 = vsel %vm746_vm0, %v2248_v41, %v3987_v0  ;;  %v783_v25 = vsel %vm771_vm1, %v764_v58, %v3988_v6  ;;  %v824_v17 = vsel %vm822_vm4, %v807_v46, %v428_v42  ;;  %v3990_v1 = vld [vmem:[#allocation31_spill] sm:$0xff]  ;;  %v2249_v46 = vld [vmem:[%s2362_s21 + $0x18] sm:$0xf]  ;;  %v3994_v41 = vld [vmem:[#allocation40_spill] sm:$0xff] }
 0x17f   : > { %v449_v27 = vpop.permute.xlu1 %448  ;;  %v781_v21 = vsel %vm771_vm1, %v761_v7, %v3989_v37  ;;  %v800_v9 = vsel %vm788_vm2, %v783_v25, %v3990_v1  ;;  %v2250_v6 = vld [vmem:[%s2362_s21 + $0x10] sm:$0xf]  ;;  %v3995_v25 = vld [vmem:[#allocation15_spill] sm:$0xff] }
 0x180   : > { %v843_v30 = vsel %vm839_vm5, %v826_v49, %v449_v27  ;;  %v447_v19 = vpop.permute.xlu0 %446  ;;  %v798_v58 = vsel %vm788_vm2, %v781_v21, %v3991_v4  ;;  %v817_v42 = vsel %vm805_vm3, %v800_v9, %v3992_v57  ;;  %v3993_v49 = vld [vmem:[#allocation17_spill] sm:$0xff]  ;;  %v3997_v9 = vld [vmem:[#allocation22_spill] sm:$0xff] }
 0x181   : > { %v841_v51 = vsel %vm839_vm5, %v824_v17, %v447_v19  ;;  %704 = vrot.lane.b32.xlu1 %v3957_v50, %s2304_s6  ;;  %v758_v27 = vsel %vm746_vm0, %v2249_v46, %v3993_v49  ;;  %v815_v0 = vsel %vm805_vm3, %v798_v58, %v3994_v41  ;;  %v834_v7 = vsel %vm822_vm4, %v817_v42, %v3250_v61  ;;  %v3996_v19 = vld [vmem:[#allocation21_spill] sm:$0xff]  ;;  %v3999_v42 = vld [vmem:[#allocation30_spill] sm:$0xff] }
 0x182   : > { %702 = vrot.lane.b32.xlu0 %v2614_v36, %s2304_s6  ;;  %v755_v17 = vsel %vm746_vm0, %v2250_v6, %v3995_v25  ;;  %v779_v37 = vsel %vm771_vm1, %v758_v27, %v3996_v19  ;;  %v832_v36 = vsel %vm822_vm4, %v815_v0, %v3252_v56  ;;  %v3998_v58 = vld [vmem:[#allocation29_spill] sm:$0xff]  ;;  %v4001_v27 = vld [vmem:[#allocation38_spill] sm:$0xff] }
 0x183   : > { %v457_v50 = vpop.permute.xlu1 %456  ;;  %v777_v4 = vsel %vm771_vm1, %v755_v17, %v3997_v9  ;;  %v796_v61 = vsel %vm788_vm2, %v779_v37, %v3998_v58  ;;  %v4000_v56 = vld [vmem:[#allocation37_spill] sm:$0xff]  ;;  %v4002_v17 = vld [vmem:[#allocation12_spill] sm:$0xff]  ;;  %v4004_v9 = vrot.slane %v3121_v53, 1 }
 0x184   : > { %v3345_v21 = vsel %vm839_vm5, %v834_v7, %v457_v50  ;;  %v455_v1 = vpop.permute.xlu0 %454  ;;  %v794_v46 = vsel %vm788_vm2, %v777_v4, %v3999_v42  ;;  %v813_v49 = vsel %vm805_vm3, %v796_v61, %v4000_v56  ;;  %v4006_v4 = vld [vmem:[#allocation10_spill] sm:$0xff] }
 0x185   : > { %v3352_v57 = vsel %vm839_vm5, %v832_v36, %v455_v1  ;;  %700 = vrot.lane.b32.xlu1 %v2619_v44, %s2304_s6  ;;  %v811_v41 = vsel %vm805_vm3, %v794_v46, %v4001_v27  ;;  %v830_v0 = vsel %vm822_vm4, %v813_v49, %v3260_v63  ;;  %v4003_v36 = vrot.slane %v3965_v8, 1  ;;  %v4008_v46 = vld [vmem:[#allocation41_spill] sm:$0xff]  ;;  %v4009_v56 = vld [vmem:[#allocation42_spill] sm:$0xff]  ;;  %v4011_v49 = vld [vmem:[#allocation43_spill] sm:$0xff] }
 0x186   : > { %698 = vrot.lane.b32.xlu0 %v2568_v45, %s2304_s6  ;;  %v828_v50 = vsel %vm822_vm4, %v811_v41, %v3265_v13  ;;  %v1382_v13 = vsel %vm746_vm0, %v3964_v62, %v2882_v38  ;;  %v1390_v38 = vsel %vm746_vm0, %v3968_v3, %v2890_v48  ;;  %v1386_v1 = vsel %vm746_vm0, %v3960_v59, %v2898_v14 }
 0x187   : > { %v453_v7 = vpop.permute.xlu1 %452  ;;  %v1398_v14 = vsel %vm771_vm1, %v1382_v13, %v2913_v32  ;;  %v1402_v42 = vsel %vm771_vm1, %v1386_v1, %v2930_v26  ;;  %v4015_v13 = vld [vmem:[#allocation45_spill] sm:$0xff] }
 0x188   : > { %v3369_v44 = vsel %vm839_vm5, %v830_v0, %v453_v7  ;;  %v451_v6 = vpop.permute.xlu0 %450  ;;  %v1418_v0 = vsel %vm788_vm2, %v1402_v42, %v2967_v15  ;;  %v4012_v15 = vrot.slane %v3961_v60, 1  ;;  %v4019_v1 = vld [vmem:[#allocation49_spill] sm:$0xff]  ;;  %v4025_v42 = vld [vmem:[#allocation55_spill] sm:$0xff] }
 0x189   : > { %v3372_v25 = vsel %vm839_vm5, %v828_v50, %v451_v6  ;;  %708 = vrot.lane.b32.xlu1 %v4002_v17, %s2304_s6 }
 0x18a   : > { %706 = vrot.lane.b32.xlu0 %v2591_v18, %s2304_s6  ;;  %v2236_v18 = vld [vmem:[%s3828_s1] sm:$0xff]   ;;  %s1936_s6 = sshll.u32 %s163_s5, 2 }
 0x18b   : > { %v461_v45 = vpop.permute.xlu1 %460  ;;  %2082 = vmatprep.subr.bf16.mxu0 %v2236_v18  ;;  %2104 = vmatprep.subr.bf16.mxu1 %v2236_v18  ;;  %s3794_s16 = scalar_lea.vmem %s3829_s2, %s1936_s6 }
 0x18c   : > { %v3379_v63 = vsel %vm839_vm5, %v838_v2, %v461_v45  ;;  %v459_v19 = vpop.permute.xlu0 %458  ;;  %v1380_v2 = vsel %vm746_vm0, %v3965_v8, %v2884_v28  ;;  %v1384_v28 = vsel %vm746_vm0, %v3961_v60, %v2900_v23  ;;  %v4005_v8 = vld [vmem:[#allocation9_spill] sm:$0xff]  ;;  %2083 = vmatpush3.bf16.msra.mxu0 %v2236_v18  ;;  %2111 = vmatpush3.bf16.msra.mxu1 %v2236_v18  ;;  %v4013_v60 = vrot.slane %v3964_v62, 1  ;;  %v4014_v45 = vld [vmem:[#allocation44_spill] sm:$0xff] }
 0x18d   : > { %v3385_v37 = vsel %vm839_vm5, %v836_v5, %v459_v19  ;;  %713 = vrot.lane.b32.xlu1 %v4003_v36, %s2305_s7  ;;  %v1388_v5 = vsel %vm746_vm0, %v3969_v52, %v2892_v12  ;;  %v1394_v48 = vsel %vm746_vm0, %v4005_v8, %v2905_v39  ;;  %v1392_v12 = vsel %vm746_vm0, %v4006_v4, %v2907_v29 }
 0x18e   : > { %711 = vrot.lane.b32.xlu0 %v4004_v9, %s2305_s7  ;;  %v1396_v53 = vsel %vm771_vm1, %v1380_v2, %v2915_v54  ;;  %v1406_v39 = vsel %vm771_vm1, %v1390_v38, %v2922_v31  ;;  %v1404_v29 = vsel %vm771_vm1, %v1388_v5, %v2924_v55  ;;  %v4007_v54 = vrot.slane %v3969_v52, 1 }
 0x18f   : > { %v475_v58 = vpop.permute.xlu1 %474  ;;  %v1400_v31 = vsel %vm771_vm1, %v1384_v28, %v2932_v47  ;;  %v1410_v55 = vsel %vm771_vm1, %v1394_v48, %v2938_v43  ;;  %v1408_v26 = vsel %vm771_vm1, %v1392_v12, %v4008_v46  ;;  %v4010_v52 = vrot.slane %v3960_v59, 1  ;;  %v4020_v28 = vld [vmem:[#allocation50_spill] sm:$0xff]  ;;  %v4021_v48 = vld [vmem:[#allocation51_spill] sm:$0xff] }
 0x190   : > { %v3422_v23 = vsel %vm856_vm6, %v843_v30, %v475_v58  ;;  %v473_v61 = vpop.permute.xlu0 %472  ;;  %v2237_v30 = vld [vmem:[%s3828_s1 + $0x8] sm:$0xff]   ;;  %v1412_v27 = vsel %vm788_vm2, %v1396_v53, %v4011_v49  ;;  %v1422_v41 = vsel %vm788_vm2, %v1406_v39, %v2958_v16  ;;  %v1420_v47 = vsel %vm788_vm2, %v1404_v29, %v2960_v35  ;;  %v4022_v58 = vld [vmem:[#allocation52_spill] sm:$0xff]  ;;  %v4023_v53 = vld [vmem:[#allocation53_spill] sm:$0xff] }
 0x191   : > { %v3431_v32 = vsel %vm856_vm6, %v841_v51, %v473_v61  ;;  %721 = vrot.lane.b32.xlu1 %v4007_v54, %s2305_s7  ;;  %v1414_v51 = vsel %vm788_vm2, %v1398_v14, %v4009_v56  ;;  %2084 = vmatprep.subr.bf16.mxu0 %v2237_v30  ;;  %v1416_v7 = vsel %vm788_vm2, %v1400_v31, %v2969_v20  ;;  %v710_v20 = vrot.slane %v4006_v4, 1  ;;  %v4024_v39 = vld [vmem:[#allocation54_spill] sm:$0xff] }
 0x192   : > { %719 = vrot.lane.b32.xlu0 %v4010_v52, %s2305_s7  ;;  %2105 = vmatprep.subr.bf16.mxu1 %v2237_v30  ;;  %v1426_v16 = vsel %vm788_vm2, %v1410_v55, %v2974_v11  ;;  %v1424_v35 = vsel %vm788_vm2, %v1408_v26, %v2976_v33  ;;  %v1430_v11 = vsel %vm805_vm3, %v1414_v51, %v2981_v34  ;;  %v4016_v34 = vld [vmem:[#allocation46_spill] sm:$0xff]  ;;  %v4028_v55 = vld [vmem:[#allocation57_spill] sm:$0xff]  ;;  %v4030_v52 = vld [vmem:[#allocation59_spill] sm:$0xff]  ;;  %vm1603_vm0 = vcmask 523264  }
 0x193   : > { %v483_v43 = vpop.permute.xlu1 %482  ;;  %2085 = vmatpush3.bf16.msra.mxu0 %v2237_v30  ;;  %2112 = vmatpush3.bf16.msra.mxu1 %v2237_v30  ;;  %v1428_v33 = vsel %vm805_vm3, %v1412_v27, %v2983_v40  ;;  %v1436_v17 = vsel %vm805_vm3, %v1420_v47, %v2992_v22  ;;  %v1434_v19 = vsel %vm805_vm3, %v1418_v0, %v4014_v45  ;;  %v4018_v22 = vld [vmem:[#allocation48_spill] sm:$0xff]  ;;  %v4029_v26 = vld [vmem:[#allocation58_spill] sm:$0xff]  ;;  %v3567_v45 = vld [vmem:[%s2362_s21 + $0x98] sm:$0xf]  ;;  %vm1695_vm1 = vcmask 883712  }
 0x194   : > { %v3462_v59 = vsel %vm856_vm6, %v3345_v21, %v483_v43  ;;  %v481_v50 = vpop.permute.xlu0 %480  ;;  %v2238_v21 = vld [vmem:[%s3828_s1 + $0x10] sm:$0xff]   ;;  %v1432_v36 = vsel %vm805_vm3, %v1416_v7, %v4015_v13  ;;  %v1442_v18 = vsel %vm805_vm3, %v1426_v16, %v4016_v34  ;;  %v1446_v38 = vsel %vm822_vm4, %v1430_v11, %v4018_v22  ;;  %v4032_v43 = vld [vmem:[#allocation61_spill] sm:$0xff]  ;;  %v4040_v13 = vld [vmem:[#allocation63_spill] sm:$0xff] }
 0x195   : > { %v3470_v6 = vsel %vm856_vm6, %v3352_v57, %v481_v50  ;;  %717 = vrot.lane.b32.xlu1 %v4012_v15, %s2305_s7  ;;  %v1438_v57 = vsel %vm805_vm3, %v1422_v41, %v2990_v24  ;;  %2086 = vmatprep.subr.bf16.mxu0 %v2238_v21  ;;  %v4017_v24 = vld [vmem:[#allocation47_spill] sm:$0xff]  ;;  %v1444_v9 = vsel %vm822_vm4, %v1428_v33, %v4019_v1  ;;  %v4027_v30 = vld [vmem:[#allocation56_spill] sm:$0xff]  ;;  %v4034_v16 = vld [vmem:[#allocation65_spill] sm:$0xff]  ;;  %vm1825_vm2 = vcmask 60416  }
 0x196   : > { %715 = vrot.lane.b32.xlu0 %v4013_v60, %s2305_s7  ;;  %2106 = vmatprep.subr.bf16.mxu1 %v2238_v21  ;;  %v1440_v2 = vsel %vm805_vm3, %v1424_v35, %v4017_v24  ;;  %v1454_v8 = vsel %vm822_vm4, %v1438_v57, %v4020_v28  ;;  %v1452_v4 = vsel %vm822_vm4, %v1436_v17, %v4021_v48  ;;  %v4031_v27 = vld [vmem:[#allocation60_spill] sm:$0xff]  ;;  %v4038_v17 = vld [vmem:[#allocation73_spill] sm:$0xff]  ;;  %v4043_v22 = vld [vmem:[#allocation11_spill] sm:$0xff] }
 0x197   : > { %v479_v40 = vpop.permute.xlu1 %478  ;;  %2087 = vmatpush3.bf16.msra.mxu0 %v2238_v21  ;;  %2113 = vmatpush3.bf16.msra.mxu1 %v2238_v21  ;;  %v1450_v14 = vsel %vm822_vm4, %v1434_v19, %v4022_v58  ;;  %v1448_v61 = vsel %vm822_vm4, %v1432_v36, %v4023_v53  ;;  %v1458_v29 = vsel %vm822_vm4, %v1442_v18, %v4024_v39  ;;  %v4033_v7 = vld [vmem:[#allocation64_spill] sm:$0xff]  ;;  %v4036_v21 = vld [vmem:[#allocation62_spill] sm:$0xff]  ;;  %v4041_v34 = vld [vmem:[#allocation85_spill] sm:$0xff] }
 0x198   : > { %v3502_v62 = vsel %vm856_vm6, %v3369_v44, %v479_v40  ;;  %v477_v5 = vpop.permute.xlu0 %476  ;;  %v2239_v44 = vld [vmem:[%s3828_s1 + $0x18] sm:$0xff]   ;;  %v1456_v54 = vsel %vm822_vm4, %v1440_v2, %v4025_v42  ;;  %v1462_v31 = vsel %vm839_vm5, %v1446_v38, %v4027_v30  ;;  %v1460_v46 = vsel %vm839_vm5, %v1444_v9, %v4028_v55  ;;  %v4037_v33 = vld [vmem:[#allocation72_spill] sm:$0xff]  ;;  %v4042_v40 = vld [vmem:[#allocation86_spill] sm:$0xff] }
 0x199   : > { %v3512_v12 = vsel %vm856_vm6, %v3372_v25, %v477_v5  ;;  %725 = vrot.lane.b32.xlu1 %v710_v20, %s2305_s7  ;;  %v4026_v25 = vrot.slane %v3968_v3, 1  ;;  %v1470_v56 = vsel %vm839_vm5, %v1454_v8, %v4029_v26  ;;  %2088 = vmatprep.subr.bf16.mxu0 %v2239_v44  ;;  %v1468_v49 = vsel %vm839_vm5, %v1452_v4, %v4030_v52  ;;  %v2240_v20 = vld [vmem:[%s3828_s1 + $0x20] sm:$0xff]   ;;  %v4044_v5 = vld [vmem:[#allocation93_spill] sm:$0xff]  ;;  %v4046_v4 = vld [vmem:[#allocation67_spill] sm:$0xff] }
 0x19a   : > { %2107 = vmatprep.subr.bf16.mxu1 %v2239_v44  ;;  %v1466_v3 = vsel %vm839_vm5, %v1450_v14, %v4031_v27  ;;  %v1464_v0 = vsel %vm839_vm5, %v1448_v61, %v4032_v43  ;;  %v1478_v50 = vsel %vm856_vm6, %v1462_v31, %v4033_v7  ;;  %v1476_v35 = vsel %vm856_vm6, %v1460_v46, %v4034_v16  ;;  %v4045_v8 = vld [vmem:[#allocation66_spill] sm:$0xff]  ;;  %v4047_v58 = vld [vmem:[#allocation68_spill] sm:$0xff]  ;;  %v4048_v61 = vld [vmem:[#allocation69_spill] sm:$0xff] }
 0x19b   : > { %723 = vrot.lane.b32.xlu0 %v4026_v25, %s2305_s7  ;;  %v487_v51 = vpop.permute.xlu1 %486  ;;  %2089 = vmatpush3.bf16.msra.mxu0 %v2239_v44  ;;  %v1474_v11 = vsel %vm839_vm5, %v1458_v29, %v4036_v21  ;;  %v1494_v57 = vsel %vm873_vm7, %v1478_v50, %v4037_v33  ;;  %v1492_v60 = vsel %vm873_vm7, %v1476_v35, %v4038_v17  ;;  %v4049_v29 = vld [vmem:[#allocation70_spill] sm:$0xff]  ;;  %v4051_v30 = vld [vmem:[#allocation76_spill] sm:$0xff]  ;;  %v4054_v46 = vld [vmem:[#allocation87_spill] sm:$0xff] }
 0x19c   : > { %v3541_v41 = vsel %vm856_vm6, %v3379_v63, %v487_v51  ;;  %v485_v47 = vpop.permute.xlu0 %484  ;;  %2114 = vmatpush3.bf16.msra.mxu1 %v2239_v44  ;;  %v4035_v63 = vld [vmem:[#allocation78_spill] sm:$0xff]  ;;  %v2015_v19 = vcombine.low %v3567_v45, %v3567_v45  ;;  %v1472_v36 = vsel %vm839_vm5, %v1456_v54, %v4040_v13  ;;  %v1510_v18 = vsel %vm890_vm8, %v1494_v57, %v4041_v34  ;;  %v4050_v54 = vld [vmem:[#allocation71_spill] sm:$0xff]  ;;  %v4057_v7 = vld [vmem:[#allocation80_spill] sm:$0xff] }
 0x19d   : > { %v3551_v15 = vsel %vm856_vm6, %v3385_v37, %v485_v47  ;;  %732 = vrot.lane.b32.xlu1 %v4035_v63, %s2306_s24  ;;  %v4039_v37 = vld [vmem:[#allocation79_spill] sm:$0xff]  ;;  %v1508_v24 = vsel %vm890_vm8, %v1492_v60, %v4042_v40  ;;  %2090 = vmatprep.subr.bf16.mxu0 %v2240_v20  ;;  %v3579_v38 = vsel %vm907_vm9, %v1510_v18, %v4043_v22  ;;  %v4052_v31 = vld [vmem:[#allocation82_spill] sm:$0xff]  ;;  %v4060_v21 = vld [vmem:[#allocation81_spill] sm:$0xff] }
 0x19e   : > { %2108 = vmatprep.subr.bf16.mxu1 %v2240_v20  ;;  %v3583_v1 = vsel %vm907_vm9, %v1508_v24, %v4044_v5  ;;  %v1486_v48 = vsel %vm856_vm6, %v1470_v56, %v4045_v8  ;;  %v1484_v44 = vsel %vm856_vm6, %v1468_v49, %v4046_v4  ;;  %v1482_v14 = vsel %vm856_vm6, %v1466_v3, %v4047_v58  ;;  %v4055_v49 = vld [vmem:[#allocation88_spill] sm:$0xff]  ;;  %v4056_v3 = vld [vmem:[#allocation6_spill] sm:$0xff]  ;;  %v4058_v16 = vld [vmem:[#allocation7_spill] sm:$0xff] }
 0x19f   : > { %730 = vrot.lane.b32.xlu0 %v4039_v37, %s2306_s24  ;;  %v492_v2 = vpop.permute.xlu1 %491  ;;  %2091 = vmatpush3.bf16.msra.mxu0 %v2240_v20  ;;  %v1480_v39 = vsel %vm856_vm6, %v1464_v0, %v4048_v61  ;;  %v1490_v42 = vsel %vm856_vm6, %v1474_v11, %v4049_v29  ;;  %v1488_v25 = vsel %vm856_vm6, %v1472_v36, %v4050_v54  ;;  %v1547_v56 = vshll.u32 %v3579_v38, 16  ;;  %v4061_v33 = vld [vmem:[#allocation83_spill] sm:$0xff]  ;;  %v4062_v17 = vld [vmem:[#allocation84_spill] sm:$0xff]  ;;  %v4063_v37 = vld [vmem:[#allocation89_spill] sm:$0xff] }
 0x1a0   : > { %v3587_v9 = vsel %vm873_vm7, %v3422_v23, %v492_v2  ;;  %v490_v28 = vpop.permute.xlu0 %489  ;;  %2115 = vmatpush3.bf16.msra.mxu1 %v2240_v20  ;;  %v2241_v23 = vld [vmem:[%s3828_s1 + $0x28] sm:$0xff]   ;;  %v1541_v51 = vshll.u32 %v3583_v1, 16  ;;  %v1498_v50 = vsel %vm873_vm7, %v1482_v14, %v4057_v7  ;;  %v4059_v20 = vld [vmem:[#allocation74_spill] sm:$0xff]  ;;  %v1496_v11 = vsel %vm873_vm7, %v1480_v39, %v4060_v21  ;;  %v4069_v29 = vld [vmem:[#allocation92_spill] sm:$0xff] }
 0x1a1   : > { %v3597_v53 = vsel %vm873_vm7, %v3431_v32, %v490_v28  ;;  %740 = vrot.lane.b32.xlu1 %v3159_v10, %s2306_s24  ;;  %v1502_v32 = vsel %vm873_vm7, %v1486_v48, %v4051_v30  ;;  %v4053_v10 = vld [vmem:[#allocation77_spill] sm:$0xff]  ;;  %2092 = vmatprep.subr.bf16.mxu0 %v2241_v23  ;;  %v1506_v57 = vsel %vm873_vm7, %v1490_v42, %v4061_v33  ;;  %v4064_v13 = vld [vmem:[#allocation75_spill] sm:$0xff]  ;;  %v4065_v36 = vld [vmem:[#allocation90_spill] sm:$0xff]  ;;  %v1549_v18 = vrot.slane %v1547_v56, 1 }
 0x1a2   : > { %v1500_v55 = vsel %vm873_vm7, %v1484_v44, %v4053_v10  ;;  %v1518_v26 = vsel %vm890_vm8, %v1502_v32, %v4054_v46  ;;  %2109 = vmatprep.subr.bf16.mxu1 %v2241_v23  ;;  %v1504_v60 = vsel %vm873_vm7, %v1488_v25, %v4062_v17  ;;  %v1512_v34 = vsel %vm890_vm8, %v1496_v11, %v4065_v36  ;;  %v4066_v5 = vld [vmem:[#allocation2_spill] sm:$0xff]  ;;  %v4067_v14 = vld [vmem:[#allocation3_spill] sm:$0xff]  ;;  %v4071_v45 = vld [vmem:[#allocation4_spill] sm:$0xff] }
 0x1a3   : > { %738 = vrot.lane.b32.xlu0 %v4052_v31, %s2306_s24  ;;  %v500_v52 = vpop.permute.xlu1 %499  ;;  %v1516_v27 = vsel %vm890_vm8, %v1500_v55, %v4055_v49  ;;  %v1534_v47 = vsel %vm907_vm9, %v1518_v26, %v4056_v3  ;;  %2093 = vmatpush3.bf16.msra.mxu0 %v2241_v23  ;;  %v1543_v40 = vrot.slane %v1541_v51, 1  ;;  %v1545_v44 = vshrl.u32 %v3579_v38, 16  ;;  %v4072_v26 = vld [vmem:[#allocation5_spill] sm:$0xff] }
 0x1a4   : > { %v3626_v43 = vsel %vm873_vm7, %v3462_v59, %v500_v52  ;;  %v498_v0 = vpop.permute.xlu0 %497  ;;  %2116 = vmatpush3.bf16.msra.mxu1 %v2241_v23  ;;  %v1532_v35 = vsel %vm907_vm9, %v1516_v27, %v4058_v16  ;;  %v2242_v59 = vld [vmem:[%s3828_s1 + $0x30] sm:$0x3f]   ;;  %v1571_v24 = vshll.u32 %v1534_v47, 16  ;;  %v1539_v58 = vshrl.u32 %v3583_v1, 16 }
 0x1a5   : > { %v3634_v63 = vsel %vm873_vm7, %v3470_v6, %v498_v0  ;;  %736 = vrot.lane.b32.xlu1 %v4059_v20, %s2306_s24  ;;  %v1514_v6 = vsel %vm890_vm8, %v1498_v50, %v4063_v37  ;;  %2118 = vmatprep.subr.msk.bf16.mxu0 %vm1708_vm10, %v2242_v59  ;;  %v1565_v22 = vshll.u32 %v1532_v35, 16  ;;  %v1710_v4 = vsel %vm1708_vm10, %v2242_v59, 0  ;;  %v4070_v1 = vld [vmem:[#allocation8_spill] sm:$0xff] }
 0x1a6   : > { %2119 = vmatprep.subr.msk.bf16.mxu1 %vm1708_vm10, %v2242_v59  ;;  %v1530_v28 = vsel %vm907_vm9, %v1514_v6, %v4066_v5  ;;  %v1528_v23 = vsel %vm907_vm9, %v1512_v34, %v4067_v14  ;;  %v1520_v38 = vsel %vm890_vm8, %v1504_v60, %v4069_v29  ;;  %v1550_v42 = vor.u32 %v1549_v18, %v1545_v44 }
 0x1a7   : > { %734 = vrot.lane.b32.xlu0 %v4064_v13, %s2306_s24  ;;  %v496_v2 = vpop.permute.xlu1 %495  ;;  %2095 = vmatpush3.bf16.msra.mxu0 %v1710_v4  ;;  %v1544_v54 = vor.u32 %v1543_v40, %v1539_v58  ;;  %v1573_v25 = vrot.slane %v1571_v24, 1  ;;  %v1567_v32 = vrot.slane %v1565_v22, 1  ;;  %v1553_v31 = vshll.u32 %v1528_v23, 16 }
 0x1a8   : > { %v881_v8 = vsel %vm873_vm7, %v3502_v62, %v496_v2  ;;  %v494_v48 = vpop.permute.xlu0 %493  ;;  %v4068_v62 = vld [vmem:[#allocation91_spill] sm:$0xff]  ;;  %2117 = vmatpush3.bf16.msra.mxu1 %v1710_v4  ;;  %v1569_v46 = vshrl.u32 %v1534_v47, 16  ;;  %v1536_v56 = vsel %vm907_vm9, %v1520_v38, %v4072_v26  ;;  %v1563_v52 = vshrl.u32 %v1532_v35, 16 }
 0x1a9   : > { %v879_v61 = vsel %vm873_vm7, %v3512_v12, %v494_v48  ;;  %744 = vrot.lane.b32.xlu1 %v2015_v19, %s2306_s24  ;;  %v1522_v39 = vsel %vm890_vm8, %v1506_v57, %v4068_v62  ;;  %v1559_v12 = vshll.u32 %v1530_v28, 16  ;;  %v1577_v50 = vshll.u32 %v1536_v56, 16 }
 0x1aa   : > { %v1538_v19 = vsel %vm907_vm9, %v1522_v39, %v4071_v45  ;;  %v1574_v49 = vor.u32 %v1573_v25, %v1569_v46  ;;  %v1568_v7 = vor.u32 %v1567_v32, %v1563_v52  ;;  %v1557_v20 = vshrl.u32 %v1530_v28, 16 }
 0x1ab   : > { %742 = vrot.lane.b32.xlu0 %v4070_v1, %s2306_s24  ;;  %v504_v30 = vpop.permute.xlu1 %503  ;;  %v1561_v27 = vrot.slane %v1559_v12, 1  ;;  %v1583_v3 = vshll.u32 %v1538_v19, 16  ;;  %v1551_v35 = vshrl.u32 %v1528_v23, 16  ;;  %v1579_v57 = vrot.slane %v1577_v50, 1 }
 0x1ac   : > { %v889_v10 = vsel %vm873_vm7, %v3541_v41, %v504_v30  ;;  %v502_v55 = vpop.permute.xlu0 %501  ;;  %v1555_v41 = vrot.slane %v1553_v31, 1 }
 0x1ad   : > { %v887_v51 = vsel %vm873_vm7, %v3551_v15, %v502_v55  ;;  %1589 = vrot.lane.b32.xlu1 %v1550_v42, %s2307_s30  ;;  %v1562_v59 = vor.u32 %v1561_v27, %v1557_v20  ;;  %v1585_v21 = vrot.slane %v1583_v3, 1 }
 0x1ae   : > { %v1556_v33 = vor.u32 %v1555_v41, %v1551_v35 }
 0x1af   : > { %1587 = vrot.lane.b32.xlu0 %v1544_v54, %s2307_s30  ;;  %v532_v0 = vpop.permute.xlu1 %531 }
 0x1b0   : > { %v894_v47 = vsel %vm890_vm8, %v3587_v9, %v532_v0  ;;  %v530_v16 = vpop.permute.xlu0 %529  ;;  %v1581_v9 = vshrl.u32 %v1538_v19, 16 }
 0x1b1   : > { %v892_v15 = vsel %vm890_vm8, %v3597_v53, %v530_v16  ;;  %1597 = vrot.lane.b32.xlu1 %v1574_v49, %s2307_s30  ;;  %v1575_v53 = vshrl.u32 %v1536_v56, 16 }
 0x1b2   : > { %v1586_v6 = vor.u32 %v1585_v21, %v1581_v9 }
 0x1b3   : > { %1595 = vrot.lane.b32.xlu0 %v1568_v7, %s2307_s30  ;;  %v540_v11 = vpop.permute.xlu1 %539  ;;  %v1580_v36 = vor.u32 %v1579_v57, %v1575_v53 }
 0x1b4   : > { %v902_v17 = vsel %vm890_vm8, %v3626_v43, %v540_v11  ;;  %v538_v60 = vpop.permute.xlu0 %537 }
 0x1b5   : > { %v900_v37 = vsel %vm890_vm8, %v3634_v63, %v538_v60  ;;  %1593 = vrot.lane.b32.xlu1 %v1562_v59, %s2307_s30 }
 0x1b7   : > { %1591 = vrot.lane.b32.xlu0 %v1556_v33, %s2307_s30  ;;  %v536_v13 = vpop.permute.xlu1 %535 }
 0x1b8   : > { %v898_v34 = vsel %vm890_vm8, %v881_v8, %v536_v13  ;;  %v534_v18 = vpop.permute.xlu0 %533 }
 0x1b9   : > { %v896_v40 = vsel %vm890_vm8, %v879_v61, %v534_v18  ;;  %1601 = vrot.lane.b32.xlu1 %v1586_v6, %s2307_s30 }
 0x1bb   : > { %1599 = vrot.lane.b32.xlu0 %v1580_v36, %s2307_s30  ;;  %v544_v43 = vpop.permute.xlu1 %543 }
 0x1bc   : > { %v906_v63 = vsel %vm890_vm8, %v889_v10, %v544_v43  ;;  %v542_v24 = vpop.permute.xlu0 %541 }
 0x1bd   : > { %v904_v2 = vsel %vm890_vm8, %v887_v51, %v542_v24 }
 0x1bf   : > { %v628_v22 = vpop.permute.xlu1 %627 }
 0x1c0   : > { %v911_v5 = vsel %vm907_vm9, %v894_v47, %v628_v22  ;;  %v626_v28 = vpop.permute.xlu0 %625 }
 0x1c1   : > { %v909_v48 = vsel %vm907_vm9, %v892_v15, %v626_v28 }
 0x1c3   : > { %v636_v8 = vpop.permute.xlu1 %635 }
 0x1c4   : > { %v919_v4 = vsel %vm907_vm9, %v902_v17, %v636_v8  ;;  %v634_v44 = vpop.permute.xlu0 %633 }
 0x1c5   : > { %v917_v58 = vsel %vm907_vm9, %v900_v37, %v634_v44 }
 0x1c7   : > { %v632_v14 = vpop.permute.xlu1 %631 }
 0x1c8   : > { %v915_v23 = vsel %vm907_vm9, %v898_v34, %v632_v14  ;;  %v630_v61 = vpop.permute.xlu0 %629 }
 0x1c9   : > { %v913_v62 = vsel %vm907_vm9, %v896_v40, %v630_v61 }
 0x1cb   : > { %v640_v39 = vpop.permute.xlu1 %639 }
 0x1cc   : > { %v923_v29 = vsel %vm907_vm9, %v906_v63, %v640_v39  ;;  %v638_v38 = vpop.permute.xlu0 %637 }
 0x1cd   : > { %v921_v1 = vsel %vm907_vm9, %v904_v2, %v638_v38 }
 0x1cf   : > { %v652_v42 = vpop.permute.xlu1 %651 }
 0x1d0   : > { %v928_v54 = vsel %vm924_vm11, %v911_v5, %v652_v42  ;;  %v650_v25 = vpop.permute.xlu0 %649 }
 0x1d1   : > { %v926_v12 = vsel %vm924_vm11, %v909_v48, %v650_v25 }
 0x1d3   : > { %v660_v30 = vpop.permute.xlu1 %659 }
 0x1d4   : > { %v936_v32 = vsel %vm924_vm11, %v919_v4, %v660_v30  ;;  %v658_v31 = vpop.permute.xlu0 %657 }
 0x1d5   : > { %v934_v45 = vsel %vm924_vm11, %v917_v58, %v658_v31 }
 0x1d7   : > { %v656_v19 = vpop.permute.xlu1 %655 }
 0x1d8   : > { %v3717_v10 = vsel %vm924_vm11, %v915_v23, %v656_v19  ;;  %v654_v55 = vpop.permute.xlu0 %653 }
 0x1d9   : > { %v3720_v46 = vsel %vm924_vm11, %v913_v62, %v654_v55 }
 0x1db   : > { %v664_v26 = vpop.permute.xlu1 %663 }
 0x1dc   : > { %v3723_v56 = vsel %vm924_vm11, %v923_v29, %v664_v26  ;;  %v662_v51 = vpop.permute.xlu0 %661 }
 0x1dd   : > { %v3726_v52 = vsel %vm924_vm11, %v921_v1, %v662_v51 }
 0x1df   : > { %v671_v49 = vpop.permute.xlu1 %670 }
 0x1e0   : > { %v669_v27 = vpop.permute.xlu0 %668  ;;  %v945_v2 = vsel %vm941_vm12, %v928_v54, %v671_v49 }
 0x1e1   : > { %v943_v5 = vsel %vm941_vm12, %v926_v12, %v669_v27 }
 0x1e3   : > { %v679_v3 = vpop.permute.xlu1 %678 }
 0x1e4   : > { %v677_v0 = vpop.permute.xlu0 %676  ;;  %v953_v14 = vsel %vm941_vm12, %v936_v32, %v679_v3 }
 0x1e5   : > { %v951_v39 = vsel %vm941_vm12, %v934_v45, %v677_v0 }
 0x1e7   : > { %v675_v7 = vpop.permute.xlu1 %674 }
 0x1e8   : > { %v673_v41 = vpop.permute.xlu0 %672  ;;  %v949_v32 = vsel %vm941_vm12, %v3717_v10, %v675_v7 }
 0x1e9   : > { %v947_v55 = vsel %vm941_vm12, %v3720_v46, %v673_v41 }
 0x1eb   : > { %v3728_v50 = vpop.permute.xlu1 %682 }
 0x1ec   : > { %v3730_v47 = vpop.permute.xlu0 %680 }
 0x1ef   : > { %v697_v16 = vpop.permute.xlu1 %696 }
 0x1f0   : > { %v695_v20 = vpop.permute.xlu0 %694  ;;  %v962_v28 = vsel %vm958_vm13, %v945_v2, %v697_v16  ;;  %v957_v16 = vsel %vm941_vm12, %v3723_v56, %v3728_v50 }
 0x1f1   : > { %v960_v48 = vsel %vm958_vm13, %v943_v5, %v695_v20 }
 0x1f3   : > { %v705_v15 = vpop.permute.xlu1 %704 }
 0x1f4   : > { %v703_v35 = vpop.permute.xlu0 %702  ;;  %v970_v29 = vsel %vm958_vm13, %v953_v14, %v705_v15  ;;  %v955_v15 = vsel %vm941_vm12, %v3726_v52, %v3730_v47 }
 0x1f5   : > { %v968_v1 = vsel %vm958_vm13, %v951_v39, %v703_v35 }
 0x1f7   : > { %v701_v59 = vpop.permute.xlu1 %700 }
 0x1f8   : > { %v699_v21 = vpop.permute.xlu0 %698  ;;  %v966_v26 = vsel %vm958_vm13, %v949_v32, %v701_v59 }
 0x1f9   : > { %v964_v49 = vsel %vm958_vm13, %v947_v55, %v699_v21 }
 0x1fb   : > { %v3732_v11 = vpop.permute.xlu1 %708 }
 0x1fc   : > { %v3734_v33 = vpop.permute.xlu0 %706  ;;  %v974_v35 = vsel %vm958_vm13, %v957_v16, %v3732_v11 }
 0x1fd   : > { %v972_v56 = vsel %vm958_vm13, %v955_v15, %v3734_v33 }
 0x1ff   : > { %v714_v57 = vpop.permute.xlu1 %713 }
 0x200   : > { %v712_v17 = vpop.permute.xlu0 %711  ;;  %v979_v8 = vsel %vm975_vm14, %v962_v28, %v714_v57 }
 0x201   : > { %v977_v4 = vsel %vm975_vm14, %v960_v48, %v712_v17 }
 0x203   : > { %v722_v60 = vpop.permute.xlu1 %721 }
 0x204   : > { %v720_v9 = vpop.permute.xlu0 %719  ;;  %v987_v42 = vsel %vm975_vm14, %v970_v29, %v722_v60 }
 0x205   : > { %v985_v25 = vsel %vm975_vm14, %v968_v1, %v720_v9 }
 0x207   : > { %v718_v37 = vpop.permute.xlu1 %717 }
 0x208   : > { %v716_v53 = vpop.permute.xlu0 %715  ;;  %v983_v27 = vsel %vm975_vm14, %v966_v26, %v718_v37 }
 0x209   : > { %v981_v10 = vsel %vm975_vm14, %v964_v49, %v716_v53 }
 0x20b   : > { %v726_v6 = vpop.permute.xlu1 %725 }
 0x20c   : > { %v991_v50 = vsel %vm975_vm14, %v974_v35, %v726_v6 }
 0x20d   : > { %v724_v13 = vpop.permute.xlu0 %723 }
 0x20e   : > { %v989_v57 = vsel %vm975_vm14, %v972_v56, %v724_v13 }
 0x20f   : > { %v733_v36 = vpop.permute.xlu1 %732 }
 0x210   : > { %v996_v44 = vsel %vm992_vm15, %v979_v8, %v733_v36 }
 0x211   : > { %v731_v34 = vpop.permute.xlu0 %730 }
 0x212   : > { %v994_v23 = vsel %vm992_vm15, %v977_v4, %v731_v34 }
 0x213   : > { %v741_v18 = vpop.permute.xlu1 %740 }
 0x214   : > { %v1004_v12 = vsel %vm992_vm15, %v987_v42, %v741_v18 }
 0x215   : > { %v739_v40 = vpop.permute.xlu0 %738 }
 0x216   : > { %v1002_v31 = vsel %vm992_vm15, %v985_v25, %v739_v40 }
 0x217   : > { %v737_v43 = vpop.permute.xlu1 %736 }
 0x218   : > { %v1000_v0 = vsel %vm992_vm15, %v983_v27, %v737_v43 }
 0x219   : > { %v735_v63 = vpop.permute.xlu0 %734 }
 0x21a   : > { %v998_v46 = vsel %vm992_vm15, %v981_v10, %v735_v63 }
 0x21b   : > { %v745_v24 = vpop.permute.xlu1 %744 }
 0x21c   : > { %v1008_v17 = vsel %vm992_vm15, %v991_v50, %v745_v24 }
 0x21d   : > { %v743_v22 = vpop.permute.xlu0 %742 }
 0x21e   : > { %v1006_v52 = vsel %vm992_vm15, %v989_v57, %v743_v22 }
 0x21f   : > { %v1590_v58 = vpop.permute.xlu1 %1589 }
 0x220   : > { %v1607_v61 = vsel %vm1603_vm0, %v996_v44, %v1590_v58 }
 0x221   : > { %v1588_v62 = vpop.permute.xlu0 %1587 }
 0x222   : > { %v1605_v38 = vsel %vm1603_vm0, %v994_v23, %v1588_v62 }
 0x223   : > { %v2037_v54 = vcombine.low %v1605_v38, %v1607_v61  ;;  %v1598_v30 = vpop.permute.xlu1 %1597 }
 0x224   : > { %v1615_v45 = vsel %vm1603_vm0, %v1004_v12, %v1598_v30 }
 0x225   : > { %2096 = vmatprep.mubr.msk.bf16.mxu0 %vm1695_vm1, %v2037_v54  ;;  %v1596_v19 = vpop.permute.xlu0 %1595 }
 0x226   : > { %v1613_v51 = vsel %vm1603_vm0, %v1002_v31, %v1596_v19 }
 0x227   : > { %v2039_v3 = vcombine.low %v1613_v51, %v1615_v45  ;;  %v1594_v7 = vpop.permute.xlu1 %1593 }
 0x228   : > { %v1611_v41 = vsel %vm1603_vm0, %v1000_v0, %v1594_v7 }
 0x229   : > { %2100 = vmatprep.mubr.msk.bf16.mxu1 %vm1695_vm1, %v2039_v3  ;;  %v1592_v20 = vpop.permute.xlu0 %1591 }
 0x22a   : > { %v1609_v59 = vsel %vm1603_vm0, %v998_v46, %v1592_v20 }
 0x22b   : > { %v2038_v21 = vcombine.low %v1609_v59, %v1611_v41  ;;  %v1602_v60 = vpop.permute.xlu1 %1601 }
 0x22c   : > { %v1619_v47 = vsel %vm1603_vm0, %v1008_v17, %v1602_v60 }
 0x22d   : > { %2097 = vmatmul.mubr.msk.bf16.vlgmr.msra.gmra.mrb[0].mxu0 %vm1695_vm1, %v2038_v21  ;;  %v1600_v11 = vpop.permute.xlu0 %1599 }
 0x22e   : > { %v1617_v9 = vsel %vm1603_vm0, %v1006_v52, %v1600_v11 }
 0x22f   : > { %v2040_v37 = vcombine.low %v1617_v9, %v1619_v47 }
 0x231   : > { %2101 = vmatmul.mubr.msk.bf16.vlgmr.msra.gmra.mrb[0].mxu1 %vm1695_vm1, %v2040_v37 }
 0x300   : > { %v2098_v33 = vpop.f32.mrb[0].mxu0 }
 0x301   : > { %v1779_v53 = vmul.f32 0.999995, %v2098_v33  ;;  %v1746_v6 = vpop.f32.mrb[1].mxu0 }
 0x302   : > { %v1777_v13 = vmul.f32 0.999995, %v1746_v6  ;;  %v2099_v36 = vpop.f32.mrb[2].mxu0 }
 0x303   : > { %v1787_v34 = vmax.f32 %v1779_v53, 0.0  ;;  %v1780_v18 = vmul.f32 0.999995, %v2099_v36  ;;  %v1749_v40 = vpop.f32.mrb[3].mxu0 }
 0x304   : > { %v1785_v43 = vmax.f32 %v1777_v13, 0.0  ;;  %v1778_v63 = vmul.f32 0.999995, %v1749_v40  ;;  %v2102_v24 = vpop.f32.mrb[0].mxu1 }
 0x305   : > { %v2065_v2 = vpack.c.bf16 %v1787_v34, %v1787_v34  ;;  %v1788_v22 = vmax.f32 %v1780_v18, 0.0  ;;  %v1783_v5 = vmul.f32 0.999995, %v2102_v24  ;;  %v1762_v28 = vpop.f32.mrb[1].mxu1 }
 0x306   : > { %v2063_v48 = vpack.c.bf16 %v1785_v43, %v1785_v43  ;;  %v1786_v8 = vmax.f32 %v1778_v63, 0.0  ;;  %v1781_v4 = vmul.f32 0.999995, %v1762_v28  ;;  %v2103_v44 = vpop.f32.mrb[2].mxu1 }
 0x307   : > { %1828 = vst.msk [vmem:[%s3794_s16 + $0x8] sm:$0xf] %vm1825_vm2, %v2065_v2  ;;  %v2066_v58 = vpack.c.bf16 %v1788_v22, %v1788_v22  ;;  %v1791_v14 = vmax.f32 %v1783_v5, 0.0  ;;  %v1784_v23 = vmul.f32 0.999995, %v2103_v44  ;;  %v1765_v61 = vpop.f32.mrb[3].mxu1 }
 0x308   : > { %1826 = vst.msk [vmem:[%s3794_s16] sm:$0xf] %vm1825_vm2, %v2063_v48  ;;  %v2064_v62 = vpack.c.bf16 %v1786_v8, %v1786_v8  ;;  %v1789_v39 = vmax.f32 %v1781_v4, 0.0  ;;  %v1782_v29 = vmul.f32 0.999995, %v1765_v61 }
 0x309   : > { %1829 = vst.msk [vmem:[%s3794_s16 + $0xc] sm:$0xf] %vm1825_vm2, %v2066_v58  ;;  %v2069_v38 = vpack.c.bf16 %v1791_v14, %v1791_v14  ;;  %v1792_v1 = vmax.f32 %v1784_v23, 0.0 }
 0x30a   : > { %1827 = vst.msk [vmem:[%s3794_s16 + $0x4] sm:$0xf] %vm1825_vm2, %v2064_v62  ;;  %v2067_v42 = vpack.c.bf16 %v1789_v39, %v1789_v39  ;;  %v1790_v54 = vmax.f32 %v1782_v29, 0.0 }
 0x30b   : > { %1832 = vst.msk [vmem:[%s3794_s16 + $0x18] sm:$0xf] %vm1825_vm2, %v2069_v38  ;;  %v2070_v25 = vpack.c.bf16 %v1792_v1, %v1792_v1 }
 0x30c   : > { %1830 = vst.msk [vmem:[%s3794_s16 + $0x10] sm:$0xf] %vm1825_vm2, %v2067_v42  ;;  %v2068_v12 = vpack.c.bf16 %v1790_v54, %v1790_v54 }
 0x30d   : > { %1833 = vst.msk [vmem:[%s3794_s16 + $0x1c] sm:$0xf] %vm1825_vm2, %v2070_v25 }
 0x30e   : > { %1831 = vst.msk [vmem:[%s3794_s16 + $0x14] sm:$0xf] %vm1825_vm2, %v2068_v12 }
 0x30f PF: > { %s12_s13 = sadd.s32 1, %s2290_s13   ;;  %s4073_s9 = smov %s2282_s11 }
 0x310   : > { %p9_p7 = scmp.ge.s32.totalorder %s12_s13, 10   ;;  %s4074_s10 = smov %s2286_s12 }
 0x311   : > { %s4075_s11 = smov %s4078_s14  ;;  %s4076_s12 = smov %s4082_s15 }
 0x312   :  { %11 = sbr.rel (!%p9_p7) target bundleno = 3 (0x3), region = 61 }

</bundles_post_ra>
